<compile_context>
chip_gen: v6e
topology: v6e:2x2x1
jax: 0.10.0
libtpu: 0.0.40
codegen_flags: <defaults>
</compile_context>

<pallas_src>
import jax
import jax.numpy as jnp
from jax import lax
from jax.experimental import pallas as pl
from jax.experimental.pallas import tpu as pltpu

MOTION_FEATURE_DIM = 8
TCN_OUTPUT_SEQUENCE_LENGTH = 6


def _round_up(x, m):
    return ((x + m - 1) // m) * m


# ----------------------------------------------------------------------------
# Fused kernel factory (num_layers / T / B_pad / H_pad / M_pad are compile-time
# constants).  Ref layout (L = num_layers):
#   refs[0]                : x        (T*B_pad, D_in)
#   refs[1 .. 4L]          : per layer: wih (d_in, 3*H_pad), whh (H_pad, 3*H_pad),
#                                       bgi (1, 3*H_pad)  [bih + bhh_{r,z} folded],
#                                       bhn (1, H_pad)    [bhh_n only]
#   refs[4L+1], refs[4L+2] : wp (H_pad, M_pad), bp (1, M_pad)
#   refs[4L+3]             : out_ref (Tp*B_pad, M_pad)
# ----------------------------------------------------------------------------
def _make_fused_kernel(num_layers, T, B_pad, H_pad, M_pad):
    def kernel(*refs):
        x_ref = refs[0]
        w_refs = refs[1:1 + 4 * num_layers]
        wp_ref = refs[1 + 4 * num_layers]
        bp_ref = refs[2 + 4 * num_layers]
        out_ref = refs[3 + 4 * num_layers]

        def wih(l): return w_refs[4 * l + 0]
        def whh(l): return w_refs[4 * l + 1]
        def bgi(l): return w_refs[4 * l + 2]
        def bhn(l): return w_refs[4 * l + 3]

        # Hoist all bias broadcasts out of the unrolled loop (no CSE of
        # broadcast_in_dim inside the loop otherwise).
        bgi_b = [jnp.broadcast_to(bgi(l)[...], (B_pad, 3 * H_pad))
                 for l in range(num_layers)]
        bhn_b = [jnp.broadcast_to(bhn(l)[...], (B_pad, H_pad))
                 for l in range(num_layers)]
        bp_b = jnp.broadcast_to(bp_ref[...], (B_pad, M_pad))

        # Layer-0 input projection hoisted for ALL timesteps in one MXU matmul
        # (its input is fully available; r/z recurrent biases already folded in).
        gi0_all = (jnp.dot(x_ref[...], wih(0)[...],
                           preferred_element_type=jnp.float32)
                   + bgi(0)[...])                          # (T*B_pad, 3*H_pad)

        def gru_step(h, gi, l):
            # gi already contains bih + bhh_{r,z}; only the n-gate recurrent bias
            # must stay inside r * (gh_n + bhh_n)  (PyTorch GRU semantics).
            if h is None:                                  # h_0 == 0 -> no recurrent dot
                r = jax.nn.sigmoid(gi[:, 0:H_pad])
                z = jax.nn.sigmoid(gi[:, H_pad:2 * H_pad])
                n = jnp.tanh(gi[:, 2 * H_pad:3 * H_pad] + r * bhn_b[l])
                return (1.0 - z) * n
            gh = jnp.dot(h, whh(l)[...], preferred_element_type=jnp.float32)
            r = jax.nn.sigmoid(gi[:, 0:H_pad] + gh[:, 0:H_pad])
            z = jax.nn.sigmoid(gi[:, H_pad:2 * H_pad] + gh[:, H_pad:2 * H_pad])
            n = jnp.tanh(gi[:, 2 * H_pad:3 * H_pad]
                         + r * (gh[:, 2 * H_pad:3 * H_pad] + bhn_b[l]))
            return (1.0 - z) * n + z * h

        hs = [None] * num_layers          # current hidden state per layer
        prev_top = None                   # previous top-layer output (pool pair)
        pool_idx = 0

        for t in range(T):                # fully unrolled wavefront
            y_t = None
            for l in range(num_layers):
                if l == 0:
                    gi = gi0_all[t * B_pad:(t + 1) * B_pad, :]   # aligned 8-row slice
                else:
                    # Per-step gi so layer l step t only depends on layer l-1 step t
                    # (wavefront: overlaps with layer l-1 step t+1).
                    gi = (jnp.dot(y_t, wih(l)[...],
                                  preferred_element_type=jnp.float32)
                          + bgi_b[l])
                hs[l] = gru_step(hs[l], gi, l)
                y_t = hs[l]

            # On-the-fly temporal max-pool (kernel=2, stride=2) of the top layer,
            # immediately projected and stored as one aligned (8, M_pad) tile.
            if t % 2 == 1:
                pooled = jnp.maximum(prev_top, y_t)
                out_ref[pool_idx * B_pad:(pool_idx + 1) * B_pad, :] = (
                    jnp.dot(pooled, wp_ref[...],
                            preferred_element_type=jnp.float32) + bp_b)
                pool_idx += 1
            prev_top = y_t

    return kernel


# ----------------------------------------------------------------------------
# Parameter padding / bias folding (wrapper-side, plain JAX).
#   * gate weights -> lane-aligned layout: gate g lives in cols [g*H_pad, g*H_pad+H)
#   * bhh_{r,z} folded into the input-gate bias; bhh_n kept separate
#   * projection padded to (H_pad, M_pad)
# ----------------------------------------------------------------------------
def _pad_params(params):
    H, M = params["wp"].shape
    H_pad = _round_up(H, 128)
    M_pad = _round_up(M, 128)

    padded_layers = []
    for l, lp in enumerate(params["gru_layers"]):
        wih, whh, bih, bhh = lp["wih"], lp["whh"], lp["bih"], lp["bhh"]
        d_in = wih.shape[0]
        d_in_pad = d_in if l == 0 else H_pad

        wih_p = jnp.zeros((d_in_pad, 3 * H_pad), jnp.float32)
        whh_p = jnp.zeros((H_pad, 3 * H_pad), jnp.float32)
        bgi_p = jnp.zeros((1, 3 * H_pad), jnp.float32)
        for g in range(3):
            wih_p = wih_p.at[:d_in, g * H_pad:g * H_pad + H].set(
                wih[:, g * H:(g + 1) * H])
            whh_p = whh_p.at[:H, g * H_pad:g * H_pad + H].set(
                whh[:, g * H:(g + 1) * H])
            b = bih[:, g * H:(g + 1) * H]
            if g < 2:                                   # fold r/z recurrent biases
                b = b + bhh[:, g * H:(g + 1) * H]
            bgi_p = bgi_p.at[:, g * H_pad:g * H_pad + H].set(b)
        bhn_p = jnp.zeros((1, H_pad), jnp.float32).at[:, :H].set(bhh[:, 2 * H:3 * H])
        padded_layers.append((wih_p, whh_p, bgi_p, bhn_p))

    wp_p = jnp.zeros((H_pad, M_pad), jnp.float32).at[:H, :M].set(params["wp"])
    bp_p = jnp.zeros((1, M_pad), jnp.float32).at[:, :M].set(params["bp"])
    return padded_layers, wp_p, bp_p, H_pad, M_pad


def temporal_cnn_fused_call(x_flat, padded_layers, wp_p, bp_p, T, B_pad, H_pad, M_pad):
    num_layers = len(padded_layers)
    Tp = T // 2

    flat_w = []
    for w4 in padded_layers:
        flat_w += list(w4)

    kernel = _make_fused_kernel(num_layers, T, B_pad, H_pad, M_pad)
    n_in = 1 + len(flat_w) + 2
    # Grid-less single invocation: everything (inputs, weights, output) is a few
    # hundred KB -> fully VMEM resident, no scratch, no HBM round trips.
    # For production batch sizes, add a leading "parallel" batch-tile grid axis
    # (2x on v7x's two TensorCores) and re-budget VMEM for 64 MiB.
    return pl.pallas_call(
        kernel,
        out_shape=jax.ShapeDtypeStruct((Tp * B_pad, M_pad), jnp.float32),
        in_specs=[pl.BlockSpec(memory_space=pltpu.MemorySpace.VMEM)] * n_in,
        out_specs=pl.BlockSpec(memory_space=pltpu.MemorySpace.VMEM),
    )(x_flat, *flat_w, wp_p, bp_p)


# ----------------------------------------------------------------------------
# Parameter construction (PyTorch-style uniform(-1/sqrt(H), 1/sqrt(H)); gate
# weights pre-concatenated/transposed: wih (D_in, 3H), whh (H, 3H)).
# ----------------------------------------------------------------------------
def init_params(key, input_size, hidden_size, num_layers, motion_dim):
    bound = 1.0 / (hidden_size ** 0.5)
    layers = []
    for layer in range(num_layers):
        d_in = input_size if layer == 0 else hidden_size
        key, k1, k2, k3, k4 = jax.random.split(key, 5)
        layers.append({
            "wih": jax.random.uniform(k1, (d_in, 3 * hidden_size), jnp.float32, -bound, bound),
            "whh": jax.random.uniform(k2, (hidden_size, 3 * hidden_size), jnp.float32, -bound, bound),
            "bih": jax.random.uniform(k3, (1, 3 * hidden_size), jnp.float32, -bound, bound),
            "bhh": jax.random.uniform(k4, (1, 3 * hidden_size), jnp.float32, -bound, bound),
        })
    key, k5, k6 = jax.random.split(key, 3)
    wp = jax.random.uniform(k5, (hidden_size, motion_dim), jnp.float32, -bound, bound)
    bp = jax.random.uniform(k6, (1, motion_dim), jnp.float32, -bound, bound)
    return {"gru_layers": layers, "wp": wp, "bp": bp}


# ----------------------------------------------------------------------------
# Forward pass matching TemporalCNN.forward
# ----------------------------------------------------------------------------
def temporal_cnn_forward(x, params, output_sequence_length=TCN_OUTPUT_SEQUENCE_LENGTH):
    # x: (B, T, input_size), batch-first like nn.GRU(batch_first=True)
    B, T, D = x.shape
    M = params["wp"].shape[1]
    Tp = T // 2

    B_pad = _round_up(max(B, 1), 8)      # one full sublane tile per timestep block
    padded_layers, wp_p, bp_p, H_pad, M_pad = _pad_params(params)

    # time-major, batch padded: row = t*B_pad + b
    x_tm = jnp.transpose(x.astype(jnp.float32), (1, 0, 2))           # (T, B, D)
    x_tm = jnp.pad(x_tm, ((0, 0), (0, B_pad - B), (0, 0)))
    x_flat = x_tm.reshape(T * B_pad, D)

    out_flat = temporal_cnn_fused_call(
        x_flat, padded_layers, wp_p, bp_p, T, B_pad, H_pad, M_pad)   # (Tp*B_pad, M_pad)

    out = out_flat.reshape(Tp, B_pad, M_pad)[:, :B, :M].transpose(1, 0, 2)  # (B, Tp, M)

    # pad / truncate sequence length (pure shape glue, plain JAX)
    if Tp > output_sequence_length:
        out = out[:, :output_sequence_length, :]
    elif Tp < output_sequence_length:
        pad = jnp.zeros((B, output_sequence_length - Tp, M), out.dtype)
        out = jnp.concatenate([out, pad], axis=1)
    return out


# ----------------------------------------------------------------------------
# Pure-JAX reference (same math) for a correctness check
# ----------------------------------------------------------------------------
def _reference_forward(x, params, output_sequence_length=TCN_OUTPUT_SEQUENCE_LENGTH):
    B, T, _ = x.shape
    H = params["wp"].shape[0]
    y = x.astype(jnp.float32)
    for lp in params["gru_layers"]:
        wih, whh, bih, bhh = lp["wih"], lp["whh"], lp["bih"], lp["bhh"]

        def step(h, x_t):
            gi = x_t @ wih + bih[0]
            gh = h @ whh + bhh[0]
            r = jax.nn.sigmoid(gi[:, :H] + gh[:, :H])
            z = jax.nn.sigmoid(gi[:, H:2 * H] + gh[:, H:2 * H])
            n = jnp.tanh(gi[:, 2 * H:] + r * gh[:, 2 * H:])
            h_new = (1.0 - z) * n + z * h
            return h_new, h_new

        h0 = jnp.zeros((B, H), jnp.float32)
        _, ys = lax.scan(step, h0, jnp.transpose(y, (1, 0, 2)))
        y = jnp.transpose(ys, (1, 0, 2))
    Tp = T // 2
    pooled = jnp.maximum(y[:, 0:2 * Tp:2, :], y[:, 1:2 * Tp:2, :])
    out = pooled @ params["wp"] + params["bp"][0]
    if Tp > output_sequence_length:
        out = out[:, :output_sequence_length]
    elif Tp < output_sequence_length:
        pad = jnp.zeros((B, output_sequence_length - Tp, out.shape[-1]), out.dtype)
        out = jnp.concatenate([out, pad], axis=1)
    return out


if __name__ == "__main__":
    B, T = 2, 8
    INPUT_SIZE, HIDDEN_SIZE, NUM_LAYERS = 4, 32, 2

    key = jax.random.PRNGKey(0)
    key, pkey, xkey = jax.random.split(key, 3)
    params = init_params(pkey, INPUT_SIZE, HIDDEN_SIZE, NUM_LAYERS, MOTION_FEATURE_DIM)
    x = jax.random.normal(xkey, (B, T, INPUT_SIZE), dtype=jnp.float32)

    fwd = jax.jit(lambda xx: temporal_cnn_forward(xx, params))
    out = fwd(x)
    jax.block_until_ready(out)

    assert out.shape == (B, TCN_OUTPUT_SEQUENCE_LENGTH, MOTION_FEATURE_DIM), out.shape

    ref = _reference_forward(x, params)
    assert jnp.allclose(out, ref, atol=2e-3, rtol=2e-3), float(jnp.max(jnp.abs(out - ref)))

    print("KERNEL_OK")
</pallas_src>

<mosaic_0001>
module attributes {stable_mosaic.version = 11 : i64} {
  func.func @kernel(%arg0: memref<64x4xf32, #tpu.memory_space<vmem>>, %arg1: memref<4x384xf32, #tpu.memory_space<vmem>>, %arg2: memref<128x384xf32, #tpu.memory_space<vmem>>, %arg3: memref<1x384xf32, #tpu.memory_space<vmem>>, %arg4: memref<1x128xf32, #tpu.memory_space<vmem>>, %arg5: memref<128x384xf32, #tpu.memory_space<vmem>>, %arg6: memref<128x384xf32, #tpu.memory_space<vmem>>, %arg7: memref<1x384xf32, #tpu.memory_space<vmem>>, %arg8: memref<1x128xf32, #tpu.memory_space<vmem>>, %arg9: memref<128x128xf32, #tpu.memory_space<vmem>>, %arg10: memref<1x128xf32, #tpu.memory_space<vmem>>, %arg11: memref<32x128xf32, #tpu.memory_space<vmem>>) attributes {dimension_semantics = [], scalar_prefetch = 0 : i64, scratch_operands = 0 : i64, tpu.core_type = #tpu.core_type<tc>} {
    %c0 = arith.constant 0 : index
    %c0_0 = arith.constant 0 : index
    %0 = vector.load %arg7[%c0, %c0_0] : memref<1x384xf32, #tpu.memory_space<vmem>>, vector<1x384xf32>
    %1 = vector.shape_cast %0 : vector<1x384xf32> to vector<1x384xf32>
    %2 = vector.broadcast %1 : vector<1x384xf32> to vector<8x384xf32>
    %c0_1 = arith.constant 0 : index
    %c0_2 = arith.constant 0 : index
    %3 = vector.load %arg4[%c0_1, %c0_2] : memref<1x128xf32, #tpu.memory_space<vmem>>, vector<1x128xf32>
    %4 = vector.shape_cast %3 : vector<1x128xf32> to vector<1x128xf32>
    %5 = vector.broadcast %4 : vector<1x128xf32> to vector<8x128xf32>
    %c0_3 = arith.constant 0 : index
    %c0_4 = arith.constant 0 : index
    %6 = vector.load %arg8[%c0_3, %c0_4] : memref<1x128xf32, #tpu.memory_space<vmem>>, vector<1x128xf32>
    %7 = vector.shape_cast %6 : vector<1x128xf32> to vector<1x128xf32>
    %8 = vector.broadcast %7 : vector<1x128xf32> to vector<8x128xf32>
    %c0_5 = arith.constant 0 : index
    %c0_6 = arith.constant 0 : index
    %9 = vector.load %arg10[%c0_5, %c0_6] : memref<1x128xf32, #tpu.memory_space<vmem>>, vector<1x128xf32>
    %10 = vector.shape_cast %9 : vector<1x128xf32> to vector<1x128xf32>
    %11 = vector.broadcast %10 : vector<1x128xf32> to vector<8x128xf32>
    %c0_7 = arith.constant 0 : index
    %c0_8 = arith.constant 0 : index
    %12 = vector.load %arg0[%c0_7, %c0_8] : memref<64x4xf32, #tpu.memory_space<vmem>>, vector<64x4xf32>
    %c0_9 = arith.constant 0 : index
    %c0_10 = arith.constant 0 : index
    %13 = vector.load %arg1[%c0_9, %c0_10] : memref<4x384xf32, #tpu.memory_space<vmem>>, vector<4x384xf32>
    %cst = arith.constant dense<0.000000e+00> : vector<64x384xf32>
    %14 = tpu.matmul %12, %13, %cst {dimension_numbers = #tpu.dot_dimension_numbers<[1], [0], [0], [1], [0, 0, 1, 1], [], []>} : vector<64x4xf32>, vector<4x384xf32>, vector<64x384xf32> -> vector<64x384xf32>
    %c0_11 = arith.constant 0 : index
    %c0_12 = arith.constant 0 : index
    %15 = vector.load %arg3[%c0_11, %c0_12] : memref<1x384xf32, #tpu.memory_space<vmem>>, vector<1x384xf32>
    %16 = vector.broadcast %15 : vector<1x384xf32> to vector<64x384xf32>
    %17 = arith.addf %14, %16 : vector<64x384xf32>
    %18 = vector.extract_strided_slice %17 {offsets = [0, 0], sizes = [8, 384], strides = [1, 1]} : vector<64x384xf32> to vector<8x384xf32>
    %19 = vector.extract_strided_slice %18 {offsets = [0, 0], sizes = [8, 128], strides = [1, 1]} : vector<8x384xf32> to vector<8x128xf32>
    %20 = arith.negf %19 : vector<8x128xf32>
    %21 = math.exp %20 : vector<8x128xf32>
    %cst_13 = arith.constant 1.000000e+00 : f32
    %22 = vector.broadcast %cst_13 : f32 to vector<8x128xf32>
    %23 = arith.addf %22, %21 : vector<8x128xf32>
    %24 = arith.divf %22, %23 : vector<8x128xf32>
    %25 = vector.extract_strided_slice %18 {offsets = [0, 128], sizes = [8, 128], strides = [1, 1]} : vector<8x384xf32> to vector<8x128xf32>
    %26 = arith.negf %25 : vector<8x128xf32>
    %27 = math.exp %26 : vector<8x128xf32>
    %cst_14 = arith.constant 1.000000e+00 : f32
    %28 = vector.broadcast %cst_14 : f32 to vector<8x128xf32>
    %29 = arith.addf %28, %27 : vector<8x128xf32>
    %30 = arith.divf %28, %29 : vector<8x128xf32>
    %31 = vector.extract_strided_slice %18 {offsets = [0, 256], sizes = [8, 128], strides = [1, 1]} : vector<8x384xf32> to vector<8x128xf32>
    %32 = arith.mulf %24, %5 : vector<8x128xf32>
    %33 = arith.addf %31, %32 : vector<8x128xf32>
    %34 = math.tanh %33 : vector<8x128xf32>
    %cst_15 = arith.constant 1.000000e+00 : f32
    %35 = vector.broadcast %cst_15 : f32 to vector<8x128xf32>
    %36 = arith.subf %35, %30 : vector<8x128xf32>
    %37 = arith.mulf %36, %34 : vector<8x128xf32>
    %c0_16 = arith.constant 0 : index
    %c0_17 = arith.constant 0 : index
    %38 = vector.load %arg5[%c0_16, %c0_17] : memref<128x384xf32, #tpu.memory_space<vmem>>, vector<128x384xf32>
    %cst_18 = arith.constant dense<0.000000e+00> : vector<8x384xf32>
    %39 = tpu.matmul %37, %38, %cst_18 {dimension_numbers = #tpu.dot_dimension_numbers<[1], [0], [0], [1], [0, 0, 1, 1], [], []>} : vector<8x128xf32>, vector<128x384xf32>, vector<8x384xf32> -> vector<8x384xf32>
    %40 = arith.addf %39, %2 : vector<8x384xf32>
    %41 = vector.extract_strided_slice %40 {offsets = [0, 0], sizes = [8, 128], strides = [1, 1]} : vector<8x384xf32> to vector<8x128xf32>
    %42 = arith.negf %41 : vector<8x128xf32>
    %43 = math.exp %42 : vector<8x128xf32>
    %cst_19 = arith.constant 1.000000e+00 : f32
    %44 = vector.broadcast %cst_19 : f32 to vector<8x128xf32>
    %45 = arith.addf %44, %43 : vector<8x128xf32>
    %46 = arith.divf %44, %45 : vector<8x128xf32>
    %47 = vector.extract_strided_slice %40 {offsets = [0, 128], sizes = [8, 128], strides = [1, 1]} : vector<8x384xf32> to vector<8x128xf32>
    %48 = arith.negf %47 : vector<8x128xf32>
    %49 = math.exp %48 : vector<8x128xf32>
    %cst_20 = arith.constant 1.000000e+00 : f32
    %50 = vector.broadcast %cst_20 : f32 to vector<8x128xf32>
    %51 = arith.addf %50, %49 : vector<8x128xf32>
    %52 = arith.divf %50, %51 : vector<8x128xf32>
    %53 = vector.extract_strided_slice %40 {offsets = [0, 256], sizes = [8, 128], strides = [1, 1]} : vector<8x384xf32> to vector<8x128xf32>
    %54 = arith.mulf %46, %8 : vector<8x128xf32>
    %55 = arith.addf %53, %54 : vector<8x128xf32>
    %56 = math.tanh %55 : vector<8x128xf32>
    %cst_21 = arith.constant 1.000000e+00 : f32
    %57 = vector.broadcast %cst_21 : f32 to vector<8x128xf32>
    %58 = arith.subf %57, %52 : vector<8x128xf32>
    %59 = arith.mulf %58, %56 : vector<8x128xf32>
    %60 = vector.extract_strided_slice %17 {offsets = [8, 0], sizes = [8, 384], strides = [1, 1]} : vector<64x384xf32> to vector<8x384xf32>
    %c0_22 = arith.constant 0 : index
    %c0_23 = arith.constant 0 : index
    %61 = vector.load %arg2[%c0_22, %c0_23] : memref<128x384xf32, #tpu.memory_space<vmem>>, vector<128x384xf32>
    %cst_24 = arith.constant dense<0.000000e+00> : vector<8x384xf32>
    %62 = tpu.matmul %37, %61, %cst_24 {dimension_numbers = #tpu.dot_dimension_numbers<[1], [0], [0], [1], [0, 0, 1, 1], [], []>} : vector<8x128xf32>, vector<128x384xf32>, vector<8x384xf32> -> vector<8x384xf32>
    %63 = vector.extract_strided_slice %60 {offsets = [0, 0], sizes = [8, 128], strides = [1, 1]} : vector<8x384xf32> to vector<8x128xf32>
    %64 = vector.extract_strided_slice %62 {offsets = [0, 0], sizes = [8, 128], strides = [1, 1]} : vector<8x384xf32> to vector<8x128xf32>
    %65 = arith.addf %63, %64 : vector<8x128xf32>
    %66 = arith.negf %65 : vector<8x128xf32>
    %67 = math.exp %66 : vector<8x128xf32>
    %cst_25 = arith.constant 1.000000e+00 : f32
    %68 = vector.broadcast %cst_25 : f32 to vector<8x128xf32>
    %69 = arith.addf %68, %67 : vector<8x128xf32>
    %70 = arith.divf %68, %69 : vector<8x128xf32>
    %71 = vector.extract_strided_slice %60 {offsets = [0, 128], sizes = [8, 128], strides = [1, 1]} : vector<8x384xf32> to vector<8x128xf32>
    %72 = vector.extract_strided_slice %62 {offsets = [0, 128], sizes = [8, 128], strides = [1, 1]} : vector<8x384xf32> to vector<8x128xf32>
    %73 = arith.addf %71, %72 : vector<8x128xf32>
    %74 = arith.negf %73 : vector<8x128xf32>
    %75 = math.exp %74 : vector<8x128xf32>
    %cst_26 = arith.constant 1.000000e+00 : f32
    %76 = vector.broadcast %cst_26 : f32 to vector<8x128xf32>
    %77 = arith.addf %76, %75 : vector<8x128xf32>
    %78 = arith.divf %76, %77 : vector<8x128xf32>
    %79 = vector.extract_strided_slice %60 {offsets = [0, 256], sizes = [8, 128], strides = [1, 1]} : vector<8x384xf32> to vector<8x128xf32>
    %80 = vector.extract_strided_slice %62 {offsets = [0, 256], sizes = [8, 128], strides = [1, 1]} : vector<8x384xf32> to vector<8x128xf32>
    %81 = arith.addf %80, %5 : vector<8x128xf32>
    %82 = arith.mulf %70, %81 : vector<8x128xf32>
    %83 = arith.addf %79, %82 : vector<8x128xf32>
    %84 = math.tanh %83 : vector<8x128xf32>
    %cst_27 = arith.constant 1.000000e+00 : f32
    %85 = vector.broadcast %cst_27 : f32 to vector<8x128xf32>
    %86 = arith.subf %85, %78 : vector<8x128xf32>
    %87 = arith.mulf %86, %84 : vector<8x128xf32>
    %88 = arith.mulf %78, %37 : vector<8x128xf32>
    %89 = arith.addf %87, %88 : vector<8x128xf32>
    %c0_28 = arith.constant 0 : index
    %c0_29 = arith.constant 0 : index
    %90 = vector.load %arg5[%c0_28, %c0_29] : memref<128x384xf32, #tpu.memory_space<vmem>>, vector<128x384xf32>
    %cst_30 = arith.constant dense<0.000000e+00> : vector<8x384xf32>
    %91 = tpu.matmul %89, %90, %cst_30 {dimension_numbers = #tpu.dot_dimension_numbers<[1], [0], [0], [1], [0, 0, 1, 1], [], []>} : vector<8x128xf32>, vector<128x384xf32>, vector<8x384xf32> -> vector<8x384xf32>
    %92 = arith.addf %91, %2 : vector<8x384xf32>
    %c0_31 = arith.constant 0 : index
    %c0_32 = arith.constant 0 : index
    %93 = vector.load %arg6[%c0_31, %c0_32] : memref<128x384xf32, #tpu.memory_space<vmem>>, vector<128x384xf32>
    %cst_33 = arith.constant dense<0.000000e+00> : vector<8x384xf32>
    %94 = tpu.matmul %59, %93, %cst_33 {dimension_numbers = #tpu.dot_dimension_numbers<[1], [0], [0], [1], [0, 0, 1, 1], [], []>} : vector<8x128xf32>, vector<128x384xf32>, vector<8x384xf32> -> vector<8x384xf32>
    %95 = vector.extract_strided_slice %92 {offsets = [0, 0], sizes = [8, 128], strides = [1, 1]} : vector<8x384xf32> to vector<8x128xf32>
    %96 = vector.extract_strided_slice %94 {offsets = [0, 0], sizes = [8, 128], strides = [1, 1]} : vector<8x384xf32> to vector<8x128xf32>
    %97 = arith.addf %95, %96 : vector<8x128xf32>
    %98 = arith.negf %97 : vector<8x128xf32>
    %99 = math.exp %98 : vector<8x128xf32>
    %cst_34 = arith.constant 1.000000e+00 : f32
    %100 = vector.broadcast %cst_34 : f32 to vector<8x128xf32>
    %101 = arith.addf %100, %99 : vector<8x128xf32>
    %102 = arith.divf %100, %101 : vector<8x128xf32>
    %103 = vector.extract_strided_slice %92 {offsets = [0, 128], sizes = [8, 128], strides = [1, 1]} : vector<8x384xf32> to vector<8x128xf32>
    %104 = vector.extract_strided_slice %94 {offsets = [0, 128], sizes = [8, 128], strides = [1, 1]} : vector<8x384xf32> to vector<8x128xf32>
    %105 = arith.addf %103, %104 : vector<8x128xf32>
    %106 = arith.negf %105 : vector<8x128xf32>
    %107 = math.exp %106 : vector<8x128xf32>
    %cst_35 = arith.constant 1.000000e+00 : f32
    %108 = vector.broadcast %cst_35 : f32 to vector<8x128xf32>
    %109 = arith.addf %108, %107 : vector<8x128xf32>
    %110 = arith.divf %108, %109 : vector<8x128xf32>
    %111 = vector.extract_strided_slice %92 {offsets = [0, 256], sizes = [8, 128], strides = [1, 1]} : vector<8x384xf32> to vector<8x128xf32>
    %112 = vector.extract_strided_slice %94 {offsets = [0, 256], sizes = [8, 128], strides = [1, 1]} : vector<8x384xf32> to vector<8x128xf32>
    %113 = arith.addf %112, %8 : vector<8x128xf32>
    %114 = arith.mulf %102, %113 : vector<8x128xf32>
    %115 = arith.addf %111, %114 : vector<8x128xf32>
    %116 = math.tanh %115 : vector<8x128xf32>
    %cst_36 = arith.constant 1.000000e+00 : f32
    %117 = vector.broadcast %cst_36 : f32 to vector<8x128xf32>
    %118 = arith.subf %117, %110 : vector<8x128xf32>
    %119 = arith.mulf %118, %116 : vector<8x128xf32>
    %120 = arith.mulf %110, %59 : vector<8x128xf32>
    %121 = arith.addf %119, %120 : vector<8x128xf32>
    %122 = arith.maximumf %59, %121 : vector<8x128xf32>
    %c0_37 = arith.constant 0 : index
    %c0_38 = arith.constant 0 : index
    %123 = vector.load %arg9[%c0_37, %c0_38] : memref<128x128xf32, #tpu.memory_space<vmem>>, vector<128x128xf32>
    %cst_39 = arith.constant dense<0.000000e+00> : vector<8x128xf32>
    %124 = tpu.matmul %122, %123, %cst_39 {dimension_numbers = #tpu.dot_dimension_numbers<[1], [0], [0], [1], [0, 0, 1, 1], [], []>} : vector<8x128xf32>, vector<128x128xf32>, vector<8x128xf32> -> vector<8x128xf32>
    %125 = arith.addf %124, %11 : vector<8x128xf32>
    %c0_40 = arith.constant 0 : index
    %c0_41 = arith.constant 0 : index
    %126 = vector.load %arg11[%c0_40, %c0_41] : memref<32x128xf32, #tpu.memory_space<vmem>>, vector<8x128xf32>
    tpu.vector_store %arg11[%c0_40, %c0_41], %125 {strides = array<i32>} : memref<32x128xf32, #tpu.memory_space<vmem>>, vector<8x128xf32>,
    %127 = vector.extract_strided_slice %17 {offsets = [16, 0], sizes = [8, 384], strides = [1, 1]} : vector<64x384xf32> to vector<8x384xf32>
    %c0_42 = arith.constant 0 : index
    %c0_43 = arith.constant 0 : index
    %128 = vector.load %arg2[%c0_42, %c0_43] : memref<128x384xf32, #tpu.memory_space<vmem>>, vector<128x384xf32>
    %cst_44 = arith.constant dense<0.000000e+00> : vector<8x384xf32>
    %129 = tpu.matmul %89, %128, %cst_44 {dimension_numbers = #tpu.dot_dimension_numbers<[1], [0], [0], [1], [0, 0, 1, 1], [], []>} : vector<8x128xf32>, vector<128x384xf32>, vector<8x384xf32> -> vector<8x384xf32>
    %130 = vector.extract_strided_slice %127 {offsets = [0, 0], sizes = [8, 128], strides = [1, 1]} : vector<8x384xf32> to vector<8x128xf32>
    %131 = vector.extract_strided_slice %129 {offsets = [0, 0], sizes = [8, 128], strides = [1, 1]} : vector<8x384xf32> to vector<8x128xf32>
    %132 = arith.addf %130, %131 : vector<8x128xf32>
    %133 = arith.negf %132 : vector<8x128xf32>
    %134 = math.exp %133 : vector<8x128xf32>
    %cst_45 = arith.constant 1.000000e+00 : f32
    %135 = vector.broadcast %cst_45 : f32 to vector<8x128xf32>
    %136 = arith.addf %135, %134 : vector<8x128xf32>
    %137 = arith.divf %135, %136 : vector<8x128xf32>
    %138 = vector.extract_strided_slice %127 {offsets = [0, 128], sizes = [8, 128], strides = [1, 1]} : vector<8x384xf32> to vector<8x128xf32>
    %139 = vector.extract_strided_slice %129 {offsets = [0, 128], sizes = [8, 128], strides = [1, 1]} : vector<8x384xf32> to vector<8x128xf32>
    %140 = arith.addf %138, %139 : vector<8x128xf32>
    %141 = arith.negf %140 : vector<8x128xf32>
    %142 = math.exp %141 : vector<8x128xf32>
    %cst_46 = arith.constant 1.000000e+00 : f32
    %143 = vector.broadcast %cst_46 : f32 to vector<8x128xf32>
    %144 = arith.addf %143, %142 : vector<8x128xf32>
    %145 = arith.divf %143, %144 : vector<8x128xf32>
    %146 = vector.extract_strided_slice %127 {offsets = [0, 256], sizes = [8, 128], strides = [1, 1]} : vector<8x384xf32> to vector<8x128xf32>
    %147 = vector.extract_strided_slice %129 {offsets = [0, 256], sizes = [8, 128], strides = [1, 1]} : vector<8x384xf32> to vector<8x128xf32>
    %148 = arith.addf %147, %5 : vector<8x128xf32>
    %149 = arith.mulf %137, %148 : vector<8x128xf32>
    %150 = arith.addf %146, %149 : vector<8x128xf32>
    %151 = math.tanh %150 : vector<8x128xf32>
    %cst_47 = arith.constant 1.000000e+00 : f32
    %152 = vector.broadcast %cst_47 : f32 to vector<8x128xf32>
    %153 = arith.subf %152, %145 : vector<8x128xf32>
    %154 = arith.mulf %153, %151 : vector<8x128xf32>
    %155 = arith.mulf %145, %89 : vector<8x128xf32>
    %156 = arith.addf %154, %155 : vector<8x128xf32>
    %c0_48 = arith.constant 0 : index
    %c0_49 = arith.constant 0 : index
    %157 = vector.load %arg5[%c0_48, %c0_49] : memref<128x384xf32, #tpu.memory_space<vmem>>, vector<128x384xf32>
    %cst_50 = arith.constant dense<0.000000e+00> : vector<8x384xf32>
    %158 = tpu.matmul %156, %157, %cst_50 {dimension_numbers = #tpu.dot_dimension_numbers<[1], [0], [0], [1], [0, 0, 1, 1], [], []>} : vector<8x128xf32>, vector<128x384xf32>, vector<8x384xf32> -> vector<8x384xf32>
    %159 = arith.addf %158, %2 : vector<8x384xf32>
    %c0_51 = arith.constant 0 : index
    %c0_52 = arith.constant 0 : index
    %160 = vector.load %arg6[%c0_51, %c0_52] : memref<128x384xf32, #tpu.memory_space<vmem>>, vector<128x384xf32>
    %cst_53 = arith.constant dense<0.000000e+00> : vector<8x384xf32>
    %161 = tpu.matmul %121, %160, %cst_53 {dimension_numbers = #tpu.dot_dimension_numbers<[1], [0], [0], [1], [0, 0, 1, 1], [], []>} : vector<8x128xf32>, vector<128x384xf32>, vector<8x384xf32> -> vector<8x384xf32>
    %162 = vector.extract_strided_slice %159 {offsets = [0, 0], sizes = [8, 128], strides = [1, 1]} : vector<8x384xf32> to vector<8x128xf32>
    %163 = vector.extract_strided_slice %161 {offsets = [0, 0], sizes = [8, 128], strides = [1, 1]} : vector<8x384xf32> to vector<8x128xf32>
    %164 = arith.addf %162, %163 : vector<8x128xf32>
    %165 = arith.negf %164 : vector<8x128xf32>
    %166 = math.exp %165 : vector<8x128xf32>
    %cst_54 = arith.constant 1.000000e+00 : f32
    %167 = vector.broadcast %cst_54 : f32 to vector<8x128xf32>
    %168 = arith.addf %167, %166 : vector<8x128xf32>
    %169 = arith.divf %167, %168 : vector<8x128xf32>
    %170 = vector.extract_strided_slice %159 {offsets = [0, 128], sizes = [8, 128], strides = [1, 1]} : vector<8x384xf32> to vector<8x128xf32>
    %171 = vector.extract_strided_slice %161 {offsets = [0, 128], sizes = [8, 128], strides = [1, 1]} : vector<8x384xf32> to vector<8x128xf32>
    %172 = arith.addf %170, %171 : vector<8x128xf32>
    %173 = arith.negf %172 : vector<8x128xf32>
    %174 = math.exp %173 : vector<8x128xf32>
    %cst_55 = arith.constant 1.000000e+00 : f32
    %175 = vector.broadcast %cst_55 : f32 to vector<8x128xf32>
    %176 = arith.addf %175, %174 : vector<8x128xf32>
    %177 = arith.divf %175, %176 : vector<8x128xf32>
    %178 = vector.extract_strided_slice %159 {offsets = [0, 256], sizes = [8, 128], strides = [1, 1]} : vector<8x384xf32> to vector<8x128xf32>
    %179 = vector.extract_strided_slice %161 {offsets = [0, 256], sizes = [8, 128], strides = [1, 1]} : vector<8x384xf32> to vector<8x128xf32>
    %180 = arith.addf %179, %8 : vector<8x128xf32>
    %181 = arith.mulf %169, %180 : vector<8x128xf32>
    %182 = arith.addf %178, %181 : vector<8x128xf32>
    %183 = math.tanh %182 : vector<8x128xf32>
    %cst_56 = arith.constant 1.000000e+00 : f32
    %184 = vector.broadcast %cst_56 : f32 to vector<8x128xf32>
    %185 = arith.subf %184, %177 : vector<8x128xf32>
    %186 = arith.mulf %185, %183 : vector<8x128xf32>
    %187 = arith.mulf %177, %121 : vector<8x128xf32>
    %188 = arith.addf %186, %187 : vector<8x128xf32>
    %189 = vector.extract_strided_slice %17 {offsets = [24, 0], sizes = [8, 384], strides = [1, 1]} : vector<64x384xf32> to vector<8x384xf32>
    %c0_57 = arith.constant 0 : index
    %c0_58 = arith.constant 0 : index
    %190 = vector.load %arg2[%c0_57, %c0_58] : memref<128x384xf32, #tpu.memory_space<vmem>>, vector<128x384xf32>
    %cst_59 = arith.constant dense<0.000000e+00> : vector<8x384xf32>
    %191 = tpu.matmul %156, %190, %cst_59 {dimension_numbers = #tpu.dot_dimension_numbers<[1], [0], [0], [1], [0, 0, 1, 1], [], []>} : vector<8x128xf32>, vector<128x384xf32>, vector<8x384xf32> -> vector<8x384xf32>
    %192 = vector.extract_strided_slice %189 {offsets = [0, 0], sizes = [8, 128], strides = [1, 1]} : vector<8x384xf32> to vector<8x128xf32>
    %193 = vector.extract_strided_slice %191 {offsets = [0, 0], sizes = [8, 128], strides = [1, 1]} : vector<8x384xf32> to vector<8x128xf32>
    %194 = arith.addf %192, %193 : vector<8x128xf32>
    %195 = arith.negf %194 : vector<8x128xf32>
    %196 = math.exp %195 : vector<8x128xf32>
    %cst_60 = arith.constant 1.000000e+00 : f32
    %197 = vector.broadcast %cst_60 : f32 to vector<8x128xf32>
    %198 = arith.addf %197, %196 : vector<8x128xf32>
    %199 = arith.divf %197, %198 : vector<8x128xf32>
    %200 = vector.extract_strided_slice %189 {offsets = [0, 128], sizes = [8, 128], strides = [1, 1]} : vector<8x384xf32> to vector<8x128xf32>
    %201 = vector.extract_strided_slice %191 {offsets = [0, 128], sizes = [8, 128], strides = [1, 1]} : vector<8x384xf32> to vector<8x128xf32>
    %202 = arith.addf %200, %201 : vector<8x128xf32>
    %203 = arith.negf %202 : vector<8x128xf32>
    %204 = math.exp %203 : vector<8x128xf32>
    %cst_61 = arith.constant 1.000000e+00 : f32
    %205 = vector.broadcast %cst_61 : f32 to vector<8x128xf32>
    %206 = arith.addf %205, %204 : vector<8x128xf32>
    %207 = arith.divf %205, %206 : vector<8x128xf32>
    %208 = vector.extract_strided_slice %189 {offsets = [0, 256], sizes = [8, 128], strides = [1, 1]} : vector<8x384xf32> to vector<8x128xf32>
    %209 = vector.extract_strided_slice %191 {offsets = [0, 256], sizes = [8, 128], strides = [1, 1]} : vector<8x384xf32> to vector<8x128xf32>
    %210 = arith.addf %209, %5 : vector<8x128xf32>
    %211 = arith.mulf %199, %210 : vector<8x128xf32>
    %212 = arith.addf %208, %211 : vector<8x128xf32>
    %213 = math.tanh %212 : vector<8x128xf32>
    %cst_62 = arith.constant 1.000000e+00 : f32
    %214 = vector.broadcast %cst_62 : f32 to vector<8x128xf32>
    %215 = arith.subf %214, %207 : vector<8x128xf32>
    %216 = arith.mulf %215, %213 : vector<8x128xf32>
    %217 = arith.mulf %207, %156 : vector<8x128xf32>
    %218 = arith.addf %216, %217 : vector<8x128xf32>
    %c0_63 = arith.constant 0 : index
    %c0_64 = arith.constant 0 : index
    %219 = vector.load %arg5[%c0_63, %c0_64] : memref<128x384xf32, #tpu.memory_space<vmem>>, vector<128x384xf32>
    %cst_65 = arith.constant dense<0.000000e+00> : vector<8x384xf32>
    %220 = tpu.matmul %218, %219, %cst_65 {dimension_numbers = #tpu.dot_dimension_numbers<[1], [0], [0], [1], [0, 0, 1, 1], [], []>} : vector<8x128xf32>, vector<128x384xf32>, vector<8x384xf32> -> vector<8x384xf32>
    %221 = arith.addf %220, %2 : vector<8x384xf32>
    %c0_66 = arith.constant 0 : index
    %c0_67 = arith.constant 0 : index
    %222 = vector.load %arg6[%c0_66, %c0_67] : memref<128x384xf32, #tpu.memory_space<vmem>>, vector<128x384xf32>
    %cst_68 = arith.constant dense<0.000000e+00> : vector<8x384xf32>
    %223 = tpu.matmul %188, %222, %cst_68 {dimension_numbers = #tpu.dot_dimension_numbers<[1], [0], [0], [1], [0, 0, 1, 1], [], []>} : vector<8x128xf32>, vector<128x384xf32>, vector<8x384xf32> -> vector<8x384xf32>
    %224 = vector.extract_strided_slice %221 {offsets = [0, 0], sizes = [8, 128], strides = [1, 1]} : vector<8x384xf32> to vector<8x128xf32>
    %225 = vector.extract_strided_slice %223 {offsets = [0, 0], sizes = [8, 128], strides = [1, 1]} : vector<8x384xf32> to vector<8x128xf32>
    %226 = arith.addf %224, %225 : vector<8x128xf32>
    %227 = arith.negf %226 : vector<8x128xf32>
    %228 = math.exp %227 : vector<8x128xf32>
    %cst_69 = arith.constant 1.000000e+00 : f32
    %229 = vector.broadcast %cst_69 : f32 to vector<8x128xf32>
    %230 = arith.addf %229, %228 : vector<8x128xf32>
    %231 = arith.divf %229, %230 : vector<8x128xf32>
    %232 = vector.extract_strided_slice %221 {offsets = [0, 128], sizes = [8, 128], strides = [1, 1]} : vector<8x384xf32> to vector<8x128xf32>
    %233 = vector.extract_strided_slice %223 {offsets = [0, 128], sizes = [8, 128], strides = [1, 1]} : vector<8x384xf32> to vector<8x128xf32>
    %234 = arith.addf %232, %233 : vector<8x128xf32>
    %235 = arith.negf %234 : vector<8x128xf32>
    %236 = math.exp %235 : vector<8x128xf32>
    %cst_70 = arith.constant 1.000000e+00 : f32
    %237 = vector.broadcast %cst_70 : f32 to vector<8x128xf32>
    %238 = arith.addf %237, %236 : vector<8x128xf32>
    %239 = arith.divf %237, %238 : vector<8x128xf32>
    %240 = vector.extract_strided_slice %221 {offsets = [0, 256], sizes = [8, 128], strides = [1, 1]} : vector<8x384xf32> to vector<8x128xf32>
    %241 = vector.extract_strided_slice %223 {offsets = [0, 256], sizes = [8, 128], strides = [1, 1]} : vector<8x384xf32> to vector<8x128xf32>
    %242 = arith.addf %241, %8 : vector<8x128xf32>
    %243 = arith.mulf %231, %242 : vector<8x128xf32>
    %244 = arith.addf %240, %243 : vector<8x128xf32>
    %245 = math.tanh %244 : vector<8x128xf32>
    %cst_71 = arith.constant 1.000000e+00 : f32
    %246 = vector.broadcast %cst_71 : f32 to vector<8x128xf32>
    %247 = arith.subf %246, %239 : vector<8x128xf32>
    %248 = arith.mulf %247, %245 : vector<8x128xf32>
    %249 = arith.mulf %239, %188 : vector<8x128xf32>
    %250 = arith.addf %248, %249 : vector<8x128xf32>
    %251 = arith.maximumf %188, %250 : vector<8x128xf32>
    %c0_72 = arith.constant 0 : index
    %c0_73 = arith.constant 0 : index
    %252 = vector.load %arg9[%c0_72, %c0_73] : memref<128x128xf32, #tpu.memory_space<vmem>>, vector<128x128xf32>
    %cst_74 = arith.constant dense<0.000000e+00> : vector<8x128xf32>
    %253 = tpu.matmul %251, %252, %cst_74 {dimension_numbers = #tpu.dot_dimension_numbers<[1], [0], [0], [1], [0, 0, 1, 1], [], []>} : vector<8x128xf32>, vector<128x128xf32>, vector<8x128xf32> -> vector<8x128xf32>
    %254 = arith.addf %253, %11 : vector<8x128xf32>
    %c8 = arith.constant 8 : index
    %c0_75 = arith.constant 0 : index
    %255 = vector.load %arg11[%c8, %c0_75] : memref<32x128xf32, #tpu.memory_space<vmem>>, vector<8x128xf32>
    tpu.vector_store %arg11[%c8, %c0_75], %254 {strides = array<i32>} : memref<32x128xf32, #tpu.memory_space<vmem>>, vector<8x128xf32>,
    %256 = vector.extract_strided_slice %17 {offsets = [32, 0], sizes = [8, 384], strides = [1, 1]} : vector<64x384xf32> to vector<8x384xf32>
    %c0_76 = arith.constant 0 : index
    %c0_77 = arith.constant 0 : index
    %257 = vector.load %arg2[%c0_76, %c0_77] : memref<128x384xf32, #tpu.memory_space<vmem>>, vector<128x384xf32>
    %cst_78 = arith.constant dense<0.000000e+00> : vector<8x384xf32>
    %258 = tpu.matmul %218, %257, %cst_78 {dimension_numbers = #tpu.dot_dimension_numbers<[1], [0], [0], [1], [0, 0, 1, 1], [], []>} : vector<8x128xf32>, vector<128x384xf32>, vector<8x384xf32> -> vector<8x384xf32>
    %259 = vector.extract_strided_slice %256 {offsets = [0, 0], sizes = [8, 128], strides = [1, 1]} : vector<8x384xf32> to vector<8x128xf32>
    %260 = vector.extract_strided_slice %258 {offsets = [0, 0], sizes = [8, 128], strides = [1, 1]} : vector<8x384xf32> to vector<8x128xf32>
    %261 = arith.addf %259, %260 : vector<8x128xf32>
    %262 = arith.negf %261 : vector<8x128xf32>
    %263 = math.exp %262 : vector<8x128xf32>
    %cst_79 = arith.constant 1.000000e+00 : f32
    %264 = vector.broadcast %cst_79 : f32 to vector<8x128xf32>
    %265 = arith.addf %264, %263 : vector<8x128xf32>
    %266 = arith.divf %264, %265 : vector<8x128xf32>
    %267 = vector.extract_strided_slice %256 {offsets = [0, 128], sizes = [8, 128], strides = [1, 1]} : vector<8x384xf32> to vector<8x128xf32>
    %268 = vector.extract_strided_slice %258 {offsets = [0, 128], sizes = [8, 128], strides = [1, 1]} : vector<8x384xf32> to vector<8x128xf32>
    %269 = arith.addf %267, %268 : vector<8x128xf32>
    %270 = arith.negf %269 : vector<8x128xf32>
    %271 = math.exp %270 : vector<8x128xf32>
    %cst_80 = arith.constant 1.000000e+00 : f32
    %272 = vector.broadcast %cst_80 : f32 to vector<8x128xf32>
    %273 = arith.addf %272, %271 : vector<8x128xf32>
    %274 = arith.divf %272, %273 : vector<8x128xf32>
    %275 = vector.extract_strided_slice %256 {offsets = [0, 256], sizes = [8, 128], strides = [1, 1]} : vector<8x384xf32> to vector<8x128xf32>
    %276 = vector.extract_strided_slice %258 {offsets = [0, 256], sizes = [8, 128], strides = [1, 1]} : vector<8x384xf32> to vector<8x128xf32>
    %277 = arith.addf %276, %5 : vector<8x128xf32>
    %278 = arith.mulf %266, %277 : vector<8x128xf32>
    %279 = arith.addf %275, %278 : vector<8x128xf32>
    %280 = math.tanh %279 : vector<8x128xf32>
    %cst_81 = arith.constant 1.000000e+00 : f32
    %281 = vector.broadcast %cst_81 : f32 to vector<8x128xf32>
    %282 = arith.subf %281, %274 : vector<8x128xf32>
    %283 = arith.mulf %282, %280 : vector<8x128xf32>
    %284 = arith.mulf %274, %218 : vector<8x128xf32>
    %285 = arith.addf %283, %284 : vector<8x128xf32>
    %c0_82 = arith.constant 0 : index
    %c0_83 = arith.constant 0 : index
    %286 = vector.load %arg5[%c0_82, %c0_83] : memref<128x384xf32, #tpu.memory_space<vmem>>, vector<128x384xf32>
    %cst_84 = arith.constant dense<0.000000e+00> : vector<8x384xf32>
    %287 = tpu.matmul %285, %286, %cst_84 {dimension_numbers = #tpu.dot_dimension_numbers<[1], [0], [0], [1], [0, 0, 1, 1], [], []>} : vector<8x128xf32>, vector<128x384xf32>, vector<8x384xf32> -> vector<8x384xf32>
    %288 = arith.addf %287, %2 : vector<8x384xf32>
    %c0_85 = arith.constant 0 : index
    %c0_86 = arith.constant 0 : index
    %289 = vector.load %arg6[%c0_85, %c0_86] : memref<128x384xf32, #tpu.memory_space<vmem>>, vector<128x384xf32>
    %cst_87 = arith.constant dense<0.000000e+00> : vector<8x384xf32>
    %290 = tpu.matmul %250, %289, %cst_87 {dimension_numbers = #tpu.dot_dimension_numbers<[1], [0], [0], [1], [0, 0, 1, 1], [], []>} : vector<8x128xf32>, vector<128x384xf32>, vector<8x384xf32> -> vector<8x384xf32>
    %291 = vector.extract_strided_slice %288 {offsets = [0, 0], sizes = [8, 128], strides = [1, 1]} : vector<8x384xf32> to vector<8x128xf32>
    %292 = vector.extract_strided_slice %290 {offsets = [0, 0], sizes = [8, 128], strides = [1, 1]} : vector<8x384xf32> to vector<8x128xf32>
    %293 = arith.addf %291, %292 : vector<8x128xf32>
    %294 = arith.negf %293 : vector<8x128xf32>
    %295 = math.exp %294 : vector<8x128xf32>
    %cst_88 = arith.constant 1.000000e+00 : f32
    %296 = vector.broadcast %cst_88 : f32 to vector<8x128xf32>
    %297 = arith.addf %296, %295 : vector<8x128xf32>
    %298 = arith.divf %296, %297 : vector<8x128xf32>
    %299 = vector.extract_strided_slice %288 {offsets = [0, 128], sizes = [8, 128], strides = [1, 1]} : vector<8x384xf32> to vector<8x128xf32>
    %300 = vector.extract_strided_slice %290 {offsets = [0, 128], sizes = [8, 128], strides = [1, 1]} : vector<8x384xf32> to vector<8x128xf32>
    %301 = arith.addf %299, %300 : vector<8x128xf32>
    %302 = arith.negf %301 : vector<8x128xf32>
    %303 = math.exp %302 : vector<8x128xf32>
    %cst_89 = arith.constant 1.000000e+00 : f32
    %304 = vector.broadcast %cst_89 : f32 to vector<8x128xf32>
    %305 = arith.addf %304, %303 : vector<8x128xf32>
    %306 = arith.divf %304, %305 : vector<8x128xf32>
    %307 = vector.extract_strided_slice %288 {offsets = [0, 256], sizes = [8, 128], strides = [1, 1]} : vector<8x384xf32> to vector<8x128xf32>
    %308 = vector.extract_strided_slice %290 {offsets = [0, 256], sizes = [8, 128], strides = [1, 1]} : vector<8x384xf32> to vector<8x128xf32>
    %309 = arith.addf %308, %8 : vector<8x128xf32>
    %310 = arith.mulf %298, %309 : vector<8x128xf32>
    %311 = arith.addf %307, %310 : vector<8x128xf32>
    %312 = math.tanh %311 : vector<8x128xf32>
    %cst_90 = arith.constant 1.000000e+00 : f32
    %313 = vector.broadcast %cst_90 : f32 to vector<8x128xf32>
    %314 = arith.subf %313, %306 : vector<8x128xf32>
    %315 = arith.mulf %314, %312 : vector<8x128xf32>
    %316 = arith.mulf %306, %250 : vector<8x128xf32>
    %317 = arith.addf %315, %316 : vector<8x128xf32>
    %318 = vector.extract_strided_slice %17 {offsets = [40, 0], sizes = [8, 384], strides = [1, 1]} : vector<64x384xf32> to vector<8x384xf32>
    %c0_91 = arith.constant 0 : index
    %c0_92 = arith.constant 0 : index
    %319 = vector.load %arg2[%c0_91, %c0_92] : memref<128x384xf32, #tpu.memory_space<vmem>>, vector<128x384xf32>
    %cst_93 = arith.constant dense<0.000000e+00> : vector<8x384xf32>
    %320 = tpu.matmul %285, %319, %cst_93 {dimension_numbers = #tpu.dot_dimension_numbers<[1], [0], [0], [1], [0, 0, 1, 1], [], []>} : vector<8x128xf32>, vector<128x384xf32>, vector<8x384xf32> -> vector<8x384xf32>
    %321 = vector.extract_strided_slice %318 {offsets = [0, 0], sizes = [8, 128], strides = [1, 1]} : vector<8x384xf32> to vector<8x128xf32>
    %322 = vector.extract_strided_slice %320 {offsets = [0, 0], sizes = [8, 128], strides = [1, 1]} : vector<8x384xf32> to vector<8x128xf32>
    %323 = arith.addf %321, %322 : vector<8x128xf32>
    %324 = arith.negf %323 : vector<8x128xf32>
    %325 = math.exp %324 : vector<8x128xf32>
    %cst_94 = arith.constant 1.000000e+00 : f32
    %326 = vector.broadcast %cst_94 : f32 to vector<8x128xf32>
    %327 = arith.addf %326, %325 : vector<8x128xf32>
    %328 = arith.divf %326, %327 : vector<8x128xf32>
    %329 = vector.extract_strided_slice %318 {offsets = [0, 128], sizes = [8, 128], strides = [1, 1]} : vector<8x384xf32> to vector<8x128xf32>
    %330 = vector.extract_strided_slice %320 {offsets = [0, 128], sizes = [8, 128], strides = [1, 1]} : vector<8x384xf32> to vector<8x128xf32>
    %331 = arith.addf %329, %330 : vector<8x128xf32>
    %332 = arith.negf %331 : vector<8x128xf32>
    %333 = math.exp %332 : vector<8x128xf32>
    %cst_95 = arith.constant 1.000000e+00 : f32
    %334 = vector.broadcast %cst_95 : f32 to vector<8x128xf32>
    %335 = arith.addf %334, %333 : vector<8x128xf32>
    %336 = arith.divf %334, %335 : vector<8x128xf32>
    %337 = vector.extract_strided_slice %318 {offsets = [0, 256], sizes = [8, 128], strides = [1, 1]} : vector<8x384xf32> to vector<8x128xf32>
    %338 = vector.extract_strided_slice %320 {offsets = [0, 256], sizes = [8, 128], strides = [1, 1]} : vector<8x384xf32> to vector<8x128xf32>
    %339 = arith.addf %338, %5 : vector<8x128xf32>
    %340 = arith.mulf %328, %339 : vector<8x128xf32>
    %341 = arith.addf %337, %340 : vector<8x128xf32>
    %342 = math.tanh %341 : vector<8x128xf32>
    %cst_96 = arith.constant 1.000000e+00 : f32
    %343 = vector.broadcast %cst_96 : f32 to vector<8x128xf32>
    %344 = arith.subf %343, %336 : vector<8x128xf32>
    %345 = arith.mulf %344, %342 : vector<8x128xf32>
    %346 = arith.mulf %336, %285 : vector<8x128xf32>
    %347 = arith.addf %345, %346 : vector<8x128xf32>
    %c0_97 = arith.constant 0 : index
    %c0_98 = arith.constant 0 : index
    %348 = vector.load %arg5[%c0_97, %c0_98] : memref<128x384xf32, #tpu.memory_space<vmem>>, vector<128x384xf32>
    %cst_99 = arith.constant dense<0.000000e+00> : vector<8x384xf32>
    %349 = tpu.matmul %347, %348, %cst_99 {dimension_numbers = #tpu.dot_dimension_numbers<[1], [0], [0], [1], [0, 0, 1, 1], [], []>} : vector<8x128xf32>, vector<128x384xf32>, vector<8x384xf32> -> vector<8x384xf32>
    %350 = arith.addf %349, %2 : vector<8x384xf32>
    %c0_100 = arith.constant 0 : index
    %c0_101 = arith.constant 0 : index
    %351 = vector.load %arg6[%c0_100, %c0_101] : memref<128x384xf32, #tpu.memory_space<vmem>>, vector<128x384xf32>
    %cst_102 = arith.constant dense<0.000000e+00> : vector<8x384xf32>
    %352 = tpu.matmul %317, %351, %cst_102 {dimension_numbers = #tpu.dot_dimension_numbers<[1], [0], [0], [1], [0, 0, 1, 1], [], []>} : vector<8x128xf32>, vector<128x384xf32>, vector<8x384xf32> -> vector<8x384xf32>
    %353 = vector.extract_strided_slice %350 {offsets = [0, 0], sizes = [8, 128], strides = [1, 1]} : vector<8x384xf32> to vector<8x128xf32>
    %354 = vector.extract_strided_slice %352 {offsets = [0, 0], sizes = [8, 128], strides = [1, 1]} : vector<8x384xf32> to vector<8x128xf32>
    %355 = arith.addf %353, %354 : vector<8x128xf32>
    %356 = arith.negf %355 : vector<8x128xf32>
    %357 = math.exp %356 : vector<8x128xf32>
    %cst_103 = arith.constant 1.000000e+00 : f32
    %358 = vector.broadcast %cst_103 : f32 to vector<8x128xf32>
    %359 = arith.addf %358, %357 : vector<8x128xf32>
    %360 = arith.divf %358, %359 : vector<8x128xf32>
    %361 = vector.extract_strided_slice %350 {offsets = [0, 128], sizes = [8, 128], strides = [1, 1]} : vector<8x384xf32> to vector<8x128xf32>
    %362 = vector.extract_strided_slice %352 {offsets = [0, 128], sizes = [8, 128], strides = [1, 1]} : vector<8x384xf32> to vector<8x128xf32>
    %363 = arith.addf %361, %362 : vector<8x128xf32>
    %364 = arith.negf %363 : vector<8x128xf32>
    %365 = math.exp %364 : vector<8x128xf32>
    %cst_104 = arith.constant 1.000000e+00 : f32
    %366 = vector.broadcast %cst_104 : f32 to vector<8x128xf32>
    %367 = arith.addf %366, %365 : vector<8x128xf32>
    %368 = arith.divf %366, %367 : vector<8x128xf32>
    %369 = vector.extract_strided_slice %350 {offsets = [0, 256], sizes = [8, 128], strides = [1, 1]} : vector<8x384xf32> to vector<8x128xf32>
    %370 = vector.extract_strided_slice %352 {offsets = [0, 256], sizes = [8, 128], strides = [1, 1]} : vector<8x384xf32> to vector<8x128xf32>
    %371 = arith.addf %370, %8 : vector<8x128xf32>
    %372 = arith.mulf %360, %371 : vector<8x128xf32>
    %373 = arith.addf %369, %372 : vector<8x128xf32>
    %374 = math.tanh %373 : vector<8x128xf32>
    %cst_105 = arith.constant 1.000000e+00 : f32
    %375 = vector.broadcast %cst_105 : f32 to vector<8x128xf32>
    %376 = arith.subf %375, %368 : vector<8x128xf32>
    %377 = arith.mulf %376, %374 : vector<8x128xf32>
    %378 = arith.mulf %368, %317 : vector<8x128xf32>
    %379 = arith.addf %377, %378 : vector<8x128xf32>
    %380 = arith.maximumf %317, %379 : vector<8x128xf32>
    %c0_106 = arith.constant 0 : index
    %c0_107 = arith.constant 0 : index
    %381 = vector.load %arg9[%c0_106, %c0_107] : memref<128x128xf32, #tpu.memory_space<vmem>>, vector<128x128xf32>
    %cst_108 = arith.constant dense<0.000000e+00> : vector<8x128xf32>
    %382 = tpu.matmul %380, %381, %cst_108 {dimension_numbers = #tpu.dot_dimension_numbers<[1], [0], [0], [1], [0, 0, 1, 1], [], []>} : vector<8x128xf32>, vector<128x128xf32>, vector<8x128xf32> -> vector<8x128xf32>
    %383 = arith.addf %382, %11 : vector<8x128xf32>
    %c16 = arith.constant 16 : index
    %c0_109 = arith.constant 0 : index
    %384 = vector.load %arg11[%c16, %c0_109] : memref<32x128xf32, #tpu.memory_space<vmem>>, vector<8x128xf32>
    tpu.vector_store %arg11[%c16, %c0_109], %383 {strides = array<i32>} : memref<32x128xf32, #tpu.memory_space<vmem>>, vector<8x128xf32>,
    %385 = vector.extract_strided_slice %17 {offsets = [48, 0], sizes = [8, 384], strides = [1, 1]} : vector<64x384xf32> to vector<8x384xf32>
    %c0_110 = arith.constant 0 : index
    %c0_111 = arith.constant 0 : index
    %386 = vector.load %arg2[%c0_110, %c0_111] : memref<128x384xf32, #tpu.memory_space<vmem>>, vector<128x384xf32>
    %cst_112 = arith.constant dense<0.000000e+00> : vector<8x384xf32>
    %387 = tpu.matmul %347, %386, %cst_112 {dimension_numbers = #tpu.dot_dimension_numbers<[1], [0], [0], [1], [0, 0, 1, 1], [], []>} : vector<8x128xf32>, vector<128x384xf32>, vector<8x384xf32> -> vector<8x384xf32>
    %388 = vector.extract_strided_slice %385 {offsets = [0, 0], sizes = [8, 128], strides = [1, 1]} : vector<8x384xf32> to vector<8x128xf32>
    %389 = vector.extract_strided_slice %387 {offsets = [0, 0], sizes = [8, 128], strides = [1, 1]} : vector<8x384xf32> to vector<8x128xf32>
    %390 = arith.addf %388, %389 : vector<8x128xf32>
    %391 = arith.negf %390 : vector<8x128xf32>
    %392 = math.exp %391 : vector<8x128xf32>
    %cst_113 = arith.constant 1.000000e+00 : f32
    %393 = vector.broadcast %cst_113 : f32 to vector<8x128xf32>
    %394 = arith.addf %393, %392 : vector<8x128xf32>
    %395 = arith.divf %393, %394 : vector<8x128xf32>
    %396 = vector.extract_strided_slice %385 {offsets = [0, 128], sizes = [8, 128], strides = [1, 1]} : vector<8x384xf32> to vector<8x128xf32>
    %397 = vector.extract_strided_slice %387 {offsets = [0, 128], sizes = [8, 128], strides = [1, 1]} : vector<8x384xf32> to vector<8x128xf32>
    %398 = arith.addf %396, %397 : vector<8x128xf32>
    %399 = arith.negf %398 : vector<8x128xf32>
    %400 = math.exp %399 : vector<8x128xf32>
    %cst_114 = arith.constant 1.000000e+00 : f32
    %401 = vector.broadcast %cst_114 : f32 to vector<8x128xf32>
    %402 = arith.addf %401, %400 : vector<8x128xf32>
    %403 = arith.divf %401, %402 : vector<8x128xf32>
    %404 = vector.extract_strided_slice %385 {offsets = [0, 256], sizes = [8, 128], strides = [1, 1]} : vector<8x384xf32> to vector<8x128xf32>
    %405 = vector.extract_strided_slice %387 {offsets = [0, 256], sizes = [8, 128], strides = [1, 1]} : vector<8x384xf32> to vector<8x128xf32>
    %406 = arith.addf %405, %5 : vector<8x128xf32>
    %407 = arith.mulf %395, %406 : vector<8x128xf32>
    %408 = arith.addf %404, %407 : vector<8x128xf32>
    %409 = math.tanh %408 : vector<8x128xf32>
    %cst_115 = arith.constant 1.000000e+00 : f32
    %410 = vector.broadcast %cst_115 : f32 to vector<8x128xf32>
    %411 = arith.subf %410, %403 : vector<8x128xf32>
    %412 = arith.mulf %411, %409 : vector<8x128xf32>
    %413 = arith.mulf %403, %347 : vector<8x128xf32>
    %414 = arith.addf %412, %413 : vector<8x128xf32>
    %c0_116 = arith.constant 0 : index
    %c0_117 = arith.constant 0 : index
    %415 = vector.load %arg5[%c0_116, %c0_117] : memref<128x384xf32, #tpu.memory_space<vmem>>, vector<128x384xf32>
    %cst_118 = arith.constant dense<0.000000e+00> : vector<8x384xf32>
    %416 = tpu.matmul %414, %415, %cst_118 {dimension_numbers = #tpu.dot_dimension_numbers<[1], [0], [0], [1], [0, 0, 1, 1], [], []>} : vector<8x128xf32>, vector<128x384xf32>, vector<8x384xf32> -> vector<8x384xf32>
    %417 = arith.addf %416, %2 : vector<8x384xf32>
    %c0_119 = arith.constant 0 : index
    %c0_120 = arith.constant 0 : index
    %418 = vector.load %arg6[%c0_119, %c0_120] : memref<128x384xf32, #tpu.memory_space<vmem>>, vector<128x384xf32>
    %cst_121 = arith.constant dense<0.000000e+00> : vector<8x384xf32>
    %419 = tpu.matmul %379, %418, %cst_121 {dimension_numbers = #tpu.dot_dimension_numbers<[1], [0], [0], [1], [0, 0, 1, 1], [], []>} : vector<8x128xf32>, vector<128x384xf32>, vector<8x384xf32> -> vector<8x384xf32>
    %420 = vector.extract_strided_slice %417 {offsets = [0, 0], sizes = [8, 128], strides = [1, 1]} : vector<8x384xf32> to vector<8x128xf32>
    %421 = vector.extract_strided_slice %419 {offsets = [0, 0], sizes = [8, 128], strides = [1, 1]} : vector<8x384xf32> to vector<8x128xf32>
    %422 = arith.addf %420, %421 : vector<8x128xf32>
    %423 = arith.negf %422 : vector<8x128xf32>
    %424 = math.exp %423 : vector<8x128xf32>
    %cst_122 = arith.constant 1.000000e+00 : f32
    %425 = vector.broadcast %cst_122 : f32 to vector<8x128xf32>
    %426 = arith.addf %425, %424 : vector<8x128xf32>
    %427 = arith.divf %425, %426 : vector<8x128xf32>
    %428 = vector.extract_strided_slice %417 {offsets = [0, 128], sizes = [8, 128], strides = [1, 1]} : vector<8x384xf32> to vector<8x128xf32>
    %429 = vector.extract_strided_slice %419 {offsets = [0, 128], sizes = [8, 128], strides = [1, 1]} : vector<8x384xf32> to vector<8x128xf32>
    %430 = arith.addf %428, %429 : vector<8x128xf32>
    %431 = arith.negf %430 : vector<8x128xf32>
    %432 = math.exp %431 : vector<8x128xf32>
    %cst_123 = arith.constant 1.000000e+00 : f32
    %433 = vector.broadcast %cst_123 : f32 to vector<8x128xf32>
    %434 = arith.addf %433, %432 : vector<8x128xf32>
    %435 = arith.divf %433, %434 : vector<8x128xf32>
    %436 = vector.extract_strided_slice %417 {offsets = [0, 256], sizes = [8, 128], strides = [1, 1]} : vector<8x384xf32> to vector<8x128xf32>
    %437 = vector.extract_strided_slice %419 {offsets = [0, 256], sizes = [8, 128], strides = [1, 1]} : vector<8x384xf32> to vector<8x128xf32>
    %438 = arith.addf %437, %8 : vector<8x128xf32>
    %439 = arith.mulf %427, %438 : vector<8x128xf32>
    %440 = arith.addf %436, %439 : vector<8x128xf32>
    %441 = math.tanh %440 : vector<8x128xf32>
    %cst_124 = arith.constant 1.000000e+00 : f32
    %442 = vector.broadcast %cst_124 : f32 to vector<8x128xf32>
    %443 = arith.subf %442, %435 : vector<8x128xf32>
    %444 = arith.mulf %443, %441 : vector<8x128xf32>
    %445 = arith.mulf %435, %379 : vector<8x128xf32>
    %446 = arith.addf %444, %445 : vector<8x128xf32>
    %447 = vector.extract_strided_slice %17 {offsets = [56, 0], sizes = [8, 384], strides = [1, 1]} : vector<64x384xf32> to vector<8x384xf32>
    %c0_125 = arith.constant 0 : index
    %c0_126 = arith.constant 0 : index
    %448 = vector.load %arg2[%c0_125, %c0_126] : memref<128x384xf32, #tpu.memory_space<vmem>>, vector<128x384xf32>
    %cst_127 = arith.constant dense<0.000000e+00> : vector<8x384xf32>
    %449 = tpu.matmul %414, %448, %cst_127 {dimension_numbers = #tpu.dot_dimension_numbers<[1], [0], [0], [1], [0, 0, 1, 1], [], []>} : vector<8x128xf32>, vector<128x384xf32>, vector<8x384xf32> -> vector<8x384xf32>
    %450 = vector.extract_strided_slice %447 {offsets = [0, 0], sizes = [8, 128], strides = [1, 1]} : vector<8x384xf32> to vector<8x128xf32>
    %451 = vector.extract_strided_slice %449 {offsets = [0, 0], sizes = [8, 128], strides = [1, 1]} : vector<8x384xf32> to vector<8x128xf32>
    %452 = arith.addf %450, %451 : vector<8x128xf32>
    %453 = arith.negf %452 : vector<8x128xf32>
    %454 = math.exp %453 : vector<8x128xf32>
    %cst_128 = arith.constant 1.000000e+00 : f32
    %455 = vector.broadcast %cst_128 : f32 to vector<8x128xf32>
    %456 = arith.addf %455, %454 : vector<8x128xf32>
    %457 = arith.divf %455, %456 : vector<8x128xf32>
    %458 = vector.extract_strided_slice %447 {offsets = [0, 128], sizes = [8, 128], strides = [1, 1]} : vector<8x384xf32> to vector<8x128xf32>
    %459 = vector.extract_strided_slice %449 {offsets = [0, 128], sizes = [8, 128], strides = [1, 1]} : vector<8x384xf32> to vector<8x128xf32>
    %460 = arith.addf %458, %459 : vector<8x128xf32>
    %461 = arith.negf %460 : vector<8x128xf32>
    %462 = math.exp %461 : vector<8x128xf32>
    %cst_129 = arith.constant 1.000000e+00 : f32
    %463 = vector.broadcast %cst_129 : f32 to vector<8x128xf32>
    %464 = arith.addf %463, %462 : vector<8x128xf32>
    %465 = arith.divf %463, %464 : vector<8x128xf32>
    %466 = vector.extract_strided_slice %447 {offsets = [0, 256], sizes = [8, 128], strides = [1, 1]} : vector<8x384xf32> to vector<8x128xf32>
    %467 = vector.extract_strided_slice %449 {offsets = [0, 256], sizes = [8, 128], strides = [1, 1]} : vector<8x384xf32> to vector<8x128xf32>
    %468 = arith.addf %467, %5 : vector<8x128xf32>
    %469 = arith.mulf %457, %468 : vector<8x128xf32>
    %470 = arith.addf %466, %469 : vector<8x128xf32>
    %471 = math.tanh %470 : vector<8x128xf32>
    %cst_130 = arith.constant 1.000000e+00 : f32
    %472 = vector.broadcast %cst_130 : f32 to vector<8x128xf32>
    %473 = arith.subf %472, %465 : vector<8x128xf32>
    %474 = arith.mulf %473, %471 : vector<8x128xf32>
    %475 = arith.mulf %465, %414 : vector<8x128xf32>
    %476 = arith.addf %474, %475 : vector<8x128xf32>
    %c0_131 = arith.constant 0 : index
    %c0_132 = arith.constant 0 : index
    %477 = vector.load %arg5[%c0_131, %c0_132] : memref<128x384xf32, #tpu.memory_space<vmem>>, vector<128x384xf32>
    %cst_133 = arith.constant dense<0.000000e+00> : vector<8x384xf32>
    %478 = tpu.matmul %476, %477, %cst_133 {dimension_numbers = #tpu.dot_dimension_numbers<[1], [0], [0], [1], [0, 0, 1, 1], [], []>} : vector<8x128xf32>, vector<128x384xf32>, vector<8x384xf32> -> vector<8x384xf32>
    %479 = arith.addf %478, %2 : vector<8x384xf32>
    %c0_134 = arith.constant 0 : index
    %c0_135 = arith.constant 0 : index
    %480 = vector.load %arg6[%c0_134, %c0_135] : memref<128x384xf32, #tpu.memory_space<vmem>>, vector<128x384xf32>
    %cst_136 = arith.constant dense<0.000000e+00> : vector<8x384xf32>
    %481 = tpu.matmul %446, %480, %cst_136 {dimension_numbers = #tpu.dot_dimension_numbers<[1], [0], [0], [1], [0, 0, 1, 1], [], []>} : vector<8x128xf32>, vector<128x384xf32>, vector<8x384xf32> -> vector<8x384xf32>
    %482 = vector.extract_strided_slice %479 {offsets = [0, 0], sizes = [8, 128], strides = [1, 1]} : vector<8x384xf32> to vector<8x128xf32>
    %483 = vector.extract_strided_slice %481 {offsets = [0, 0], sizes = [8, 128], strides = [1, 1]} : vector<8x384xf32> to vector<8x128xf32>
    %484 = arith.addf %482, %483 : vector<8x128xf32>
    %485 = arith.negf %484 : vector<8x128xf32>
    %486 = math.exp %485 : vector<8x128xf32>
    %cst_137 = arith.constant 1.000000e+00 : f32
    %487 = vector.broadcast %cst_137 : f32 to vector<8x128xf32>
    %488 = arith.addf %487, %486 : vector<8x128xf32>
    %489 = arith.divf %487, %488 : vector<8x128xf32>
    %490 = vector.extract_strided_slice %479 {offsets = [0, 128], sizes = [8, 128], strides = [1, 1]} : vector<8x384xf32> to vector<8x128xf32>
    %491 = vector.extract_strided_slice %481 {offsets = [0, 128], sizes = [8, 128], strides = [1, 1]} : vector<8x384xf32> to vector<8x128xf32>
    %492 = arith.addf %490, %491 : vector<8x128xf32>
    %493 = arith.negf %492 : vector<8x128xf32>
    %494 = math.exp %493 : vector<8x128xf32>
    %cst_138 = arith.constant 1.000000e+00 : f32
    %495 = vector.broadcast %cst_138 : f32 to vector<8x128xf32>
    %496 = arith.addf %495, %494 : vector<8x128xf32>
    %497 = arith.divf %495, %496 : vector<8x128xf32>
    %498 = vector.extract_strided_slice %479 {offsets = [0, 256], sizes = [8, 128], strides = [1, 1]} : vector<8x384xf32> to vector<8x128xf32>
    %499 = vector.extract_strided_slice %481 {offsets = [0, 256], sizes = [8, 128], strides = [1, 1]} : vector<8x384xf32> to vector<8x128xf32>
    %500 = arith.addf %499, %8 : vector<8x128xf32>
    %501 = arith.mulf %489, %500 : vector<8x128xf32>
    %502 = arith.addf %498, %501 : vector<8x128xf32>
    %503 = math.tanh %502 : vector<8x128xf32>
    %cst_139 = arith.constant 1.000000e+00 : f32
    %504 = vector.broadcast %cst_139 : f32 to vector<8x128xf32>
    %505 = arith.subf %504, %497 : vector<8x128xf32>
    %506 = arith.mulf %505, %503 : vector<8x128xf32>
    %507 = arith.mulf %497, %446 : vector<8x128xf32>
    %508 = arith.addf %506, %507 : vector<8x128xf32>
    %509 = arith.maximumf %446, %508 : vector<8x128xf32>
    %c0_140 = arith.constant 0 : index
    %c0_141 = arith.constant 0 : index
    %510 = vector.load %arg9[%c0_140, %c0_141] : memref<128x128xf32, #tpu.memory_space<vmem>>, vector<128x128xf32>
    %cst_142 = arith.constant dense<0.000000e+00> : vector<8x128xf32>
    %511 = tpu.matmul %509, %510, %cst_142 {dimension_numbers = #tpu.dot_dimension_numbers<[1], [0], [0], [1], [0, 0, 1, 1], [], []>} : vector<8x128xf32>, vector<128x128xf32>, vector<8x128xf32> -> vector<8x128xf32>
    %512 = arith.addf %511, %11 : vector<8x128xf32>
    %c24 = arith.constant 24 : index
    %c0_143 = arith.constant 0 : index
    %513 = vector.load %arg11[%c24, %c0_143] : memref<32x128xf32, #tpu.memory_space<vmem>>, vector<8x128xf32>
    tpu.vector_store %arg11[%c24, %c0_143], %512 {strides = array<i32>} : memref<32x128xf32, #tpu.memory_space<vmem>>, vector<8x128xf32>,
    return
  }
}

</mosaic_0001>

<bundles_post_ra>
// kernel: _lambda_.1
= control target key start
LH: loop header
LB: loop body
LE: loop exit
PB: predicated region body
PF: predicated region fallthrough
CT: control target
= control target key end

     0   :  { %vm131_vm0 = vcmask 1043456   ;;  %v11196_v1 = vmov 0.0   ;;  %vm106_vm1 = vcmask 31744   ;;  %vm6420_vm2 = vmmov 0   ;;  %s11183_s1 = inlined_call_operand.vmem [shape: f32[4,384], index: 1, kind: input, shape index: {}]   ;;  %s11184_s0 = inlined_call_operand.vmem [shape: f32[64,4], index: 0, kind: input, shape index: {}]   ;;  %s11185_s5 = inlined_call_operand.vmem [shape: f32[128,384], index: 5, kind: input, shape index: {}]   ;;  %s11186_s2 = inlined_call_operand.vmem [shape: f32[128,384], index: 2, kind: input, shape index: {}]   ;;  %s11187_s3 = inlined_call_operand.vmem [shape: f32[1,384], index: 3, kind: input, shape index: {}]   ;;  %s11188_s4 = inlined_call_operand.vmem [shape: f32[1,128], index: 4, kind: input, shape index: {}]   ;;  %s11189_s6 = inlined_call_operand.vmem [shape: f32[128,384], index: 6, kind: input, shape index: {}]   ;;  %s11190_s7 = inlined_call_operand.vmem [shape: f32[1,384], index: 7, kind: input, shape index: {}]   ;;  %s11191_s8 = inlined_call_operand.vmem [shape: f32[1,128], index: 8, kind: input, shape index: {}]   ;;  %s11192_s9 = inlined_call_operand.vmem [shape: f32[128,128], index: 9, kind: input, shape index: {}]   ;;  %s11193_s10 = inlined_call_operand.vmem [shape: f32[1,128], index: 10, kind: input, shape index: {}]   ;;  %s11194_s11 = inlined_call_operand.vmem [shape: f32[32,128], index: 11, kind: output, shape index: {}]  }
   0x1   :  { %v84_v0 = vld [vmem:[%s11183_s1] sm:$0xff]  ;;  %202 = vmatprep.mubr.f32.mxu0 %v11196_v1  ;;  %v85_v3 = vld [vmem:[%s11183_s1 + $0x8] sm:$0xf]  ;;  %v6504_v6 = vld [vmem:[%s11185_s5 + $0x170] sm:$0xff]  ;;  %v40_v61 = vlaneseq }
   0x2   :  { %v76_v2 = vld [vmem:[%s11184_s0] sm:$0xff]  ;;  %v105_v4 = vcombine.high %v84_v0, %v84_v0  ;;  %5237 = vmatprep.subr.msk.mxu1 %vm131_vm0, %v85_v3  ;;  %v77_v5 = vld [vmem:[%s11184_s0 + $0x8] sm:$0xff]  ;;  %v6515_v8 = vld [vmem:[%s11185_s5 + $0x178] sm:$0xff] }
   0x3   :  { %5239 = vmatprep.mubr.msk.f32.mxu1 %vm106_vm1, %v76_v2  ;;  %5238 = vmatpush3.msk.msra.mxu1 %vm131_vm0, %v85_v3  ;;  %v6510_v7 = vld [vmem:[%s11185_s5 + $0x168] sm:$0xff]  ;;  %v6522_v9 = vld [vmem:[%s11185_s5 + $0x158] sm:$0xff]  ;;  %v6529_v10 = vld [vmem:[%s11185_s5 + $0x150] sm:$0xff]  ;;  %v6849_v62 = vshrl.u32 %v40_v61, 7 }
   0x4   :  { %4735 = vmatprep.subr.msk.mxu0 %vm131_vm0, %v105_v4  ;;  %5240 = vmatmul.mubr.msk.f32.vlgmr.msra.gmra.mxu1 %vm106_vm1, %v77_v5  ;;  %v6534_v11 = vld [vmem:[%s11185_s5 + $0x160] sm:$0xff]  ;;  %v6548_v13 = vld [vmem:[%s11185_s5 + $0x138] sm:$0xff]  ;;  %v6553_v14 = vld [vmem:[%s11185_s5 + $0x148] sm:$0xff] }
   0x5   :  { %4736 = vmatpush1.msk.msra.mxu0 %vm131_vm0, %v84_v0  ;;  %5251 = vmatprep.subr.mxu1 %v11196_v1  ;;  %v6541_v12 = vld [vmem:[%s11185_s5 + $0x140] sm:$0xff]  ;;  %v6560_v15 = vld [vmem:[%s11185_s5 + $0x128] sm:$0xff]  ;;  %v78_v16 = vld [vmem:[%s11184_s0 + $0x10] sm:$0xff]  ;;  %11483 = vst [vmem:[#allocation3_spill] sm:$0xff] %v6849_v62  ;;  %v11195_v63 = vsub.s32 0, %v6849_v62  ;;  %v11199_v3 = vsub.s32 1, %v6849_v62 }
   0x6   :  { %4737 = vmatmul.mubr.msk.f32.vlgmr.msra.gmra.mxu0 %vm106_vm1, %v76_v2  ;;  %421 = vmatprep.subr.mxu0 %v6504_v6  ;;  %v6570_v17 = vld [vmem:[%s11185_s5 + $0x120] sm:$0xff]  ;;  %v6575_v18 = vld [vmem:[%s11185_s5 + $0x130] sm:$0xff]  ;;  %v6589_v20 = vld [vmem:[%s11185_s5 + $0x108] sm:$0xff] }
   0x7   :  { %208 = vmatprep.mubr.f32.mxu0 %v11196_v1  ;;  %422 = vmatpush1.msra.mxu0 %v6510_v7  ;;  %v6582_v19 = vld [vmem:[%s11185_s5 + $0x110] sm:$0xff]  ;;  %v6594_v21 = vld [vmem:[%s11185_s5 + $0x118] sm:$0xff]  ;;  %v6616_v25 = vld [vmem:[%s11185_s5 + $0x100] sm:$0xff] }
   0x8   :  { %5252 = vmatpush3.msra.mxu1 %v6515_v8  ;;  %423 = vmatprep.subr.mxu0 %v6522_v9  ;;  %v6601_v22 = vld [vmem:[%s11185_s5 + $0xf8] sm:$0xff]  ;;  %v6611_v24 = vld [vmem:[%s11185_s5 + $0xf0] sm:$0xff]  ;;  %v6623_v26 = vld [vmem:[%s11185_s5 + $0xe0] sm:$0xff] }
   0x9   :  { %5253 = vmatprep.subr.mxu1 %v11196_v1  ;;  %424 = vmatpush1.msra.mxu0 %v6529_v10  ;;  %v79_v23 = vld [vmem:[%s11184_s0 + $0x18] sm:$0xff]  ;;  %v6635_v28 = vld [vmem:[%s11185_s5 + $0xe8] sm:$0xff]  ;;  %v80_v30 = vld [vmem:[%s11184_s0 + $0x20] sm:$0xff] }
   0xa   :  { %4738 = vmatmul.mubr.msk.f32.gmra.mxu0 %vm106_vm1, %v77_v5  ;;  %5254 = vmatpush3.msra.mxu1 %v6534_v11  ;;  %v6630_v27 = vld [vmem:[%s11185_s5 + $0xd8] sm:$0xff]  ;;  %v6642_v29 = vld [vmem:[%s11185_s5 + $0xc8] sm:$0xff]  ;;  %v6652_v31 = vld [vmem:[%s11185_s5 + $0xd0] sm:$0xff] }
   0xb   :  { %214 = vmatprep.mubr.f32.mxu0 %v11196_v1  ;;  %425 = vmatprep.subr.mxu0 %v6541_v12  ;;  %v6659_v32 = vld [vmem:[%s11185_s5 + $0xc0] sm:$0xff]  ;;  %v6666_v33 = vld [vmem:[%s11185_s5 + $0xb0] sm:$0xff]  ;;  %v6671_v34 = vld [vmem:[%s11185_s5 + $0xb8] sm:$0xff] }
   0xc   :  { %5255 = vmatprep.subr.mxu1 %v11196_v1  ;;  %426 = vmatpush1.msra.mxu0 %v6548_v13  ;;  %v6678_v35 = vld [vmem:[%s11185_s5 + $0xa8] sm:$0xff]  ;;  %v6685_v36 = vld [vmem:[%s11185_s5 + $0x98] sm:$0xff]  ;;  %v6695_v38 = vld [vmem:[%s11185_s5 + $0xa0] sm:$0xff] }
   0xd   :  { %5256 = vmatpush3.msra.mxu1 %v6553_v14  ;;  %427 = vmatprep.subr.mxu0 %v6560_v15  ;;  %v81_v37 = vld [vmem:[%s11184_s0 + $0x28] sm:$0xff]  ;;  %v6702_v39 = vld [vmem:[%s11185_s5 + $0x90] sm:$0xff]  ;;  %v6709_v40 = vld [vmem:[%s11185_s5 + $0x80] sm:$0xff] }
   0xe   :  { %5257 = vmatprep.subr.mxu1 %v11196_v1  ;;  %4739 = vmatmul.mubr.msk.f32.gmra.mxu0 %vm106_vm1, %v78_v16  ;;  %v6716_v41 = vld [vmem:[%s11185_s5 + $0x78] sm:$0xff]  ;;  %v6723_v42 = vld [vmem:[%s11185_s5 + $0x88] sm:$0xff]  ;;  %v82_v44 = vld [vmem:[%s11184_s0 + $0x30] sm:$0xff] }
   0xf   :  { %5258 = vmatpush3.msra.mxu1 %v6575_v18  ;;  %428 = vmatpush1.msra.mxu0 %v6570_v17  ;;  %v6730_v43 = vld [vmem:[%s11185_s5 + $0x68] sm:$0xff]  ;;  %v6740_v45 = vld [vmem:[%s11185_s5 + $0x70] sm:$0xff]  ;;  %v6747_v46 = vld [vmem:[%s11185_s5 + $0x60] sm:$0xff] }
  0x10   :  { %5259 = vmatprep.subr.mxu1 %v11196_v1  ;;  %429 = vmatprep.subr.mxu0 %v6582_v19  ;;  %v6754_v47 = vld [vmem:[%s11185_s5 + $0x50] sm:$0xff]  ;;  %v6761_v48 = vld [vmem:[%s11185_s5 + $0x48] sm:$0xff]  ;;  %v6768_v49 = vld [vmem:[%s11185_s5 + $0x58] sm:$0xff] }
  0x11   :  { %5260 = vmatpush3.msra.mxu1 %v6594_v21  ;;  %430 = vmatpush1.msra.mxu0 %v6589_v20  ;;  %v6775_v50 = vld [vmem:[%s11185_s5 + $0x38] sm:$0xff]  ;;  %v6785_v52 = vld [vmem:[%s11185_s5 + $0x40] sm:$0xff]  ;;  %v6792_v53 = vld [vmem:[%s11185_s5 + $0x30] sm:$0xff] }
  0x12   :  { %220 = vmatprep.mubr.f32.mxu0 %v11196_v1  ;;  %431 = vmatprep.subr.mxu0 %v6601_v22  ;;  %v83_v51 = vld [vmem:[%s11184_s0 + $0x38] sm:$0xff]  ;;  %v6799_v54 = vld [vmem:[%s11185_s5 + $0x20] sm:$0xff]  ;;  %v6813_v56 = vld [vmem:[%s11185_s5 + $0x28] sm:$0xff] }
  0x13   :  { %5261 = vmatprep.subr.mxu1 %v11196_v1  ;;  %4740 = vmatmul.mubr.msk.f32.gmra.mxu0 %vm106_vm1, %v79_v23  ;;  %v6806_v55 = vld [vmem:[%s11185_s5 + $0x18] sm:$0xff]  ;;  %v6818_v57 = vld [vmem:[%s11185_s5 + $0x8] sm:$0xff]  ;;  %v6825_v58 = vld [vmem:[%s11185_s5] sm:$0xff] }
  0x14   :  { %5262 = vmatpush3.msra.mxu1 %v6616_v25  ;;  %432 = vmatpush1.msra.mxu0 %v6611_v24  ;;  %v6832_v59 = vld [vmem:[%s11185_s5 + $0x10] sm:$0xff]  ;;  %v86_v0 = vld [vmem:[%s11187_s3] sm:$0x7] }
  0x15   :  { %5263 = vmatprep.subr.mxu1 %v11196_v1  ;;  %433 = vmatprep.subr.mxu0 %v6623_v26  ;;  %v6839_v60 = vld [vmem:[%s11186_s2 + $0x170] sm:$0xff]  ;;  %v6857_v2 = vrot.slane %v86_v0, %v11195_v63  ;;  %v11202_v63 = vsub.s32 2, %v6849_v62 }
  0x16   :  { %5264 = vmatpush3.msra.mxu1 %v6635_v28  ;;  %434 = vmatpush1.msra.mxu0 %v6630_v27  ;;  %11482 = vst [vmem:[#allocation2_spill] sm:$0xff] %v6839_v60 }
  0x17   :  { %226 = vmatprep.mubr.f32.mxu0 %v11196_v1  ;;  %435 = vmatprep.subr.mxu0 %v6642_v29  ;;  %11484 = vst [vmem:[#allocation4_spill] sm:$0xff] %v6857_v2 }
  0x18   :  { %5265 = vmatprep.subr.mxu1 %v11196_v1  ;;  %4741 = vmatmul.mubr.msk.f32.gmra.mxu0 %vm106_vm1, %v80_v30 }
  0x19   :  { %5266 = vmatpush3.msra.mxu1 %v6652_v31  ;;  %436 = vmatpush1.msra.mxu0 %v6659_v32 }
  0x1a   :  { %5267 = vmatprep.subr.mxu1 %v11196_v1  ;;  %437 = vmatprep.subr.mxu0 %v6666_v33 }
  0x1b   :  { %5268 = vmatpush3.msra.mxu1 %v6671_v34  ;;  %438 = vmatpush1.msra.mxu0 %v6678_v35 }
  0x1c   :  { %232 = vmatprep.mubr.f32.mxu0 %v11196_v1  ;;  %439 = vmatprep.subr.mxu0 %v6685_v36 }
  0x1d   :  { %5269 = vmatprep.subr.mxu1 %v11196_v1  ;;  %4742 = vmatmul.mubr.msk.f32.gmra.mxu0 %vm106_vm1, %v81_v37 }
  0x1e   :  { %5270 = vmatpush3.msra.mxu1 %v6695_v38  ;;  %440 = vmatpush1.msra.mxu0 %v6702_v39 }
  0x1f   :  { %5242 = vmatprep.mubr.msk.f32.mxu1 %vm106_vm1, %v78_v16  ;;  %441 = vmatprep.subr.mxu0 %v6709_v40 }
  0x20   :  { %5271 = vmatprep.subr.mxu1 %v11196_v1  ;;  %5243 = vmatmul.mubr.msk.f32.gmra.mxu1 %vm106_vm1, %v79_v23  ;;  %v6863_v23 = vrot.slane %v86_v0, %v11199_v3 }
  0x21   :  { %442 = vmatpush1.msra.mxu0 %v6716_v41  ;;  %5272 = vmatpush3.msra.mxu1 %v6723_v42 }
  0x22   :  { %238 = vmatprep.mubr.f32.mxu0 %v11196_v1  ;;  %443 = vmatprep.subr.mxu0 %v6730_v43  ;;  %11485 = vst [vmem:[#allocation5_spill] sm:$0xff] %v6863_v23 }
  0x23   :  { %5273 = vmatprep.subr.mxu1 %v11196_v1  ;;  %4743 = vmatmul.mubr.msk.f32.gmra.mxu0 %vm106_vm1, %v82_v44 }
  0x24   :  { %5274 = vmatpush3.msra.mxu1 %v6740_v45  ;;  %444 = vmatpush1.msra.mxu0 %v6747_v46 }
  0x25   :  { %5245 = vmatprep.mubr.msk.f32.mxu1 %vm106_vm1, %v80_v30  ;;  %445 = vmatprep.subr.mxu0 %v6754_v47 }
  0x26   :  { %5275 = vmatprep.subr.mxu1 %v11196_v1  ;;  %5246 = vmatmul.mubr.msk.f32.gmra.mxu1 %vm106_vm1, %v81_v37 }
  0x27   :  { %446 = vmatpush1.msra.mxu0 %v6761_v48  ;;  %5276 = vmatpush3.msra.mxu1 %v6768_v49 }
  0x28   :  { %244 = vmatprep.mubr.f32.mxu0 %v11196_v1  ;;  %447 = vmatprep.subr.mxu0 %v6775_v50 }
  0x29   :  { %5277 = vmatprep.subr.mxu1 %v11196_v1  ;;  %4744 = vmatmul.mubr.msk.f32.gmra.mxu0 %vm106_vm1, %v83_v51 }
  0x2a   :  { %5278 = vmatpush3.msra.mxu1 %v6785_v52  ;;  %448 = vmatpush1.msra.mxu0 %v6792_v53 }
  0x2b   :  { %5248 = vmatprep.mubr.msk.f32.mxu1 %vm106_vm1, %v82_v44  ;;  %449 = vmatprep.subr.mxu0 %v6799_v54 }
  0x2c   :  { %5279 = vmatprep.subr.mxu1 %v11196_v1  ;;  %5249 = vmatmul.mubr.msk.f32.gmra.mxu1 %vm106_vm1, %v83_v51 }
  0x2d   :  { %450 = vmatpush1.msra.mxu0 %v6806_v55  ;;  %5280 = vmatpush3.msra.mxu1 %v6813_v56 }
  0x2e   :  { %451 = vmatprep.subr.mxu0 %v6818_v57  ;;  %5281 = vmatprep.subr.mxu1 %v11196_v1 }
  0x2f   :  { %452 = vmatpush1.msra.mxu0 %v6825_v58  ;;  %5282 = vmatpush3.msra.mxu1 %v6832_v59 }
  0x30   :  { %485 = vmatprep.mubr.f32.mxu0 %v11196_v1  ;;  %5283 = vmatprep.mubr.msk.f32.mxu1 %vm6420_vm2, %v11196_v1 }
  0x31   :  { %627 = vmatprep.subr.mxu0 %v6839_v60  ;;  %5286 = vmatprep.subr.mxu1 %v11196_v1 }
  0xc4   :  { %v6867_v60 = vpop.f32.mrf.mxu1 }
  0xc5   :  { %11486 = vst [vmem:[#allocation6_spill] sm:$0xff] %v6867_v60 }
  0xc6   :  { %v204_v4 = vpop.f32.mrf.mxu0 }
  0xc7   :  { %v205_v5 = vadd.f32 %v204_v4, %v6857_v2 }
  0xc8   :  { %v206_v30 = vpop.f32.mrf.mxu0 }
  0xc9   :  { %v4754_v16 = vmul.f32 -1.442695, %v205_v5  ;;  %v207_v37 = vadd.f32 %v206_v30, %v6863_v23  ;;  %v6871_v5 = vrot.slane %v86_v0, %v11202_v63  ;;  %v317_v30 = vpop.f32.mrf.mxu1  ;;  %v6885_v0 = vld [vmem:[%s11186_s2 + $0x168] sm:$0xff]  ;;  %v617_v63 = vld [vmem:[%s11186_s2 + $0x130] sm:$0xff] }
  0xcb   :  { %6164 = vpow2.f32 %v4754_v16  ;;  %v4755_v44 = vmul.f32 -1.442695, %v207_v37  ;;  %v6876_v16 = vld [vmem:[%s11188_s4] ss:$0 sm:$0xff] }
  0xcd   :  { %6166 = vpow2.f32 %v4755_v44  ;;  %v318_v44 = vadd.f32 %v317_v30, %v6871_v5  ;;  %v6893_v30 = vld [vmem:[%s11186_s2 + $0x158] sm:$0xff] }
  0xd8   :  { %v6165_v51 = vpop.eup %6164 }
  0xd9   :  { %v359_v61 = vadd.f32 1.0, %v6165_v51 }
  0xda   :  { %v6167_v1 = vpop.eup %6166 }
  0xdb   :  { %6168 = vrcp.f32 %v359_v61  ;;  %v365_v4 = vadd.f32 1.0, %v6167_v1 }
  0xdd   :  { %6170 = vrcp.f32 %v365_v4  ;;  %v626_v4 = vld [vmem:[%s11186_s2 + $0x178] sm:$0xff] }
  0xe8   :  { %v6169_v37 = vpop.eup %6168 }
  0xe9   :  { %v368_v51 = vmul.f32 %v6169_v37, %v6876_v16  ;;  %v6909_v37 = vld [vmem:[%s11186_s2 + $0x140] sm:$0xff] }
  0xea   :  { %v6171_v3 = vpop.eup %6170  ;;  %11488 = vst [vmem:[#allocation8_spill] sm:$0xff] %v6909_v37 }
  0xeb   :  { %v369_v61 = vadd.f32 %v368_v51, %v318_v44  ;;  %v371_v1 = vsub.f32 1.0, %v6171_v3  ;;  %v623_v3 = vld [vmem:[%s11186_s2 + $0x160] sm:$0xff]  ;;  %v11489_v44 = vmov 0.0   ;;  %v6916_v51 = vld [vmem:[%s11186_s2 + $0x138] sm:$0xff] }
  0xec   :  { %11490 = vst [vmem:[#allocation9_spill] sm:$0xff] %v6916_v51 }
  0xed   :  { %6172 = vtanh.f32 %v369_v61  ;;  %v620_v61 = vld [vmem:[%s11186_s2 + $0x148] sm:$0xff] }
  0xfa   :  { %v6173_v60 = vpop.eup %6172 }
  0xfb   :  { %v6880_v62 = vmul.f32 %v6173_v60, %v371_v1  ;;  %v6900_v60 = vld [vmem:[%s11186_s2 + $0x150] sm:$0xff]  ;;  %v6925_v1 = vld [vmem:[%s11186_s2 + $0x128] sm:$0xff] }
  0xfc   :  { %11487 = vst [vmem:[#allocation7_spill] sm:$0xff] %v6900_v60  ;;  %11491 = vst [vmem:[#allocation10_spill] sm:$0xff] %v6925_v1 }
  0xfd   :  { %486 = vmatmul.mubr.f32.vlgmr.msra.gmra.mxu0 %v6880_v62  ;;  %5284 = vmatmul.mubr.f32.vlgmr.msra.gmra.mxu1 %v6880_v62 }
  0xfe   :  { %628 = vmatpush1.msra.mxu0 %v6885_v0  ;;  %5287 = vmatpush3.msra.mxu1 %v626_v4  ;;  %v6932_v4 = vld [vmem:[%s11186_s2 + $0x120] sm:$0xff] }
  0xff   :  { %629 = vmatprep.subr.mxu0 %v6893_v30  ;;  %5288 = vmatprep.subr.mxu1 %v11489_v44  ;;  %11492 = vst [vmem:[#allocation11_spill] sm:$0xff] %v6932_v4 }
 0x100   :  { %630 = vmatpush1.msra.mxu0 %v6900_v60  ;;  %5289 = vmatpush3.msra.mxu1 %v623_v3  ;;  %v6941_v3 = vld [vmem:[%s11186_s2 + $0x110] sm:$0xff]  ;;  %v614_v60 = vld [vmem:[%s11186_s2 + $0x118] sm:$0xff] }
 0x101   :  { %631 = vmatprep.subr.mxu0 %v6909_v37  ;;  %5290 = vmatprep.subr.mxu1 %v11489_v44  ;;  %11493 = vst [vmem:[#allocation12_spill] sm:$0xff] %v6941_v3  ;;  %v6948_v37 = vld [vmem:[%s11186_s2 + $0x108] sm:$0xff] }
 0x102   :  { %632 = vmatpush1.msra.mxu0 %v6916_v51  ;;  %5291 = vmatpush3.msra.mxu1 %v620_v61  ;;  %11494 = vst [vmem:[#allocation13_spill] sm:$0xff] %v6948_v37  ;;  %v6957_v61 = vld [vmem:[%s11186_s2 + $0xf8] sm:$0xff]  ;;  %v611_v51 = vld [vmem:[%s11186_s2 + $0x100] sm:$0xff] }
 0x103   :  { %633 = vmatprep.subr.mxu0 %v6925_v1  ;;  %5292 = vmatprep.subr.mxu1 %v11489_v44  ;;  %11495 = vst [vmem:[#allocation14_spill] sm:$0xff] %v6957_v61  ;;  %v6964_v1 = vld [vmem:[%s11186_s2 + $0xf0] sm:$0xff] }
 0x104   :  { %634 = vmatpush1.msra.mxu0 %v6932_v4  ;;  %5293 = vmatpush3.msra.mxu1 %v617_v63  ;;  %11496 = vst [vmem:[#allocation15_spill] sm:$0xff] %v6964_v1  ;;  %v6973_v63 = vld [vmem:[%s11186_s2 + $0xe0] sm:$0xff]  ;;  %v608_v4 = vld [vmem:[%s11186_s2 + $0xe8] sm:$0xff] }
 0x105   :  { %635 = vmatprep.subr.mxu0 %v6941_v3  ;;  %5294 = vmatprep.subr.mxu1 %v11489_v44  ;;  %11497 = vst [vmem:[#allocation16_spill] sm:$0xff] %v6973_v63  ;;  %v6980_v3 = vld [vmem:[%s11186_s2 + $0xd8] sm:$0xff] }
 0x106   :  { %636 = vmatpush1.msra.mxu0 %v6948_v37  ;;  %5295 = vmatpush3.msra.mxu1 %v614_v60  ;;  %11498 = vst [vmem:[#allocation17_spill] sm:$0xff] %v6980_v3  ;;  %v6989_v60 = vld [vmem:[%s11186_s2 + $0xc8] sm:$0xff]  ;;  %v605_v37 = vld [vmem:[%s11186_s2 + $0xd0] sm:$0xff] }
 0x107   :  { %637 = vmatprep.subr.mxu0 %v6957_v61  ;;  %5296 = vmatprep.subr.mxu1 %v11489_v44  ;;  %11499 = vst [vmem:[#allocation18_spill] sm:$0xff] %v6989_v60  ;;  %v6996_v61 = vld [vmem:[%s11186_s2 + $0xc0] sm:$0xff] }
 0x108   :  { %638 = vmatpush1.msra.mxu0 %v6964_v1  ;;  %5297 = vmatpush3.msra.mxu1 %v611_v51  ;;  %11500 = vst [vmem:[#allocation19_spill] sm:$0xff] %v6996_v61  ;;  %v7005_v51 = vld [vmem:[%s11186_s2 + $0xb0] sm:$0xff]  ;;  %v602_v1 = vld [vmem:[%s11186_s2 + $0xb8] sm:$0xff] }
 0x109   :  { %639 = vmatprep.subr.mxu0 %v6973_v63  ;;  %5298 = vmatprep.subr.mxu1 %v11489_v44  ;;  %11501 = vst [vmem:[#allocation20_spill] sm:$0xff] %v7005_v51  ;;  %v7012_v63 = vld [vmem:[%s11186_s2 + $0xa8] sm:$0xff] }
 0x10a   :  { %640 = vmatpush1.msra.mxu0 %v6980_v3  ;;  %5299 = vmatpush3.msra.mxu1 %v608_v4  ;;  %v7021_v4 = vld [vmem:[%s11186_s2 + $0x98] sm:$0xff]  ;;  %v7033_v3 = vld [vmem:[%s11186_s2 + $0xa0] sm:$0xff] }
 0x10b   :  { %641 = vmatprep.subr.mxu0 %v6989_v60  ;;  %5300 = vmatprep.subr.mxu1 %v11489_v44  ;;  %11502 = vst [vmem:[#allocation21_spill] sm:$0xff] %v7021_v4  ;;  %v7028_v60 = vld [vmem:[%s11186_s2 + $0x90] sm:$0xff]  ;;  %11504 = vst [vmem:[#allocation23_spill] sm:$0xff] %v7033_v3 }
 0x10c   :  { %642 = vmatpush1.msra.mxu0 %v6996_v61  ;;  %5301 = vmatpush3.msra.mxu1 %v605_v37  ;;  %11503 = vst [vmem:[#allocation22_spill] sm:$0xff] %v7028_v60  ;;  %v7039_v37 = vld [vmem:[%s11186_s2 + $0x80] sm:$0xff]  ;;  %v7051_v61 = vld [vmem:[%s11186_s2 + $0x88] sm:$0xff] }
 0x10d   :  { %643 = vmatprep.subr.mxu0 %v7005_v51  ;;  %5302 = vmatprep.subr.mxu1 %v11489_v44  ;;  %11505 = vst [vmem:[#allocation24_spill] sm:$0xff] %v7039_v37  ;;  %v7046_v51 = vld [vmem:[%s11186_s2 + $0x78] sm:$0xff]  ;;  %11507 = vst [vmem:[#allocation26_spill] sm:$0xff] %v7051_v61 }
 0x10e   :  { %644 = vmatpush1.msra.mxu0 %v7012_v63  ;;  %5303 = vmatpush3.msra.mxu1 %v602_v1  ;;  %11506 = vst [vmem:[#allocation25_spill] sm:$0xff] %v7046_v51  ;;  %v7058_v1 = vld [vmem:[%s11186_s2 + $0x68] sm:$0xff] }
 0x10f   :  { %645 = vmatprep.subr.mxu0 %v7021_v4  ;;  %5304 = vmatprep.subr.mxu1 %v11489_v44  ;;  %11508 = vst [vmem:[#allocation27_spill] sm:$0xff] %v7058_v1  ;;  %v7065_v4 = vld [vmem:[%s11186_s2 + $0x60] sm:$0xff] }
 0x110   :  { %646 = vmatpush1.msra.mxu0 %v7028_v60  ;;  %5305 = vmatpush3.msra.mxu1 %v7033_v3  ;;  %11509 = vst [vmem:[#allocation28_spill] sm:$0xff] %v7065_v4  ;;  %v7070_v60 = vld [vmem:[%s11186_s2 + $0x70] sm:$0xff] }
 0x111   :  { %647 = vmatprep.subr.mxu0 %v7039_v37  ;;  %5306 = vmatprep.subr.mxu1 %v11489_v44  ;;  %11510 = vst [vmem:[#allocation29_spill] sm:$0xff] %v7070_v60  ;;  %v7077_v3 = vld [vmem:[%s11186_s2 + $0x50] sm:$0xff]  ;;  %v7084_v37 = vld [vmem:[%s11186_s2 + $0x48] sm:$0xff] }
 0x112   :  { %648 = vmatpush1.msra.mxu0 %v7046_v51  ;;  %5307 = vmatpush3.msra.mxu1 %v7051_v61  ;;  %11511 = vst [vmem:[#allocation30_spill] sm:$0xff] %v7077_v3  ;;  %11512 = vst [vmem:[#allocation31_spill] sm:$0xff] %v7084_v37  ;;  %v7089_v51 = vld [vmem:[%s11186_s2 + $0x58] sm:$0xff] }
 0x113   :  { %649 = vmatprep.subr.mxu0 %v7058_v1  ;;  %5308 = vmatprep.subr.mxu1 %v11489_v44  ;;  %11513 = vst [vmem:[#allocation32_spill] sm:$0xff] %v7089_v51  ;;  %v7096_v61 = vld [vmem:[%s11186_s2 + $0x38] sm:$0xff]  ;;  %v7103_v1 = vld [vmem:[%s11186_s2 + $0x30] sm:$0xff] }
 0x114   :  { %650 = vmatpush1.msra.mxu0 %v7065_v4  ;;  %5309 = vmatpush3.msra.mxu1 %v7070_v60  ;;  %11514 = vst [vmem:[#allocation33_spill] sm:$0xff] %v7096_v61  ;;  %v7108_v4 = vld [vmem:[%s11186_s2 + $0x40] sm:$0xff] }
 0x115   :  { %651 = vmatprep.subr.mxu0 %v7077_v3  ;;  %5310 = vmatprep.subr.mxu1 %v11489_v44  ;;  %11515 = vst [vmem:[#allocation34_spill] sm:$0xff] %v7108_v4  ;;  %v7115_v60 = vld [vmem:[%s11186_s2 + $0x20] sm:$0xff]  ;;  %v7122_v3 = vld [vmem:[%s11186_s2 + $0x18] sm:$0xff] }
 0x116   :  { %652 = vmatpush1.msra.mxu0 %v7084_v37  ;;  %5311 = vmatpush3.msra.mxu1 %v7089_v51  ;;  %v7127_v37 = vld [vmem:[%s11186_s2 + $0x28] sm:$0xff] }
 0x117   :  { %653 = vmatprep.subr.mxu0 %v7096_v61  ;;  %5312 = vmatprep.subr.mxu1 %v11489_v44  ;;  %v7134_v51 = vld [vmem:[%s11186_s2 + $0x8] sm:$0xff]  ;;  %v7141_v61 = vld [vmem:[%s11186_s2] sm:$0xff] }
 0x118   :  { %654 = vmatpush1.msra.mxu0 %v7103_v1  ;;  %5313 = vmatpush3.msra.mxu1 %v7108_v4  ;;  %v7148_v4 = vld [vmem:[%s11186_s2 + $0x10] sm:$0xff] }
 0x119   :  { %655 = vmatprep.subr.mxu0 %v7115_v60  ;;  %5314 = vmatprep.subr.mxu1 %v11489_v44 }
 0x11a   :  { %656 = vmatpush1.msra.mxu0 %v7122_v3  ;;  %5315 = vmatpush3.msra.mxu1 %v7127_v37 }
 0x11b   :  { %657 = vmatprep.subr.mxu0 %v7134_v51  ;;  %5316 = vmatprep.subr.mxu1 %v11489_v44 }
 0x11c   :  { %658 = vmatpush1.msra.mxu0 %v7141_v61  ;;  %691 = vmatprep.mubr.f32.mxu0 %v11489_v44 }
 0x11d   :  { %5317 = vmatpush3.msra.mxu1 %v7148_v4  ;;  %5318 = vmatprep.mubr.msk.f32.mxu1 %vm6420_vm2, %v11489_v44 }
 0x11e   :  { %692 = vmatmul.mubr.f32.vlgmr.msra.gmra.mxu0 %v6880_v62  ;;  %5319 = vmatmul.mubr.f32.vlgmr.msra.gmra.mxu1 %v6880_v62 }
 0x11f   :  { %790 = vmatprep.subr.mxu0 %v6504_v6  ;;  %5321 = vmatprep.subr.mxu1 %v11489_v44  ;;  %v7230_v6 = vld [vmem:[%s11189_s6 + $0x170] sm:$0xff] }
 0x120   :  { %791 = vmatpush1.msra.mxu0 %v6510_v7  ;;  %5322 = vmatpush3.msra.mxu1 %v6515_v8  ;;  %v210_v7 = vpop.f32.mrf.mxu0  ;;  %v7233_v8 = vpop.f32.mrf.mxu1 }
 0x121   :  { %792 = vmatprep.subr.mxu0 %v6522_v9  ;;  %5323 = vmatprep.subr.mxu1 %v11489_v44  ;;  %11516 = vst [vmem:[#allocation35_spill] sm:$0xff] %v7233_v8  ;;  %v7545_v8 = vld [vmem:[%s11189_s6 + $0x38] sm:$0xff] }
 0x122   :  { %793 = vmatpush1.msra.mxu0 %v6529_v10  ;;  %5324 = vmatpush3.msra.mxu1 %v6534_v11  ;;  %v212_v9 = vpop.f32.mrf.mxu0  ;;  %v7235_v10 = vpop.f32.mrf.mxu1  ;;  %11547 = vst [vmem:[#allocation59_spill] sm:$0xff] %v7545_v8 }
 0x123   :  { %794 = vmatprep.subr.mxu0 %v6541_v12  ;;  %5325 = vmatprep.subr.mxu1 %v11489_v44 }
 0x124   :  { %795 = vmatpush1.msra.mxu0 %v6548_v13  ;;  %5326 = vmatpush3.msra.mxu1 %v6553_v14  ;;  %v7237_v11 = vpop.f32.mrf.mxu0  ;;  %v7239_v12 = vpop.f32.mrf.mxu1 }
 0x125   :  { %796 = vmatprep.subr.mxu0 %v6560_v15  ;;  %5327 = vmatprep.subr.mxu1 %v11489_v44  ;;  %11517 = vst [vmem:[#allocation36_spill] sm:$0xff] %v7239_v12  ;;  %v7507_v12 = vld [vmem:[%s11189_s6 + $0x68] sm:$0xff] }
 0x126   :  { %797 = vmatpush1.msra.mxu0 %v6570_v17  ;;  %5328 = vmatpush3.msra.mxu1 %v6575_v18  ;;  %v7241_v13 = vpop.f32.mrf.mxu0  ;;  %v7243_v14 = vpop.f32.mrf.mxu1  ;;  %11541 = vst [vmem:[#allocation53_spill] sm:$0xff] %v7507_v12 }
 0x127   :  { %798 = vmatprep.subr.mxu0 %v6582_v19  ;;  %5329 = vmatprep.subr.mxu1 %v11489_v44  ;;  %11518 = vst [vmem:[#allocation37_spill] sm:$0xff] %v7243_v14  ;;  %v7526_v14 = vld [vmem:[%s11189_s6 + $0x50] sm:$0xff] }
 0x128   :  { %799 = vmatpush1.msra.mxu0 %v6589_v20  ;;  %5330 = vmatpush3.msra.mxu1 %v6594_v21  ;;  %v7245_v15 = vpop.f32.mrf.mxu0  ;;  %v7247_v17 = vpop.f32.mrf.mxu1  ;;  %11544 = vst [vmem:[#allocation56_spill] sm:$0xff] %v7526_v14 }
 0x129   :  { %800 = vmatprep.subr.mxu0 %v6601_v22  ;;  %5331 = vmatprep.subr.mxu1 %v11489_v44  ;;  %11519 = vst [vmem:[#allocation38_spill] sm:$0xff] %v7245_v15  ;;  %11520 = vst [vmem:[#allocation39_spill] sm:$0xff] %v7247_v17  ;;  %v7457_v17 = vld [vmem:[%s11189_s6 + $0xa8] sm:$0xff]  ;;  %v7557_v15 = vld [vmem:[%s11189_s6 + $0x40] sm:$0xff] }
 0x12a   :  { %801 = vmatpush1.msra.mxu0 %v6611_v24  ;;  %5332 = vmatpush3.msra.mxu1 %v6616_v25  ;;  %v7249_v18 = vpop.f32.mrf.mxu0  ;;  %v7251_v19 = vpop.f32.mrf.mxu1  ;;  %11549 = vst [vmem:[#allocation61_spill] sm:$0xff] %v7557_v15 }
 0x12b   :  { %802 = vmatprep.subr.mxu0 %v6623_v26  ;;  %5333 = vmatprep.subr.mxu1 %v11489_v44  ;;  %11521 = vst [vmem:[#allocation40_spill] sm:$0xff] %v7249_v18  ;;  %11522 = vst [vmem:[#allocation41_spill] sm:$0xff] %v7251_v19  ;;  %v7488_v19 = vld [vmem:[%s11189_s6 + $0x80] sm:$0xff]  ;;  %v7552_v18 = vld [vmem:[%s11189_s6 + $0x30] sm:$0xff] }
 0x12c   :  { %803 = vmatpush1.msra.mxu0 %v6630_v27  ;;  %5334 = vmatpush3.msra.mxu1 %v6635_v28  ;;  %v7253_v20 = vpop.f32.mrf.mxu0  ;;  %11548 = vst [vmem:[#allocation60_spill] sm:$0xff] %v7552_v18 }
 0x12d   :  { %804 = vmatprep.subr.mxu0 %v6642_v29  ;;  %5335 = vmatprep.subr.mxu1 %v11489_v44  ;;  %11523 = vst [vmem:[#allocation42_spill] sm:$0xff] %v7253_v20  ;;  %v7538_v20 = vld [vmem:[%s11189_s6 + $0x58] sm:$0xff] }
 0x12e   :  { %805 = vmatpush1.msra.mxu0 %v6659_v32  ;;  %5336 = vmatpush3.msra.mxu1 %v6652_v31  ;;  %v7257_v22 = vpop.f32.mrf.mxu0  ;;  %11546 = vst [vmem:[#allocation58_spill] sm:$0xff] %v7538_v20 }
 0x12f   :  { %806 = vmatprep.subr.mxu0 %v6666_v33  ;;  %5337 = vmatprep.subr.mxu1 %v11489_v44  ;;  %11524 = vst [vmem:[#allocation43_spill] sm:$0xff] %v7257_v22  ;;  %v7533_v22 = vld [vmem:[%s11189_s6 + $0x48] sm:$0xff] }
 0x130   :  { %807 = vmatpush1.msra.mxu0 %v6678_v35  ;;  %5338 = vmatpush3.msra.mxu1 %v6671_v34  ;;  %v7259_v25 = vpop.f32.mrf.mxu0  ;;  %v211_v34 = vadd.f32 %v210_v7, %v6857_v2  ;;  %11545 = vst [vmem:[#allocation57_spill] sm:$0xff] %v7533_v22 }
 0x131   :  { %808 = vmatprep.subr.mxu0 %v6685_v36  ;;  %5339 = vmatprep.subr.mxu1 %v11489_v44  ;;  %11525 = vst [vmem:[#allocation44_spill] sm:$0xff] %v7259_v25  ;;  %v7519_v25 = vld [vmem:[%s11189_s6 + $0x70] sm:$0xff] }
 0x132   :  { %809 = vmatpush1.msra.mxu0 %v6702_v39  ;;  %5340 = vmatpush3.msra.mxu1 %v6695_v38  ;;  %v7261_v26 = vpop.f32.mrf.mxu0  ;;  %11543 = vst [vmem:[#allocation55_spill] sm:$0xff] %v7519_v25 }
 0x133   :  { %810 = vmatprep.subr.mxu0 %v6709_v40  ;;  %5341 = vmatprep.subr.mxu1 %v11489_v44  ;;  %11526 = vst [vmem:[#allocation45_spill] sm:$0xff] %v7261_v26  ;;  %v7514_v26 = vld [vmem:[%s11189_s6 + $0x60] sm:$0xff] }
 0x134   :  { %811 = vmatpush1.msra.mxu0 %v6716_v41  ;;  %5342 = vmatpush3.msra.mxu1 %v6723_v42  ;;  %v7263_v27 = vpop.f32.mrf.mxu0  ;;  %v213_v42 = vadd.f32 %v212_v9, %v6863_v23  ;;  %11542 = vst [vmem:[#allocation54_spill] sm:$0xff] %v7514_v26 }
 0x135   :  { %812 = vmatprep.subr.mxu0 %v6730_v43  ;;  %5343 = vmatprep.subr.mxu1 %v11489_v44  ;;  %11527 = vst [vmem:[#allocation46_spill] sm:$0xff] %v7263_v27  ;;  %v7500_v27 = vld [vmem:[%s11189_s6 + $0x88] sm:$0xff] }
 0x136   :  { %813 = vmatpush1.msra.mxu0 %v6747_v46  ;;  %5344 = vmatpush3.msra.mxu1 %v6740_v45  ;;  %v7265_v28 = vpop.f32.mrf.mxu0  ;;  %v38_v46 = vld [vmem:[%s11190_s7] sm:$0x7]  ;;  %11540 = vst [vmem:[#allocation52_spill] sm:$0xff] %v7500_v27 }
 0x137   :  { %814 = vmatprep.subr.mxu0 %v6754_v47  ;;  %5345 = vmatprep.subr.mxu1 %v11489_v44  ;;  %11528 = vst [vmem:[#allocation47_spill] sm:$0xff] %v7265_v28  ;;  %v11531_v47 = vld [vmem:[#allocation3_spill] sm:$0xff]  ;;  %v7495_v28 = vld [vmem:[%s11189_s6 + $0x78] sm:$0xff] }
 0x138   :  { %815 = vmatpush1.msra.mxu0 %v6761_v48  ;;  %5346 = vmatpush3.msra.mxu1 %v6768_v49  ;;  %v7267_v29 = vpop.f32.mrf.mxu0  ;;  %v11532_v48 = vsub.s32 0, %v11531_v47  ;;  %11539 = vst [vmem:[#allocation51_spill] sm:$0xff] %v7495_v28 }
 0x139   :  { %816 = vmatprep.subr.mxu0 %v6775_v50  ;;  %5347 = vmatprep.subr.mxu1 %v11489_v44  ;;  %11529 = vst [vmem:[#allocation48_spill] sm:$0xff] %v7267_v29  ;;  %v7476_v29 = vld [vmem:[%s11189_s6 + $0x90] sm:$0xff] }
 0x13a   :  { %817 = vmatpush1.msra.mxu0 %v6792_v53  ;;  %5348 = vmatpush3.msra.mxu1 %v6785_v52  ;;  %v7269_v31 = vpop.f32.mrf.mxu0  ;;  %v7278_v49 = vrot.slane %v38_v46, %v11532_v48  ;;  %v7295_v48 = vld [vmem:[%s11189_s6 + $0x168] sm:$0xff] }
 0x13b   :  { %818 = vmatprep.subr.mxu0 %v6799_v54  ;;  %5349 = vmatprep.subr.mxu1 %v11489_v44  ;;  %11530 = vst [vmem:[#allocation49_spill] sm:$0xff] %v7269_v31  ;;  %v7469_v31 = vld [vmem:[%s11189_s6 + $0x98] sm:$0xff] }
 0x13c   :  { %819 = vmatpush1.msra.mxu0 %v6806_v55  ;;  %5350 = vmatpush3.msra.mxu1 %v6813_v56  ;;  %11533 = vst [vmem:[#allocation3_spill] sm:$0xff] %v7278_v49 }
 0x13d   :  { %820 = vmatprep.subr.mxu0 %v6818_v57  ;;  %5351 = vmatprep.subr.mxu1 %v11489_v44 }
 0x13e   :  { %821 = vmatpush1.msra.mxu0 %v6825_v58  ;;  %5352 = vmatpush3.msra.mxu1 %v6832_v59  ;;  %v11534_v59 = vld [vmem:[#allocation6_spill] sm:$0xff] }
 0x13f   :  { %854 = vmatprep.mubr.f32.mxu0 %v11489_v44  ;;  %5353 = vmatprep.mubr.msk.f32.mxu1 %vm6420_vm2, %v11489_v44  ;;  %v323_v7 = vadd.f32 %v11534_v59, %v6871_v5  ;;  %v7355_v59 = vld [vmem:[%s11189_s6 + $0x120] sm:$0xff] }
 0x140   :  { %5356 = vmatprep.subr.mxu1 %v11489_v44  ;;  %979 = vmatprep.subr.mxu0 %v7230_v6 }
 0x1bd   :  { %v7255_v21 = vpop.f32.mrf.mxu1  ;;  %v487_v32 = vpop.f32.mrf.mxu0 }
 0x1be   :  { %v488_v53 = vadd.f32 %v487_v32, %v7278_v49 }
 0x1bf   :  { %v5285_v24 = vpop.f32.mrf.mxu1  ;;  %v489_v33 = vpop.f32.mrf.mxu0 }
 0x1c0   :  { %v4756_v54 = vmul.f32 -1.442695, %v488_v53  ;;  %v7324_v53 = vld [vmem:[%s11189_s6 + $0x140] sm:$0xff] }
 0x1de   :  { %v693_v35 = vpop.f32.mrf.mxu0  ;;  %v764_v36 = vpop.f32.mrf.mxu1 }
 0x1df   :  { %v768_v38 = vadd.f32 %v693_v35, %v211_v34  ;;  %v782_v57 = vadd.f32 %v6876_v16, %v764_v36  ;;  %v11535_v34 = vsub.s32 1, %v11531_v47 }
 0x1e0   :  { %v5320_v39 = vpop.f32.mrf.mxu1  ;;  %v695_v41 = vpop.f32.mrf.mxu0 }
 0x1e1   :  { %v4758_v40 = vmul.f32 -1.442695, %v768_v38  ;;  %v775_v43 = vadd.f32 %v695_v41, %v213_v42  ;;  %v7286_v35 = vrot.slane %v38_v46, %v11535_v34  ;;  %v7371_v34 = vld [vmem:[%s11189_s6 + $0x110] sm:$0xff] }
 0x1e3   :  { %6174 = vpow2.f32 %v4758_v40  ;;  %v4759_v45 = vmul.f32 -1.442695, %v775_v43  ;;  %11536 = vst [vmem:[#allocation6_spill] sm:$0xff] %v7286_v35  ;;  %v490_v38 = vadd.f32 %v489_v33, %v7286_v35  ;;  %v7300_v33 = vld [vmem:[%s11189_s6 + $0x178] sm:$0xff] }
 0x1e5   :  { %6176 = vpow2.f32 %v4759_v45  ;;  %v4757_v40 = vmul.f32 -1.442695, %v490_v38 }
 0x1f0   :  { %v6175_v50 = vpop.eup %6174 }
 0x1f1   :  { %v772_v52 = vadd.f32 1.0, %v6175_v50  ;;  %v7305_v50 = vld [vmem:[%s11189_s6 + $0x158] sm:$0xff] }
 0x1f2   :  { %v6177_v55 = vpop.eup %6176 }
 0x1f3   :  { %6178 = vrcp.f32 %v772_v52  ;;  %v779_v56 = vadd.f32 1.0, %v6177_v55  ;;  %v7317_v52 = vld [vmem:[%s11189_s6 + $0x160] sm:$0xff]  ;;  %v7336_v55 = vld [vmem:[%s11189_s6 + $0x148] sm:$0xff] }
 0x1f4   :  { %6180 = vpow2.f32 %v4756_v54  ;;  %v7331_v54 = vld [vmem:[%s11189_s6 + $0x138] sm:$0xff] }
 0x1f5   :  { %6182 = vrcp.f32 %v779_v56  ;;  %v7343_v56 = vld [vmem:[%s11189_s6 + $0x128] sm:$0xff] }
 0x200   :  { %v6179_v58 = vpop.eup %6178 }
 0x201   :  { %v783_v9 = vmul.f32 %v6179_v58, %v782_v57  ;;  %v6181_v32 = vpop.eup %6180  ;;  %v7348_v58 = vld [vmem:[%s11191_s8] ss:$0 sm:$0xff] }
 0x202   :  { %v565_v39 = vadd.f32 1.0, %v6181_v32  ;;  %v6183_v41 = vpop.eup %6182 }
 0x203   :  { %v784_v24 = vadd.f32 %v783_v9, %v323_v7  ;;  %v786_v16 = vsub.f32 1.0, %v6183_v41  ;;  %v788_v43 = vmul.f32 %v6183_v41, %v6880_v62  ;;  %v7312_v62 = vld [vmem:[%s11189_s6 + $0x150] sm:$0xff]  ;;  %v11537_v9 = vsub.s32 2, %v11531_v47  ;;  %v7378_v47 = vld [vmem:[%s11189_s6 + $0x108] sm:$0xff]  ;;  %v7403_v41 = vld [vmem:[%s11189_s6 + $0x100] sm:$0xff] }
 0x204   :  { %v7360_v7 = vld [vmem:[%s11189_s6 + $0x130] sm:$0xff] }
 0x205   :  { %6184 = vtanh.f32 %v784_v24  ;;  %v7364_v24 = vrot.slane %v38_v46, %v11537_v9  ;;  %v7383_v46 = vld [vmem:[%s11189_s6 + $0x118] sm:$0xff]  ;;  %v7431_v9 = vld [vmem:[%s11189_s6 + $0xc8] sm:$0xff] }
 0x206   :  { %6186 = vrcp.f32 %v565_v39  ;;  %v7391_v39 = vld [vmem:[%s11189_s6 + $0xf8] sm:$0xff] }
 0x207   :  { %6188 = vpow2.f32 %v4757_v40  ;;  %11538 = vst [vmem:[#allocation50_spill] sm:$0xff] %v7364_v24  ;;  %v7398_v40 = vld [vmem:[%s11189_s6 + $0xf0] sm:$0xff] }
 0x212   :  { %v6185_v36 = vpop.eup %6184 }
 0x213   :  { %v787_v42 = vmul.f32 %v6185_v36, %v786_v16  ;;  %v6187_v57 = vpop.eup %6186  ;;  %v559_v16 = vadd.f32 %v7255_v21, %v7364_v24  ;;  %v7424_v21 = vld [vmem:[%s11189_s6 + $0xe8] sm:$0xff] }
 0x214   :  { %v6189_v32 = vpop.eup %6188  ;;  %v574_v38 = vmul.f32 %v6187_v57, %v7348_v58 }
 0x215   :  { %v7290_v45 = vadd.f32 %v788_v43, %v787_v42  ;;  %v571_v36 = vadd.f32 1.0, %v6189_v32  ;;  %v7412_v42 = vld [vmem:[%s11189_s6 + $0xe0] sm:$0xff]  ;;  %v7419_v43 = vld [vmem:[%s11189_s6 + $0xd8] sm:$0xff] }
 0x216   :  { %v575_v57 = vadd.f32 %v574_v38, %v559_v16  ;;  %v7438_v32 = vld [vmem:[%s11189_s6 + $0xc0] sm:$0xff]  ;;  %v7443_v38 = vld [vmem:[%s11189_s6 + $0xd0] sm:$0xff] }
 0x217   :  { %855 = vmatmul.mubr.f32.vlgmr.msra.gmra.mxu0 %v7290_v45  ;;  %5354 = vmatmul.mubr.f32.vlgmr.msra.gmra.mxu1 %v7290_v45  ;;  %6190 = vrcp.f32 %v571_v36  ;;  %v7450_v16 = vld [vmem:[%s11189_s6 + $0xb0] sm:$0xff]  ;;  %v7462_v36 = vld [vmem:[%s11189_s6 + $0xb8] sm:$0xff] }
 0x218   :  { %980 = vmatpush1.msra.mxu0 %v7295_v48  ;;  %5357 = vmatpush3.msra.mxu1 %v7300_v33  ;;  %6192 = vtanh.f32 %v575_v57  ;;  %v7481_v57 = vld [vmem:[%s11189_s6 + $0xa0] sm:$0xff] }
 0x219   :  { %981 = vmatprep.subr.mxu0 %v7305_v50  ;;  %5358 = vmatprep.subr.mxu1 %v11489_v44 }
 0x21a   :  { %982 = vmatpush1.msra.mxu0 %v7312_v62  ;;  %5359 = vmatpush3.msra.mxu1 %v7317_v52 }
 0x21b   :  { %983 = vmatprep.subr.mxu0 %v7324_v53  ;;  %5360 = vmatprep.subr.mxu1 %v11489_v44 }
 0x21c   :  { %984 = vmatpush1.msra.mxu0 %v7331_v54  ;;  %5361 = vmatpush3.msra.mxu1 %v7336_v55 }
 0x21d   :  { %985 = vmatprep.subr.mxu0 %v7343_v56  ;;  %5362 = vmatprep.subr.mxu1 %v11489_v44 }
 0x21e   :  { %986 = vmatpush1.msra.mxu0 %v7355_v59  ;;  %5363 = vmatpush3.msra.mxu1 %v7360_v7 }
 0x21f   :  { %987 = vmatprep.subr.mxu0 %v7371_v34  ;;  %5364 = vmatprep.subr.mxu1 %v11489_v44 }
 0x220   :  { %988 = vmatpush1.msra.mxu0 %v7378_v47  ;;  %5365 = vmatpush3.msra.mxu1 %v7383_v46 }
 0x221   :  { %989 = vmatprep.subr.mxu0 %v7391_v39  ;;  %5366 = vmatprep.subr.mxu1 %v11489_v44 }
 0x222   :  { %990 = vmatpush1.msra.mxu0 %v7398_v40  ;;  %5367 = vmatpush3.msra.mxu1 %v7403_v41 }
 0x223   :  { %991 = vmatprep.subr.mxu0 %v7412_v42  ;;  %5368 = vmatprep.subr.mxu1 %v11489_v44 }
 0x224   :  { %992 = vmatpush1.msra.mxu0 %v7419_v43  ;;  %5369 = vmatpush3.msra.mxu1 %v7424_v21 }
 0x225   :  { %993 = vmatprep.subr.mxu0 %v7431_v9  ;;  %5370 = vmatprep.subr.mxu1 %v11489_v44 }
 0x226   :  { %994 = vmatpush1.msra.mxu0 %v7438_v32  ;;  %5371 = vmatpush3.msra.mxu1 %v7443_v38 }
 0x227   :  { %995 = vmatprep.subr.mxu0 %v7450_v16  ;;  %5372 = vmatprep.subr.mxu1 %v11489_v44 }
 0x228   :  { %996 = vmatpush1.msra.mxu0 %v7457_v17  ;;  %5373 = vmatpush3.msra.mxu1 %v7462_v36 }
 0x229   :  { %997 = vmatprep.subr.mxu0 %v7469_v31  ;;  %5374 = vmatprep.subr.mxu1 %v11489_v44 }
 0x22a   :  { %998 = vmatpush1.msra.mxu0 %v7476_v29  ;;  %5375 = vmatpush3.msra.mxu1 %v7481_v57 }
 0x22b   :  { %999 = vmatprep.subr.mxu0 %v7488_v19  ;;  %5376 = vmatprep.subr.mxu1 %v11489_v44 }
 0x22c   :  { %1000 = vmatpush1.msra.mxu0 %v7495_v28  ;;  %5377 = vmatpush3.msra.mxu1 %v7500_v27 }
 0x22d   :  { %1001 = vmatprep.subr.mxu0 %v7507_v12  ;;  %5378 = vmatprep.subr.mxu1 %v11489_v44  ;;  %v7590_v12 = vld [vmem:[%s11189_s6] sm:$0xff] }
 0x22e   :  { %1002 = vmatpush1.msra.mxu0 %v7514_v26  ;;  %5379 = vmatpush3.msra.mxu1 %v7519_v25  ;;  %v6191_v25 = vpop.eup %6190  ;;  %v7571_v26 = vld [vmem:[%s11189_s6 + $0x18] sm:$0xff]  ;;  %11554 = vst [vmem:[#allocation66_spill] sm:$0xff] %v7590_v12 }
 0x22f   :  { %1003 = vmatprep.subr.mxu0 %v7526_v14  ;;  %5380 = vmatprep.subr.mxu1 %v11489_v44  ;;  %v7564_v14 = vld [vmem:[%s11189_s6 + $0x20] sm:$0xff]  ;;  %11551 = vst [vmem:[#allocation63_spill] sm:$0xff] %v7571_v26  ;;  %v577_v27 = vsub.f32 1.0, %v6191_v25 }
 0x230   :  { %1004 = vmatpush1.msra.mxu0 %v7533_v22  ;;  %5381 = vmatpush3.msra.mxu1 %v7538_v20  ;;  %11550 = vst [vmem:[#allocation62_spill] sm:$0xff] %v7564_v14  ;;  %v7576_v22 = vld [vmem:[%s11189_s6 + $0x28] sm:$0xff]  ;;  %v6193_v20 = vpop.eup %6192  ;;  %v11556_v25 = vld [vmem:[#allocation2_spill] sm:$0xff] }
 0x231   :  { %1005 = vmatprep.subr.mxu0 %v7545_v8  ;;  %5382 = vmatprep.subr.mxu1 %v11489_v44  ;;  %11552 = vst [vmem:[#allocation64_spill] sm:$0xff] %v7576_v22  ;;  %v7583_v8 = vld [vmem:[%s11189_s6 + $0x8] sm:$0xff] }
 0x232   :  { %1006 = vmatpush1.msra.mxu0 %v7552_v18  ;;  %5383 = vmatpush3.msra.mxu1 %v7557_v15  ;;  %11553 = vst [vmem:[#allocation65_spill] sm:$0xff] %v7583_v8  ;;  %v7597_v15 = vld [vmem:[%s11189_s6 + $0x10] sm:$0xff]  ;;  %v11567_v18 = vld [vmem:[#allocation17_spill] sm:$0xff] }
 0x233   :  { %1007 = vmatprep.subr.mxu0 %v7564_v14  ;;  %5384 = vmatprep.subr.mxu1 %v11489_v44  ;;  %11555 = vst [vmem:[#allocation67_spill] sm:$0xff] %v7597_v15  ;;  %v7603_v14 = vmul.f32 %v6193_v20, %v577_v27  ;;  %v11557_v20 = vld [vmem:[#allocation7_spill] sm:$0xff]  ;;  %v11558_v27 = vld [vmem:[#allocation8_spill] sm:$0xff] }
 0x234   :  { %1008 = vmatpush1.msra.mxu0 %v7571_v26  ;;  %5385 = vmatpush3.msra.mxu1 %v7576_v22  ;;  %v11564_v22 = vld [vmem:[#allocation14_spill] sm:$0xff]  ;;  %v11566_v26 = vld [vmem:[#allocation16_spill] sm:$0xff] }
 0x235   :  { %1009 = vmatprep.subr.mxu0 %v7583_v8  ;;  %5386 = vmatprep.subr.mxu1 %v11489_v44  ;;  %v11562_v8 = vld [vmem:[#allocation12_spill] sm:$0xff] }
 0x236   :  { %1010 = vmatpush1.msra.mxu0 %v7590_v12  ;;  %1043 = vmatprep.mubr.f32.mxu0 %v11489_v44  ;;  %v11560_v12 = vld [vmem:[#allocation10_spill] sm:$0xff] }
 0x237   :  { %5387 = vmatpush3.msra.mxu1 %v7597_v15  ;;  %5388 = vmatprep.mubr.msk.f32.mxu1 %vm6420_vm2, %v11489_v44  ;;  %v11559_v15 = vld [vmem:[#allocation9_spill] sm:$0xff] }
 0x238   :  { %1044 = vmatmul.mubr.f32.vlgmr.msra.gmra.mxu0 %v7603_v14  ;;  %5389 = vmatmul.mubr.f32.vlgmr.msra.gmra.mxu1 %v7603_v14 }
 0x239   :  { %1278 = vmatprep.subr.mxu1 %v11556_v25  ;;  %1342 = vmatprep.mubr.f32.mxu1 %v11489_v44  ;;  %v11561_v25 = vld [vmem:[#allocation11_spill] sm:$0xff] }
 0x23a   :  { %1279 = vmatpush1.msra.mxu1 %v6885_v0  ;;  %5391 = vmatprep.subr.mxu0 %v11489_v44  ;;  %v11563_v0 = vld [vmem:[#allocation13_spill] sm:$0xff] }
 0x23b   :  { %1280 = vmatprep.subr.mxu1 %v6893_v30  ;;  %5423 = vmatprep.mubr.msk.f32.mxu0 %vm6420_vm2, %v11489_v44  ;;  %v11565_v30 = vld [vmem:[#allocation15_spill] sm:$0xff] }
 0x23c   :  { %1281 = vmatpush1.msra.mxu1 %v11557_v20  ;;  %v11568_v20 = vld [vmem:[#allocation18_spill] sm:$0xff] }
 0x23d   :  { %1282 = vmatprep.subr.mxu1 %v11558_v27  ;;  %v11569_v27 = vld [vmem:[#allocation19_spill] sm:$0xff] }
 0x23e   :  { %1283 = vmatpush1.msra.mxu1 %v11559_v15  ;;  %v11570_v15 = vld [vmem:[#allocation20_spill] sm:$0xff] }
 0x23f   :  { %1284 = vmatprep.subr.mxu1 %v11560_v12  ;;  %v11571_v12 = vld [vmem:[#allocation21_spill] sm:$0xff] }
 0x240   :  { %1285 = vmatpush1.msra.mxu1 %v11561_v25  ;;  %v11573_v25 = vld [vmem:[#allocation24_spill] sm:$0xff] }
 0x241   :  { %1286 = vmatprep.subr.mxu1 %v11562_v8  ;;  %v11572_v8 = vld [vmem:[#allocation22_spill] sm:$0xff] }
 0x242   :  { %1287 = vmatpush1.msra.mxu1 %v11563_v0  ;;  %v11575_v0 = vld [vmem:[#allocation27_spill] sm:$0xff] }
 0x243   :  { %1288 = vmatprep.subr.mxu1 %v11564_v22  ;;  %v11574_v22 = vld [vmem:[#allocation25_spill] sm:$0xff] }
 0x244   :  { %1289 = vmatpush1.msra.mxu1 %v11565_v30  ;;  %v11578_v30 = vld [vmem:[#allocation31_spill] sm:$0xff] }
 0x245   :  { %1290 = vmatprep.subr.mxu1 %v11566_v26  ;;  %v11576_v26 = vld [vmem:[#allocation28_spill] sm:$0xff] }
 0x246   :  { %1291 = vmatpush1.msra.mxu1 %v11567_v18  ;;  %v11577_v18 = vld [vmem:[#allocation30_spill] sm:$0xff] }
 0x247   :  { %1292 = vmatprep.subr.mxu1 %v11568_v20  ;;  %v11579_v20 = vld [vmem:[#allocation33_spill] sm:$0xff] }
 0x248   :  { %1293 = vmatpush1.msra.mxu1 %v11569_v27  ;;  %v1152_v27 = vld [vmem:[%s11192_s9 + $0x48] sm:$0xff] }
 0x249   :  { %1294 = vmatprep.subr.mxu1 %v11570_v15  ;;  %v1151_v15 = vld [vmem:[%s11192_s9 + $0x40] sm:$0xff] }
 0x24a   :  { %1295 = vmatpush1.msra.mxu1 %v7012_v63  ;;  %v1158_v63 = vld [vmem:[%s11192_s9 + $0x78] sm:$0xff] }
 0x24b   :  { %1296 = vmatprep.subr.mxu1 %v11571_v12  ;;  %5392 = vmatpush3.msra.mxu0 %v1158_v63  ;;  %v1150_v12 = vld [vmem:[%s11192_s9 + $0x38] sm:$0xff] }
 0x24c   :  { %1297 = vmatpush1.msra.mxu1 %v11572_v8  ;;  %5393 = vmatprep.subr.mxu0 %v11489_v44  ;;  %v1149_v8 = vld [vmem:[%s11192_s9 + $0x30] sm:$0xff] }
 0x24d   :  { %1298 = vmatprep.subr.mxu1 %v11573_v25  ;;  %v1148_v25 = vld [vmem:[%s11192_s9 + $0x28] sm:$0xff] }
 0x24e   :  { %1299 = vmatpush1.msra.mxu1 %v11574_v22  ;;  %v1147_v22 = vld [vmem:[%s11192_s9 + $0x20] sm:$0xff] }
 0x24f   :  { %1300 = vmatprep.subr.mxu1 %v11575_v0  ;;  %v1146_v0 = vld [vmem:[%s11192_s9 + $0x18] sm:$0xff] }
 0x250   :  { %1301 = vmatpush1.msra.mxu1 %v11576_v26  ;;  %v1145_v26 = vld [vmem:[%s11192_s9 + $0x10] sm:$0xff] }
 0x251   :  { %1302 = vmatprep.subr.mxu1 %v11577_v18  ;;  %v1144_v18 = vld [vmem:[%s11192_s9 + $0x8] sm:$0xff] }
 0x252   :  { %1303 = vmatpush1.msra.mxu1 %v11578_v30  ;;  %v1143_v30 = vld [vmem:[%s11192_s9] sm:$0xff] }
 0x253   :  { %1304 = vmatprep.subr.mxu1 %v11579_v20 }
 0x254   :  { %1305 = vmatpush1.msra.mxu1 %v7103_v1  ;;  %v1153_v1 = vld [vmem:[%s11192_s9 + $0x50] sm:$0xff] }
 0x255   :  { %1306 = vmatprep.subr.mxu1 %v7115_v60  ;;  %v1157_v60 = vld [vmem:[%s11192_s9 + $0x70] sm:$0xff] }
 0x256   :  { %1307 = vmatpush1.msra.mxu1 %v7122_v3  ;;  %5394 = vmatpush3.msra.mxu0 %v1157_v60  ;;  %v1156_v3 = vld [vmem:[%s11192_s9 + $0x68] sm:$0xff] }
 0x257   :  { %1308 = vmatprep.subr.mxu1 %v7134_v51  ;;  %5395 = vmatprep.subr.mxu0 %v11489_v44  ;;  %v1154_v51 = vld [vmem:[%s11192_s9 + $0x58] sm:$0xff] }
 0x258   :  { %1309 = vmatpush1.msra.mxu1 %v7141_v61  ;;  %5396 = vmatpush3.msra.mxu0 %v1156_v3  ;;  %v1155_v61 = vld [vmem:[%s11192_s9 + $0x60] sm:$0xff] }
 0x259   :  { %1343 = vmatmul.mubr.f32.vlgmr.msra.gmra.mxu1 %v7290_v45  ;;  %5397 = vmatprep.subr.mxu0 %v11489_v44 }
 0x25a   :  { %1553 = vmatprep.mubr.f32.mxu1 %v11489_v44  ;;  %5398 = vmatpush3.msra.mxu0 %v1155_v61 }
 0x25b   :  { %5399 = vmatprep.subr.mxu0 %v11489_v44 }
 0x25c   :  { %5400 = vmatpush3.msra.mxu0 %v1154_v51 }
 0x25d   :  { %5401 = vmatprep.subr.mxu0 %v11489_v44 }
 0x25e   :  { %5402 = vmatpush3.msra.mxu0 %v1153_v1 }
 0x25f   :  { %5403 = vmatprep.subr.mxu0 %v11489_v44 }
 0x260   :  { %5404 = vmatpush3.msra.mxu0 %v1152_v27 }
 0x261   :  { %5405 = vmatprep.subr.mxu0 %v11489_v44 }
 0x262   :  { %5406 = vmatpush3.msra.mxu0 %v1151_v15 }
 0x263   :  { %5407 = vmatprep.subr.mxu0 %v11489_v44 }
 0x264   :  { %5408 = vmatpush3.msra.mxu0 %v1150_v12 }
 0x265   :  { %5409 = vmatprep.subr.mxu0 %v11489_v44 }
 0x266   :  { %5410 = vmatpush3.msra.mxu0 %v1149_v8 }
 0x267   :  { %5411 = vmatprep.subr.mxu0 %v11489_v44 }
 0x268   :  { %5412 = vmatpush3.msra.mxu0 %v1148_v25 }
 0x269   :  { %5413 = vmatprep.subr.mxu0 %v11489_v44 }
 0x26a   :  { %5414 = vmatpush3.msra.mxu0 %v1147_v22 }
 0x26b   :  { %5415 = vmatprep.subr.mxu0 %v11489_v44 }
 0x26c   :  { %5416 = vmatpush3.msra.mxu0 %v1146_v0 }
 0x26d   :  { %5417 = vmatprep.subr.mxu0 %v11489_v44 }
 0x26e   :  { %5418 = vmatpush3.msra.mxu0 %v1145_v26 }
 0x26f   :  { %5419 = vmatprep.subr.mxu0 %v11489_v44 }
 0x270   :  { %5420 = vmatpush3.msra.mxu0 %v1144_v18 }
 0x271   :  { %5421 = vmatprep.subr.mxu0 %v11489_v44 }
 0x272   :  { %5422 = vmatpush3.msra.mxu0 %v1143_v30 }
 0x273   :  { %5426 = vmatprep.subr.mxu0 %v11489_v44 }
 0x2d7   :  { %v927_v20 = vpop.f32.mrf.mxu1  ;;  %v856_v60 = vpop.f32.mrf.mxu0 }
 0x2d8   :  { %v857_v61 = vadd.f32 %v856_v60, %v7278_v49  ;;  %v928_v49 = vadd.f32 %v927_v20, %v7364_v24  ;;  %v7752_v20 = vld [vmem:[%s11186_s2 + $0x118] sm:$0xff] }
 0x2d9   :  { %v5355_v63 = vpop.f32.mrf.mxu1  ;;  %v858_v3 = vpop.f32.mrf.mxu0  ;;  %v7893_v24 = vld [vmem:[%s11185_s5 + $0x118] sm:$0xff] }
 0x2da   :  { %v859_v25 = vadd.f32 %v858_v3, %v7286_v35  ;;  %v7888_v35 = vld [vmem:[%s11185_s5 + $0x108] sm:$0xff]  ;;  %11595 = vst [vmem:[#allocation16_spill] sm:$0xff] %v7893_v24 }
 0x2db   :  { %11594 = vst [vmem:[#allocation15_spill] sm:$0xff] %v7888_v35 }
 0x2f8   :  { %v1045_v51 = vpop.f32.mrf.mxu0  ;;  %v1116_v1 = vpop.f32.mrf.mxu1 }
 0x2f9   :  { %v1120_v27 = vadd.f32 %v1045_v51, %v857_v61  ;;  %v1134_v28 = vadd.f32 %v7348_v58, %v1116_v1  ;;  %v7724_v58 = vld [vmem:[%s11186_s2 + $0x178] sm:$0xff]  ;;  %v7759_v1 = vld [vmem:[%s11186_s2 + $0x100] sm:$0xff] }
 0x2fa   :  { %v5390_v15 = vpop.f32.mrf.mxu1  ;;  %v1047_v8 = vpop.f32.mrf.mxu0 }
 0x2fb   :  { %v4760_v12 = vmul.f32 -1.442695, %v1120_v27  ;;  %v1127_v22 = vadd.f32 %v1047_v8, %v859_v25 }
 0x2fd   :  { %6194 = vpow2.f32 %v4760_v12  ;;  %v4761_v0 = vmul.f32 -1.442695, %v1127_v22 }
 0x2ff   :  { %6196 = vpow2.f32 %v4761_v0  ;;  %v7766_v0 = vld [vmem:[%s11186_s2 + $0xe8] sm:$0xff] }
 0x30a   :  { %v6195_v26 = vpop.eup %6194 }
 0x30b   :  { %v1124_v18 = vadd.f32 1.0, %v6195_v26  ;;  %v7773_v26 = vld [vmem:[%s11186_s2 + $0xd0] sm:$0xff] }
 0x30c   :  { %v6197_v30 = vpop.eup %6196 }
 0x30d   :  { %6198 = vrcp.f32 %v1124_v18  ;;  %v1131_v63 = vadd.f32 1.0, %v6197_v30  ;;  %v7780_v18 = vld [vmem:[%s11186_s2 + $0xb8] sm:$0xff]  ;;  %v11580_v30 = vld [vmem:[#allocation23_spill] sm:$0xff] }
 0x30f   :  { %6200 = vrcp.f32 %v1131_v63  ;;  %v11581_v63 = vld [vmem:[#allocation26_spill] sm:$0xff] }
 0x31a   :  { %v6199_v60 = vpop.eup %6198 }
 0x31b   :  { %v1135_v61 = vmul.f32 %v6199_v60, %v1134_v28  ;;  %v7729_v28 = vld [vmem:[%s11186_s2 + $0x160] sm:$0xff]  ;;  %v11582_v60 = vld [vmem:[#allocation29_spill] sm:$0xff] }
 0x31c   :  { %v6201_v27 = vpop.eup %6200 }
 0x31d   :  { %v1136_v51 = vadd.f32 %v1135_v61, %v928_v49  ;;  %v1138_v3 = vsub.f32 1.0, %v6201_v27  ;;  %v1140_v8 = vmul.f32 %v6201_v27, %v7603_v14  ;;  %v7745_v49 = vld [vmem:[%s11186_s2 + $0x130] sm:$0xff] }
 0x31e   :  { %v11583_v61 = vld [vmem:[#allocation32_spill] sm:$0xff] }
 0x31f   :  { %6202 = vtanh.f32 %v1136_v51  ;;  %v11584_v51 = vld [vmem:[#allocation34_spill] sm:$0xff]  ;;  %v7806_v27 = vld [vmem:[%s11185_s5 + $0x170] sm:$0xff] }
 0x320   :  { %1489 = vmatprep.subr.mxu1 %v7806_v27 }
 0x32c   :  { %v6203_v15 = vpop.eup %6202 }
 0x32d   :  { %v1139_v12 = vmul.f32 %v6203_v15, %v1138_v3  ;;  %v7823_v3 = vld [vmem:[%s11185_s5 + $0x158] sm:$0xff]  ;;  %v7828_v15 = vld [vmem:[%s11185_s5 + $0x150] sm:$0xff] }
 0x32e   :  { %11585 = vst [vmem:[#allocation2_spill] sm:$0xff] %v7828_v15 }
 0x32f   :  { %v7717_v25 = vadd.f32 %v1140_v8, %v1139_v12  ;;  %v7833_v12 = vld [vmem:[%s11185_s5 + $0x160] sm:$0xff] }
 0x330   :  { %11586 = vst [vmem:[#allocation7_spill] sm:$0xff] %v7833_v12  ;;  %v7840_v8 = vld [vmem:[%s11185_s5 + $0x140] sm:$0xff] }
 0x331   :  { %v1142_v22 = vmax.f32 %v7603_v14, %v7717_v25  ;;  %v7738_v14 = vld [vmem:[%s11186_s2 + $0x148] sm:$0xff]  ;;  %11587 = vst [vmem:[#allocation8_spill] sm:$0xff] %v7840_v8 }
 0x333   :  { %5424 = vmatmul.mubr.f32.vlgmr.msra.gmra.mxu0 %v1142_v22  ;;  %v7845_v22 = vld [vmem:[%s11185_s5 + $0x148] sm:$0xff] }
 0x334   :  { %5427 = vmatpush3.msra.mxu0 %v7724_v58  ;;  %5458 = vmatprep.mubr.msk.f32.mxu0 %vm6420_vm2, %v11489_v44  ;;  %11588 = vst [vmem:[#allocation9_spill] sm:$0xff] %v7845_v22 }
 0x335   :  { %5428 = vmatprep.subr.mxu0 %v11489_v44 }
 0x336   :  { %5429 = vmatpush3.msra.mxu0 %v7729_v28 }
 0x337   :  { %5430 = vmatprep.subr.mxu0 %v11489_v44 }
 0x338   :  { %5431 = vmatpush3.msra.mxu0 %v7738_v14 }
 0x339   :  { %5432 = vmatprep.subr.mxu0 %v11489_v44 }
 0x33a   :  { %5433 = vmatpush3.msra.mxu0 %v7745_v49 }
 0x33b   :  { %5434 = vmatprep.subr.mxu0 %v11489_v44 }
 0x33c   :  { %5435 = vmatpush3.msra.mxu0 %v7752_v20 }
 0x33d   :  { %5436 = vmatprep.subr.mxu0 %v11489_v44 }
 0x33e   :  { %5437 = vmatpush3.msra.mxu0 %v7759_v1 }
 0x33f   :  { %5438 = vmatprep.subr.mxu0 %v11489_v44 }
 0x340   :  { %5439 = vmatpush3.msra.mxu0 %v7766_v0 }
 0x341   :  { %5440 = vmatprep.subr.mxu0 %v11489_v44 }
 0x342   :  { %5441 = vmatpush3.msra.mxu0 %v7773_v26 }
 0x343   :  { %5442 = vmatprep.subr.mxu0 %v11489_v44 }
 0x344   :  { %5443 = vmatpush3.msra.mxu0 %v7780_v18 }
 0x345   :  { %5444 = vmatprep.subr.mxu0 %v11489_v44 }
 0x346   :  { %5445 = vmatpush3.msra.mxu0 %v11580_v30  ;;  %v7852_v30 = vld [vmem:[%s11185_s5 + $0x138] sm:$0xff] }
 0x347   :  { %5446 = vmatprep.subr.mxu0 %v11489_v44  ;;  %11589 = vst [vmem:[#allocation10_spill] sm:$0xff] %v7852_v30 }
 0x348   :  { %5447 = vmatpush3.msra.mxu0 %v11581_v63  ;;  %v7859_v63 = vld [vmem:[%s11185_s5 + $0x128] sm:$0xff] }
 0x349   :  { %5448 = vmatprep.subr.mxu0 %v11489_v44  ;;  %11590 = vst [vmem:[#allocation11_spill] sm:$0xff] %v7859_v63 }
 0x34a   :  { %5449 = vmatpush3.msra.mxu0 %v11582_v60  ;;  %v7864_v60 = vld [vmem:[%s11185_s5 + $0x130] sm:$0xff] }
 0x34b   :  { %5450 = vmatprep.subr.mxu0 %v11489_v44  ;;  %11591 = vst [vmem:[#allocation12_spill] sm:$0xff] %v7864_v60 }
 0x34c   :  { %5451 = vmatpush3.msra.mxu0 %v11583_v61  ;;  %v7871_v61 = vld [vmem:[%s11185_s5 + $0x120] sm:$0xff] }
 0x34d   :  { %5452 = vmatprep.subr.mxu0 %v11489_v44  ;;  %11592 = vst [vmem:[#allocation13_spill] sm:$0xff] %v7871_v61 }
 0x34e   :  { %5453 = vmatpush3.msra.mxu0 %v11584_v51  ;;  %v7882_v51 = vld [vmem:[%s11185_s5 + $0x110] sm:$0xff] }
 0x34f   :  { %5454 = vmatprep.subr.mxu0 %v11489_v44  ;;  %11593 = vst [vmem:[#allocation14_spill] sm:$0xff] %v7882_v51 }
 0x350   :  { %5455 = vmatpush3.msra.mxu0 %v7127_v37  ;;  %v7811_v37 = vld [vmem:[%s11185_s5 + $0x168] sm:$0xff] }
 0x351   :  { %5456 = vmatprep.subr.mxu0 %v11489_v44  ;;  %1490 = vmatpush1.msra.mxu1 %v7811_v37 }
 0x352   :  { %5457 = vmatpush3.msra.mxu0 %v7148_v4  ;;  %v7816_v4 = vld [vmem:[%s11185_s5 + $0x178] sm:$0xff]  ;;  %1491 = vmatprep.subr.mxu1 %v7823_v3 }
 0x353   :  { %5459 = vmatmul.mubr.f32.vlgmr.msra.gmra.mxu0 %v7290_v45  ;;  %5461 = vmatprep.subr.mxu0 %v11489_v44 }
 0x354   :  { %5493 = vmatprep.mubr.msk.f32.mxu0 %vm6420_vm2, %v11489_v44  ;;  %5462 = vmatpush3.msra.mxu0 %v7816_v4 }
 0x355   :  { %5463 = vmatprep.subr.mxu0 %v11489_v44  ;;  %1492 = vmatpush1.msra.mxu1 %v7828_v15 }
 0x356   :  { %5464 = vmatpush3.msra.mxu0 %v7833_v12  ;;  %1493 = vmatprep.subr.mxu1 %v7840_v8 }
 0x357   :  { %5465 = vmatprep.subr.mxu0 %v11489_v44  ;;  %1494 = vmatpush1.msra.mxu1 %v7852_v30 }
 0x358   :  { %5466 = vmatpush3.msra.mxu0 %v7845_v22  ;;  %1495 = vmatprep.subr.mxu1 %v7859_v63  ;;  %v7984_v63 = vld [vmem:[%s11185_s5 + $0xa0] sm:$0xff]  ;;  %v7998_v22 = vld [vmem:[%s11185_s5 + $0x78] sm:$0xff] }
 0x359   :  { %5467 = vmatprep.subr.mxu0 %v11489_v44  ;;  %1496 = vmatpush1.msra.mxu1 %v7871_v61  ;;  %v7967_v61 = vld [vmem:[%s11185_s5 + $0xb8] sm:$0xff]  ;;  %11610 = vst [vmem:[#allocation26_spill] sm:$0xff] %v7984_v63  ;;  %11612 = vst [vmem:[#allocation32_spill] sm:$0xff] %v7998_v22 }
 0x35a   :  { %5468 = vmatpush3.msra.mxu0 %v7864_v60  ;;  %1497 = vmatprep.subr.mxu1 %v7882_v51  ;;  %v7900_v60 = vld [vmem:[%s11185_s5 + $0xf8] sm:$0xff]  ;;  %v7907_v51 = vld [vmem:[%s11185_s5 + $0xf0] sm:$0xff]  ;;  %11607 = vst [vmem:[#allocation31_spill] sm:$0xff] %v7967_v61 }
 0x35b   :  { %5469 = vmatprep.subr.mxu0 %v11489_v44  ;;  %1498 = vmatpush1.msra.mxu1 %v7888_v35  ;;  %11596 = vst [vmem:[#allocation17_spill] sm:$0xff] %v7900_v60  ;;  %11597 = vst [vmem:[#allocation18_spill] sm:$0xff] %v7907_v51  ;;  %v7912_v35 = vld [vmem:[%s11185_s5 + $0x100] sm:$0xff] }
 0x35c   :  { %5470 = vmatpush3.msra.mxu0 %v7893_v24  ;;  %1499 = vmatprep.subr.mxu1 %v7900_v60  ;;  %11598 = vst [vmem:[#allocation19_spill] sm:$0xff] %v7912_v35  ;;  %v7919_v60 = vld [vmem:[%s11185_s5 + $0xe0] sm:$0xff]  ;;  %v7926_v24 = vld [vmem:[%s11185_s5 + $0xd8] sm:$0xff] }
 0x35d   :  { %5471 = vmatprep.subr.mxu0 %v11489_v44  ;;  %1500 = vmatpush1.msra.mxu1 %v7907_v51  ;;  %11599 = vst [vmem:[#allocation20_spill] sm:$0xff] %v7919_v60  ;;  %11600 = vst [vmem:[#allocation21_spill] sm:$0xff] %v7926_v24  ;;  %v7931_v51 = vld [vmem:[%s11185_s5 + $0xe8] sm:$0xff] }
 0x35e   :  { %5472 = vmatpush3.msra.mxu0 %v7912_v35  ;;  %1501 = vmatprep.subr.mxu1 %v7919_v60  ;;  %11601 = vst [vmem:[#allocation22_spill] sm:$0xff] %v7931_v51  ;;  %v7938_v60 = vld [vmem:[%s11185_s5 + $0xc8] sm:$0xff]  ;;  %v7945_v35 = vld [vmem:[%s11185_s5 + $0xc0] sm:$0xff] }
 0x35f   :  { %5473 = vmatprep.subr.mxu0 %v11489_v44  ;;  %1502 = vmatpush1.msra.mxu1 %v7926_v24  ;;  %11602 = vst [vmem:[#allocation24_spill] sm:$0xff] %v7938_v60  ;;  %11603 = vst [vmem:[#allocation25_spill] sm:$0xff] %v7945_v35  ;;  %v7950_v24 = vld [vmem:[%s11185_s5 + $0xd0] sm:$0xff] }
 0x360   :  { %5474 = vmatpush3.msra.mxu0 %v7931_v51  ;;  %1503 = vmatprep.subr.mxu1 %v7938_v60  ;;  %11604 = vst [vmem:[#allocation27_spill] sm:$0xff] %v7950_v24  ;;  %v7957_v60 = vld [vmem:[%s11185_s5 + $0xb0] sm:$0xff]  ;;  %v7962_v51 = vld [vmem:[%s11185_s5 + $0xa8] sm:$0xff] }
 0x361   :  { %5475 = vmatprep.subr.mxu0 %v11489_v44  ;;  %1504 = vmatpush1.msra.mxu1 %v7945_v35  ;;  %11605 = vst [vmem:[#allocation28_spill] sm:$0xff] %v7957_v60  ;;  %11606 = vst [vmem:[#allocation30_spill] sm:$0xff] %v7962_v51  ;;  %v7979_v35 = vld [vmem:[%s11185_s5 + $0x90] sm:$0xff] }
 0x362   :  { %5476 = vmatpush3.msra.mxu0 %v7950_v24  ;;  %1505 = vmatprep.subr.mxu1 %v7957_v60  ;;  %v7974_v24 = vld [vmem:[%s11185_s5 + $0x98] sm:$0xff]  ;;  %11609 = vst [vmem:[#allocation23_spill] sm:$0xff] %v7979_v35  ;;  %v7991_v60 = vld [vmem:[%s11185_s5 + $0x80] sm:$0xff] }
 0x363   :  { %5477 = vmatprep.subr.mxu0 %v11489_v44  ;;  %11608 = vst [vmem:[#allocation33_spill] sm:$0xff] %v7974_v24  ;;  %1506 = vmatpush1.msra.mxu1 %v7962_v51  ;;  %11611 = vst [vmem:[#allocation29_spill] sm:$0xff] %v7991_v60  ;;  %v8003_v51 = vld [vmem:[%s11185_s5 + $0x88] sm:$0xff] }
 0x364   :  { %5478 = vmatpush3.msra.mxu0 %v7967_v61  ;;  %1507 = vmatprep.subr.mxu1 %v7974_v24  ;;  %11613 = vst [vmem:[#allocation34_spill] sm:$0xff] %v8003_v51  ;;  %v8010_v24 = vld [vmem:[%s11185_s5 + $0x68] sm:$0xff]  ;;  %v8017_v61 = vld [vmem:[%s11185_s5 + $0x60] sm:$0xff] }
 0x365   :  { %5479 = vmatprep.subr.mxu0 %v11489_v44  ;;  %1508 = vmatpush1.msra.mxu1 %v7979_v35  ;;  %11614 = vst [vmem:[#allocation68_spill] sm:$0xff] %v8010_v24  ;;  %11615 = vst [vmem:[#allocation69_spill] sm:$0xff] %v8017_v61  ;;  %v8022_v35 = vld [vmem:[%s11185_s5 + $0x70] sm:$0xff] }
 0x366   :  { %5480 = vmatpush3.msra.mxu0 %v7984_v63  ;;  %1509 = vmatprep.subr.mxu1 %v7991_v60  ;;  %11616 = vst [vmem:[#allocation70_spill] sm:$0xff] %v8022_v35  ;;  %v8029_v60 = vld [vmem:[%s11185_s5 + $0x50] sm:$0xff]  ;;  %v8036_v63 = vld [vmem:[%s11185_s5 + $0x48] sm:$0xff] }
 0x367   :  { %5481 = vmatprep.subr.mxu0 %v11489_v44  ;;  %1510 = vmatpush1.msra.mxu1 %v7998_v22  ;;  %11617 = vst [vmem:[#allocation71_spill] sm:$0xff] %v8029_v60  ;;  %11618 = vst [vmem:[#allocation72_spill] sm:$0xff] %v8036_v63  ;;  %v8041_v22 = vld [vmem:[%s11185_s5 + $0x58] sm:$0xff] }
 0x368   :  { %5482 = vmatpush3.msra.mxu0 %v8003_v51  ;;  %1511 = vmatprep.subr.mxu1 %v8010_v24  ;;  %11619 = vst [vmem:[#allocation73_spill] sm:$0xff] %v8041_v22  ;;  %v8048_v24 = vld [vmem:[%s11185_s5 + $0x38] sm:$0xff]  ;;  %v8055_v51 = vld [vmem:[%s11185_s5 + $0x30] sm:$0xff] }
 0x369   :  { %5483 = vmatprep.subr.mxu0 %v11489_v44  ;;  %1512 = vmatpush1.msra.mxu1 %v8017_v61  ;;  %11620 = vst [vmem:[#allocation74_spill] sm:$0xff] %v8048_v24  ;;  %11621 = vst [vmem:[#allocation75_spill] sm:$0xff] %v8055_v51  ;;  %v8060_v61 = vld [vmem:[%s11185_s5 + $0x40] sm:$0xff] }
 0x36a   :  { %5484 = vmatpush3.msra.mxu0 %v8022_v35  ;;  %1513 = vmatprep.subr.mxu1 %v8029_v60  ;;  %11622 = vst [vmem:[#allocation76_spill] sm:$0xff] %v8060_v61  ;;  %v8067_v60 = vld [vmem:[%s11185_s5 + $0x20] sm:$0xff]  ;;  %v8074_v35 = vld [vmem:[%s11185_s5 + $0x18] sm:$0xff] }
 0x36b   :  { %5485 = vmatprep.subr.mxu0 %v11489_v44  ;;  %1514 = vmatpush1.msra.mxu1 %v8036_v63  ;;  %11623 = vst [vmem:[#allocation77_spill] sm:$0xff] %v8067_v60  ;;  %11624 = vst [vmem:[#allocation78_spill] sm:$0xff] %v8074_v35  ;;  %v8079_v63 = vld [vmem:[%s11185_s5 + $0x28] sm:$0xff] }
 0x36c   :  { %5486 = vmatpush3.msra.mxu0 %v8041_v22  ;;  %1515 = vmatprep.subr.mxu1 %v8048_v24  ;;  %11625 = vst [vmem:[#allocation79_spill] sm:$0xff] %v8079_v63  ;;  %v8086_v24 = vld [vmem:[%s11185_s5 + $0x8] sm:$0xff]  ;;  %v8093_v22 = vld [vmem:[%s11185_s5] sm:$0xff] }
 0x36d   :  { %5487 = vmatprep.subr.mxu0 %v11489_v44  ;;  %1516 = vmatpush1.msra.mxu1 %v8055_v51  ;;  %11626 = vst [vmem:[#allocation80_spill] sm:$0xff] %v8086_v24  ;;  %11627 = vst [vmem:[#allocation81_spill] sm:$0xff] %v8093_v22  ;;  %v8098_v51 = vld [vmem:[%s11185_s5 + $0x10] sm:$0xff] }
 0x36e   :  { %5488 = vmatpush3.msra.mxu0 %v8060_v61  ;;  %1517 = vmatprep.subr.mxu1 %v8067_v60  ;;  %11628 = vst [vmem:[#allocation82_spill] sm:$0xff] %v8098_v51  ;;  %v1344_v60 = vpop.f32.mrf.mxu1  ;;  %v217_v61 = vadd.f32 %v7237_v11, %v6857_v2 }
 0x36f   :  { %5489 = vmatprep.subr.mxu0 %v11489_v44  ;;  %1518 = vmatpush1.msra.mxu1 %v8074_v35 }
 0x370   :  { %5490 = vmatpush3.msra.mxu0 %v8079_v63  ;;  %1519 = vmatprep.subr.mxu1 %v8086_v24  ;;  %v1419_v30 = vadd.f32 %v1344_v60, %v217_v61  ;;  %v4734_v24 = vld [vmem:[%s11193_s10] ss:$0 sm:$0xff] }
 0x371   :  { %5491 = vmatprep.subr.mxu0 %v11489_v44  ;;  %1520 = vmatpush1.msra.mxu1 %v8093_v22 }
 0x372   :  { %5492 = vmatpush3.msra.mxu0 %v8098_v51  ;;  %1678 = vmatprep.subr.mxu1 %v7230_v6  ;;  %v4762_v35 = vmul.f32 -1.442695, %v1419_v30  ;;  %v1346_v6 = vpop.f32.mrf.mxu1  ;;  %v219_v51 = vadd.f32 %v7241_v13, %v6863_v23  ;;  %v328_v13 = vadd.f32 %v7235_v10, %v6871_v5  ;;  %v11630_v10 = vld [vmem:[#allocation52_spill] sm:$0xff] }
 0x373   :  { %5496 = vmatprep.subr.mxu0 %v11489_v44 }
 0x374   :  { %6204 = vpow2.f32 %v4762_v35  ;;  %v1426_v12 = vadd.f32 %v1346_v6, %v219_v51  ;;  %v8121_v35 = vld [vmem:[%s11188_s4] ss:$0 sm:$0xff] }
 0x376   :  { %v4763_v11 = vmul.f32 -1.442695, %v1426_v12 }
 0x378   :  { %6206 = vpow2.f32 %v4763_v11 }
 0x381   :  { %v6205_v60 = vpop.eup %6204 }
 0x382   :  { %v1423_v30 = vadd.f32 1.0, %v6205_v60 }
 0x384   :  { %6208 = vrcp.f32 %v1423_v30 }
 0x385   :  { %v6207_v61 = vpop.eup %6206 }
 0x386   :  { %v1430_v2 = vadd.f32 1.0, %v6207_v61 }
 0x388   :  { %6210 = vrcp.f32 %v1430_v2  ;;  %v11629_v2 = vld [vmem:[#allocation51_spill] sm:$0xff] }
 0x3f3   :  { %v1225_v63 = vpop.f32.mrf.mxu0 }
 0x3f4   :  { %v1226_v8 = vadd.f32 %v4734_v24, %v1225_v63 }
 0x3f5   :  { %v5425_v22 = vpop.f32.mrf.mxu0 }
 0x3f6   :  { %1229 = vst [vmem:[%s11194_s11] sm:$0xff] %v1226_v8  ;;  %v6209_v8 = vpop.eup %6208 }
 0x3f7   :  { %v6211_v51 = vpop.eup %6210 }
 0x3f8   :  { %v1437_v6 = vsub.f32 1.0, %v6211_v51  ;;  %v1439_v30 = vmul.f32 %v6211_v51, %v7290_v45  ;;  %v11631_v45 = vld [vmem:[#allocation53_spill] sm:$0xff]  ;;  %v6357_v51 = vld [vmem:[%s11186_s2 + $0x40] sm:$0xff] }
 0x413   :  { %v1415_v15 = vpop.f32.mrf.mxu0 }
 0x414   :  { %v1433_v24 = vadd.f32 %v8121_v35, %v1415_v15  ;;  %v6350_v15 = vld [vmem:[%s11186_s2 + $0x60] sm:$0xff] }
 0x415   :  { %v5460_v22 = vpop.f32.mrf.mxu0 }
 0x416   :  { %v1434_v12 = vmul.f32 %v6209_v8, %v1433_v24  ;;  %v6351_v24 = vld [vmem:[%s11186_s2 + $0x70] sm:$0xff]  ;;  %v6353_v22 = vld [vmem:[%s11186_s2 + $0x48] sm:$0xff] }
 0x417   :  { %v6352_v8 = vld [vmem:[%s11186_s2 + $0x50] sm:$0xff] }
 0x418   :  { %v1435_v63 = vadd.f32 %v1434_v12, %v328_v13  ;;  %v6354_v13 = vld [vmem:[%s11186_s2 + $0x58] sm:$0xff] }
 0x419   :  { %v6355_v12 = vld [vmem:[%s11186_s2 + $0x38] sm:$0xff] }
 0x41a   :  { %6212 = vtanh.f32 %v1435_v63  ;;  %v6356_v63 = vld [vmem:[%s11186_s2 + $0x30] sm:$0xff] }
 0x427   :  { %v6213_v11 = vpop.eup %6212 }
 0x428   :  { %v1438_v60 = vmul.f32 %v6213_v11, %v1437_v6  ;;  %v6358_v6 = vld [vmem:[%s11186_s2 + $0x20] sm:$0xff]  ;;  %v6359_v11 = vld [vmem:[%s11186_s2 + $0x18] sm:$0xff] }
 0x42a   :  { %v8127_v61 = vadd.f32 %v1439_v30, %v1438_v60  ;;  %v6360_v60 = vld [vmem:[%s11186_s2 + $0x28] sm:$0xff] }
 0x42b   :  { %v6361_v30 = vld [vmem:[%s11186_s2 + $0x8] sm:$0xff] }
 0x42c   :  { %1554 = vmatmul.mubr.f32.vlgmr.msra.gmra.mxu1 %v8127_v61  ;;  %5494 = vmatmul.mubr.f32.vlgmr.msra.gmra.mxu0 %v8127_v61 }
 0x42d   :  { %1679 = vmatpush1.msra.mxu1 %v7295_v48  ;;  %5497 = vmatpush3.msra.mxu0 %v7300_v33  ;;  %v11634_v48 = vld [vmem:[#allocation56_spill] sm:$0xff]  ;;  %v11637_v33 = vld [vmem:[#allocation59_spill] sm:$0xff] }
 0x42e   :  { %1680 = vmatprep.subr.mxu1 %v7305_v50  ;;  %5498 = vmatprep.subr.mxu0 %v11489_v44  ;;  %v11638_v50 = vld [vmem:[#allocation60_spill] sm:$0xff] }
 0x42f   :  { %1681 = vmatpush1.msra.mxu1 %v7312_v62  ;;  %5499 = vmatpush3.msra.mxu0 %v7317_v52  ;;  %v11639_v62 = vld [vmem:[#allocation61_spill] sm:$0xff]  ;;  %v11640_v52 = vld [vmem:[#allocation62_spill] sm:$0xff] }
 0x430   :  { %1682 = vmatprep.subr.mxu1 %v7324_v53  ;;  %5500 = vmatprep.subr.mxu0 %v11489_v44  ;;  %v11641_v53 = vld [vmem:[#allocation63_spill] sm:$0xff] }
 0x431   :  { %1683 = vmatpush1.msra.mxu1 %v7331_v54  ;;  %5501 = vmatpush3.msra.mxu0 %v7336_v55  ;;  %v11642_v54 = vld [vmem:[#allocation64_spill] sm:$0xff]  ;;  %v11643_v55 = vld [vmem:[#allocation65_spill] sm:$0xff] }
 0x432   :  { %1684 = vmatprep.subr.mxu1 %v7343_v56  ;;  %5502 = vmatprep.subr.mxu0 %v11489_v44  ;;  %v11644_v56 = vld [vmem:[#allocation66_spill] sm:$0xff] }
 0x433   :  { %1685 = vmatpush1.msra.mxu1 %v7355_v59  ;;  %5503 = vmatpush3.msra.mxu0 %v7360_v7  ;;  %v11645_v59 = vld [vmem:[#allocation67_spill] sm:$0xff]  ;;  %v6325_v7 = vld [vmem:[%s11186_s2 + $0x170] sm:$0xff] }
 0x434   :  { %1686 = vmatprep.subr.mxu1 %v7371_v34  ;;  %5504 = vmatprep.subr.mxu0 %v11489_v44  ;;  %v6326_v34 = vld [vmem:[%s11186_s2 + $0x168] sm:$0xff] }
 0x435   :  { %1687 = vmatpush1.msra.mxu1 %v7378_v47  ;;  %5505 = vmatpush3.msra.mxu0 %v7383_v46  ;;  %v6327_v47 = vld [vmem:[%s11186_s2 + $0x158] sm:$0xff]  ;;  %v6328_v46 = vld [vmem:[%s11186_s2 + $0x150] sm:$0xff] }
 0x436   :  { %1688 = vmatprep.subr.mxu1 %v7391_v39  ;;  %5506 = vmatprep.subr.mxu0 %v11489_v44  ;;  %v6329_v39 = vld [vmem:[%s11186_s2 + $0x140] sm:$0xff] }
 0x437   :  { %1689 = vmatpush1.msra.mxu1 %v7398_v40  ;;  %5507 = vmatpush3.msra.mxu0 %v7403_v41  ;;  %v6330_v40 = vld [vmem:[%s11186_s2 + $0x138] sm:$0xff]  ;;  %v6331_v41 = vld [vmem:[%s11186_s2 + $0x128] sm:$0xff] }
 0x438   :  { %1690 = vmatprep.subr.mxu1 %v7412_v42  ;;  %5508 = vmatprep.subr.mxu0 %v11489_v44  ;;  %v6332_v42 = vld [vmem:[%s11186_s2 + $0x120] sm:$0xff] }
 0x439   :  { %1691 = vmatpush1.msra.mxu1 %v7419_v43  ;;  %5509 = vmatpush3.msra.mxu0 %v7424_v21  ;;  %v6333_v43 = vld [vmem:[%s11186_s2 + $0x110] sm:$0xff]  ;;  %v6334_v21 = vld [vmem:[%s11186_s2 + $0x108] sm:$0xff] }
 0x43a   :  { %1692 = vmatprep.subr.mxu1 %v7431_v9  ;;  %5510 = vmatprep.subr.mxu0 %v11489_v44  ;;  %v6335_v9 = vld [vmem:[%s11186_s2 + $0xf8] sm:$0xff] }
 0x43b   :  { %1693 = vmatpush1.msra.mxu1 %v7438_v32  ;;  %5511 = vmatpush3.msra.mxu0 %v7443_v38  ;;  %v6336_v32 = vld [vmem:[%s11186_s2 + $0xf0] sm:$0xff]  ;;  %v6337_v38 = vld [vmem:[%s11186_s2 + $0xe0] sm:$0xff] }
 0x43c   :  { %1694 = vmatprep.subr.mxu1 %v7450_v16  ;;  %5512 = vmatprep.subr.mxu0 %v11489_v44  ;;  %v6338_v16 = vld [vmem:[%s11186_s2 + $0xd8] sm:$0xff] }
 0x43d   :  { %1695 = vmatpush1.msra.mxu1 %v7457_v17  ;;  %5513 = vmatpush3.msra.mxu0 %v7462_v36  ;;  %v11632_v17 = vld [vmem:[#allocation54_spill] sm:$0xff]  ;;  %v6339_v36 = vld [vmem:[%s11186_s2 + $0xc8] sm:$0xff] }
 0x43e   :  { %1696 = vmatprep.subr.mxu1 %v7469_v31  ;;  %5514 = vmatprep.subr.mxu0 %v11489_v44  ;;  %v11633_v31 = vld [vmem:[#allocation55_spill] sm:$0xff] }
 0x43f   :  { %1697 = vmatpush1.msra.mxu1 %v7476_v29  ;;  %5515 = vmatpush3.msra.mxu0 %v7481_v57  ;;  %v11635_v29 = vld [vmem:[#allocation57_spill] sm:$0xff]  ;;  %v6340_v57 = vld [vmem:[%s11186_s2 + $0xc0] sm:$0xff] }
 0x440   :  { %1698 = vmatprep.subr.mxu1 %v7488_v19  ;;  %5516 = vmatprep.subr.mxu0 %v11489_v44  ;;  %v11636_v19 = vld [vmem:[#allocation58_spill] sm:$0xff] }
 0x441   :  { %1699 = vmatpush1.msra.mxu1 %v11629_v2  ;;  %5517 = vmatpush3.msra.mxu0 %v11630_v10  ;;  %v6362_v2 = vld [vmem:[%s11186_s2] sm:$0xff]  ;;  %v6363_v10 = vld [vmem:[%s11186_s2 + $0x10] sm:$0xff] }
 0x442   :  { %1700 = vmatprep.subr.mxu1 %v11631_v45  ;;  %5518 = vmatprep.subr.mxu0 %v11489_v44  ;;  %v11646_v45 = vld [vmem:[#allocation2_spill] sm:$0xff] }
 0x443   :  { %1701 = vmatpush1.msra.mxu1 %v11632_v17  ;;  %5519 = vmatpush3.msra.mxu0 %v11633_v31  ;;  %v11647_v17 = vld [vmem:[#allocation7_spill] sm:$0xff]  ;;  %v11648_v31 = vld [vmem:[#allocation8_spill] sm:$0xff] }
 0x444   :  { %1702 = vmatprep.subr.mxu1 %v11634_v48  ;;  %5520 = vmatprep.subr.mxu0 %v11489_v44  ;;  %v11649_v48 = vld [vmem:[#allocation10_spill] sm:$0xff] }
 0x445   :  { %1703 = vmatpush1.msra.mxu1 %v11635_v29  ;;  %5521 = vmatpush3.msra.mxu0 %v11636_v19  ;;  %v11651_v29 = vld [vmem:[#allocation11_spill] sm:$0xff] }
 0x446   :  { %1704 = vmatprep.subr.mxu1 %v11637_v33  ;;  %5522 = vmatprep.subr.mxu0 %v11489_v44  ;;  %v11655_v19 = vld [vmem:[#allocation15_spill] sm:$0xff]  ;;  %v11656_v33 = vld [vmem:[#allocation16_spill] sm:$0xff] }
 0x447   :  { %1705 = vmatpush1.msra.mxu1 %v11638_v50  ;;  %5523 = vmatpush3.msra.mxu0 %v11639_v62  ;;  %v11657_v50 = vld [vmem:[#allocation17_spill] sm:$0xff]  ;;  %v11658_v62 = vld [vmem:[#allocation18_spill] sm:$0xff] }
 0x448   :  { %1706 = vmatprep.subr.mxu1 %v11640_v52  ;;  %5524 = vmatprep.subr.mxu0 %v11489_v44  ;;  %v11659_v52 = vld [vmem:[#allocation19_spill] sm:$0xff] }
 0x449   :  { %1707 = vmatpush1.msra.mxu1 %v11641_v53  ;;  %5525 = vmatpush3.msra.mxu0 %v11642_v54  ;;  %v11660_v53 = vld [vmem:[#allocation20_spill] sm:$0xff]  ;;  %v11661_v54 = vld [vmem:[#allocation21_spill] sm:$0xff] }
 0x44a   :  { %1708 = vmatprep.subr.mxu1 %v11643_v55  ;;  %5526 = vmatprep.subr.mxu0 %v11489_v44  ;;  %v11662_v55 = vld [vmem:[#allocation22_spill] sm:$0xff] }
 0x44b   :  { %1709 = vmatpush1.msra.mxu1 %v11644_v56  ;;  %1742 = vmatprep.mubr.f32.mxu1 %v11489_v44  ;;  %v11663_v56 = vld [vmem:[#allocation24_spill] sm:$0xff] }
 0x44c   :  { %5527 = vmatpush3.msra.mxu0 %v11645_v59  ;;  %5528 = vmatprep.mubr.msk.f32.mxu0 %vm6420_vm2, %v11489_v44  ;;  %v11664_v59 = vld [vmem:[#allocation25_spill] sm:$0xff] }
 0x44d   :  { %1743 = vmatmul.mubr.f32.vlgmr.msra.gmra.mxu1 %v7717_v25  ;;  %5529 = vmatmul.mubr.f32.vlgmr.msra.gmra.mxu0 %v7717_v25 }
 0x44e   :  { %1841 = vmatprep.subr.mxu1 %v6325_v7  ;;  %5531 = vmatprep.subr.mxu0 %v11489_v44  ;;  %v11665_v7 = vld [vmem:[#allocation27_spill] sm:$0xff] }
 0x44f   :  { %1842 = vmatpush1.msra.mxu1 %v6326_v34  ;;  %5532 = vmatpush3.msra.mxu0 %v7724_v58  ;;  %v6341_v58 = vld [vmem:[%s11186_s2 + $0xb0] sm:$0xff] }
 0x450   :  { %1843 = vmatprep.subr.mxu1 %v6327_v47  ;;  %5533 = vmatprep.subr.mxu0 %v11489_v44  ;;  %v11666_v34 = vld [vmem:[#allocation28_spill] sm:$0xff]  ;;  %v11667_v47 = vld [vmem:[#allocation30_spill] sm:$0xff] }
 0x451   :  { %1844 = vmatpush1.msra.mxu1 %v6328_v46  ;;  %5534 = vmatpush3.msra.mxu0 %v7729_v28  ;;  %v6342_v28 = vld [vmem:[%s11186_s2 + $0xa8] sm:$0xff] }
 0x452   :  { %1845 = vmatprep.subr.mxu1 %v6329_v39  ;;  %5535 = vmatprep.subr.mxu0 %v11489_v44  ;;  %v11668_v46 = vld [vmem:[#allocation31_spill] sm:$0xff]  ;;  %v11669_v39 = vld [vmem:[#allocation33_spill] sm:$0xff] }
 0x453   :  { %1846 = vmatpush1.msra.mxu1 %v6330_v40  ;;  %5536 = vmatpush3.msra.mxu0 %v7738_v14  ;;  %v6343_v14 = vld [vmem:[%s11186_s2 + $0x98] sm:$0xff]  ;;  %v11670_v40 = vld [vmem:[#allocation23_spill] sm:$0xff] }
 0x454   :  { %1847 = vmatprep.subr.mxu1 %v6331_v41  ;;  %5537 = vmatprep.subr.mxu0 %v11489_v44  ;;  %v11671_v41 = vld [vmem:[#allocation26_spill] sm:$0xff] }
 0x455   :  { %1848 = vmatpush1.msra.mxu1 %v6332_v42  ;;  %5538 = vmatpush3.msra.mxu0 %v7745_v49  ;;  %v6344_v49 = vld [vmem:[%s11186_s2 + $0x90] sm:$0xff]  ;;  %v11672_v42 = vld [vmem:[#allocation29_spill] sm:$0xff] }
 0x456   :  { %1849 = vmatprep.subr.mxu1 %v6333_v43  ;;  %5539 = vmatprep.subr.mxu0 %v11489_v44  ;;  %v11673_v43 = vld [vmem:[#allocation32_spill] sm:$0xff] }
 0x457   :  { %1850 = vmatpush1.msra.mxu1 %v6334_v21  ;;  %5540 = vmatpush3.msra.mxu0 %v7752_v20  ;;  %v6345_v20 = vld [vmem:[%s11186_s2 + $0xa0] sm:$0xff] }
 0x458   :  { %1851 = vmatprep.subr.mxu1 %v6335_v9  ;;  %5541 = vmatprep.subr.mxu0 %v11489_v44  ;;  %v11674_v21 = vld [vmem:[#allocation34_spill] sm:$0xff]  ;;  %v11675_v9 = vld [vmem:[#allocation68_spill] sm:$0xff] }
 0x459   :  { %1852 = vmatpush1.msra.mxu1 %v6336_v32  ;;  %5542 = vmatpush3.msra.mxu0 %v7759_v1  ;;  %v6346_v1 = vld [vmem:[%s11186_s2 + $0x80] sm:$0xff]  ;;  %v11676_v32 = vld [vmem:[#allocation69_spill] sm:$0xff] }
 0x45a   :  { %1853 = vmatprep.subr.mxu1 %v6337_v38  ;;  %5543 = vmatprep.subr.mxu0 %v11489_v44  ;;  %v11677_v38 = vld [vmem:[#allocation70_spill] sm:$0xff] }
 0x45b   :  { %1854 = vmatpush1.msra.mxu1 %v6338_v16  ;;  %5544 = vmatpush3.msra.mxu0 %v7766_v0  ;;  %v6347_v0 = vld [vmem:[%s11186_s2 + $0x78] sm:$0xff]  ;;  %v11678_v16 = vld [vmem:[#allocation71_spill] sm:$0xff] }
 0x45c   :  { %1855 = vmatprep.subr.mxu1 %v6339_v36  ;;  %5545 = vmatprep.subr.mxu0 %v11489_v44  ;;  %v11679_v36 = vld [vmem:[#allocation72_spill] sm:$0xff] }
 0x45d   :  { %1856 = vmatpush1.msra.mxu1 %v6340_v57  ;;  %5546 = vmatpush3.msra.mxu0 %v7773_v26  ;;  %v6348_v26 = vld [vmem:[%s11186_s2 + $0x88] sm:$0xff]  ;;  %v11680_v57 = vld [vmem:[#allocation73_spill] sm:$0xff] }
 0x45e   :  { %1857 = vmatprep.subr.mxu1 %v6341_v58  ;;  %5547 = vmatprep.subr.mxu0 %v11489_v44  ;;  %v11681_v58 = vld [vmem:[#allocation74_spill] sm:$0xff] }
 0x45f   :  { %1858 = vmatpush1.msra.mxu1 %v6342_v28  ;;  %5548 = vmatpush3.msra.mxu0 %v7780_v18  ;;  %v6349_v18 = vld [vmem:[%s11186_s2 + $0x68] sm:$0xff] }
 0x460   :  { %1859 = vmatprep.subr.mxu1 %v6343_v14  ;;  %5549 = vmatprep.subr.mxu0 %v11489_v44  ;;  %v11682_v28 = vld [vmem:[#allocation75_spill] sm:$0xff]  ;;  %v11683_v14 = vld [vmem:[#allocation76_spill] sm:$0xff] }
 0x461   :  { %1860 = vmatpush1.msra.mxu1 %v6344_v49  ;;  %5550 = vmatpush3.msra.mxu0 %v6345_v20  ;;  %v11684_v49 = vld [vmem:[#allocation77_spill] sm:$0xff]  ;;  %v11685_v20 = vld [vmem:[#allocation78_spill] sm:$0xff] }
 0x462   :  { %1861 = vmatprep.subr.mxu1 %v6346_v1  ;;  %5551 = vmatprep.subr.mxu0 %v11489_v44  ;;  %v11686_v1 = vld [vmem:[#allocation79_spill] sm:$0xff] }
 0x463   :  { %1862 = vmatpush1.msra.mxu1 %v6347_v0  ;;  %5552 = vmatpush3.msra.mxu0 %v6348_v26  ;;  %v11687_v0 = vld [vmem:[#allocation80_spill] sm:$0xff]  ;;  %v11688_v26 = vld [vmem:[#allocation81_spill] sm:$0xff] }
 0x464   :  { %1863 = vmatprep.subr.mxu1 %v6349_v18  ;;  %5553 = vmatprep.subr.mxu0 %v11489_v44  ;;  %v11689_v18 = vld [vmem:[#allocation82_spill] sm:$0xff] }
 0x465   :  { %1864 = vmatpush1.msra.mxu1 %v6350_v15  ;;  %5554 = vmatpush3.msra.mxu0 %v6351_v24  ;;  %v6364_v15 = vld [vmem:[%s11189_s6 + $0x170] sm:$0xff] }
 0x466   :  { %1865 = vmatprep.subr.mxu1 %v6352_v8  ;;  %5555 = vmatprep.subr.mxu0 %v11489_v44 }
 0x467   :  { %1866 = vmatpush1.msra.mxu1 %v6353_v22  ;;  %5556 = vmatpush3.msra.mxu0 %v6354_v13 }
 0x468   :  { %1867 = vmatprep.subr.mxu1 %v6355_v12  ;;  %5557 = vmatprep.subr.mxu0 %v11489_v44  ;;  %v11690_v12 = vld [vmem:[#allocation3_spill] sm:$0xff] }
 0x469   :  { %1868 = vmatpush1.msra.mxu1 %v6356_v63  ;;  %5558 = vmatpush3.msra.mxu0 %v6357_v51 }
 0x46a   :  { %1869 = vmatprep.subr.mxu1 %v6358_v6  ;;  %5559 = vmatprep.subr.mxu0 %v11489_v44 }
 0x46b   :  { %1870 = vmatpush1.msra.mxu1 %v6359_v11  ;;  %5560 = vmatpush3.msra.mxu0 %v6360_v60 }
 0x46c   :  { %1871 = vmatprep.subr.mxu1 %v6361_v30  ;;  %5561 = vmatprep.subr.mxu0 %v11489_v44 }
 0x46d   :  { %1872 = vmatpush1.msra.mxu1 %v6362_v2  ;;  %1905 = vmatprep.mubr.f32.mxu1 %v11489_v44 }
 0x46e   :  { %5562 = vmatpush3.msra.mxu0 %v6363_v10  ;;  %5563 = vmatprep.mubr.msk.f32.mxu0 %vm6420_vm2, %v11489_v44 }
 0x46f   :  { %1906 = vmatmul.mubr.f32.vlgmr.msra.gmra.mxu1 %v8127_v61  ;;  %5564 = vmatmul.mubr.f32.vlgmr.msra.gmra.mxu0 %v8127_v61 }
 0x470   :  { %2004 = vmatprep.subr.mxu1 %v7806_v27  ;;  %5566 = vmatprep.subr.mxu0 %v11489_v44  ;;  %v11650_v27 = vld [vmem:[#allocation9_spill] sm:$0xff] }
 0x471   :  { %2005 = vmatpush1.msra.mxu1 %v7811_v37  ;;  %5567 = vmatpush3.msra.mxu0 %v7816_v4  ;;  %v11652_v37 = vld [vmem:[#allocation13_spill] sm:$0xff]  ;;  %v11653_v4 = vld [vmem:[#allocation12_spill] sm:$0xff] }
 0x472   :  { %2006 = vmatprep.subr.mxu1 %v7823_v3  ;;  %5568 = vmatprep.subr.mxu0 %v11489_v44  ;;  %v11654_v3 = vld [vmem:[#allocation14_spill] sm:$0xff] }
 0x473   :  { %2007 = vmatpush1.msra.mxu1 %v11646_v45  ;;  %5569 = vmatpush3.msra.mxu0 %v11647_v17  ;;  %v11691_v17 = vld [vmem:[#allocation4_spill] sm:$0xff] }
 0x474   :  { %2008 = vmatprep.subr.mxu1 %v11648_v31  ;;  %5570 = vmatprep.subr.mxu0 %v11489_v44  ;;  %v11692_v31 = vld [vmem:[#allocation38_spill] sm:$0xff] }
 0x475   :  { %2009 = vmatpush1.msra.mxu1 %v11649_v48  ;;  %5571 = vmatpush3.msra.mxu0 %v11650_v27  ;;  %v223_v48 = vadd.f32 %v11692_v31, %v11691_v17  ;;  %v8422_v27 = vld [vmem:[%s11191_s8] ss:$0 sm:$0xff] }
 0x476   :  { %2010 = vmatprep.subr.mxu1 %v11651_v29  ;;  %5572 = vmatprep.subr.mxu0 %v11489_v44  ;;  %v6383_v31 = vld [vmem:[%s11189_s6 + $0xe0] sm:$0xff] }
 0x477   :  { %2011 = vmatpush1.msra.mxu1 %v11652_v37  ;;  %5573 = vmatpush3.msra.mxu0 %v11653_v4 }
 0x478   :  { %2012 = vmatprep.subr.mxu1 %v11654_v3  ;;  %5574 = vmatprep.subr.mxu0 %v11489_v44 }
 0x479   :  { %2013 = vmatpush1.msra.mxu1 %v11655_v19  ;;  %5575 = vmatpush3.msra.mxu0 %v11656_v33  ;;  %v11693_v19 = vld [vmem:[#allocation50_spill] sm:$0xff] }
 0x47a   :  { %2014 = vmatprep.subr.mxu1 %v11657_v50  ;;  %5576 = vmatprep.subr.mxu0 %v11489_v44 }
 0x47b   :  { %2015 = vmatpush1.msra.mxu1 %v11658_v62  ;;  %5577 = vmatpush3.msra.mxu0 %v11659_v52 }
 0x47c   :  { %2016 = vmatprep.subr.mxu1 %v11660_v53  ;;  %5578 = vmatprep.subr.mxu0 %v11489_v44 }
 0x47d   :  { %2017 = vmatpush1.msra.mxu1 %v11661_v54  ;;  %5579 = vmatpush3.msra.mxu0 %v11662_v55 }
 0x47e   :  { %2018 = vmatprep.subr.mxu1 %v11663_v56  ;;  %5580 = vmatprep.subr.mxu0 %v11489_v44  ;;  %v11694_v56 = vld [vmem:[#allocation40_spill] sm:$0xff] }
 0x47f   :  { %2019 = vmatpush1.msra.mxu1 %v11664_v59  ;;  %5581 = vmatpush3.msra.mxu0 %v11665_v7  ;;  %v225_v59 = vadd.f32 %v11694_v56, %v6863_v23  ;;  %v6396_v56 = vld [vmem:[%s11189_s6 + $0x78] sm:$0xff] }
 0x480   :  { %2020 = vmatprep.subr.mxu1 %v11666_v34  ;;  %5582 = vmatprep.subr.mxu0 %v11489_v44 }
 0x481   :  { %2021 = vmatpush1.msra.mxu1 %v11667_v47  ;;  %5583 = vmatpush3.msra.mxu0 %v11668_v46 }
 0x482   :  { %2022 = vmatprep.subr.mxu1 %v11669_v39  ;;  %5584 = vmatprep.subr.mxu0 %v11489_v44 }
 0x483   :  { %2023 = vmatpush1.msra.mxu1 %v11670_v40  ;;  %5585 = vmatpush3.msra.mxu0 %v11671_v41 }
 0x484   :  { %2024 = vmatprep.subr.mxu1 %v11672_v42  ;;  %5586 = vmatprep.subr.mxu0 %v11489_v44 }
 0x485   :  { %2025 = vmatpush1.msra.mxu1 %v11673_v43  ;;  %5587 = vmatpush3.msra.mxu0 %v11674_v21  ;;  %v11695_v43 = vld [vmem:[#allocation35_spill] sm:$0xff] }
 0x486   :  { %2026 = vmatprep.subr.mxu1 %v11675_v9  ;;  %5588 = vmatprep.subr.mxu0 %v11489_v44  ;;  %v333_v21 = vadd.f32 %v11695_v43, %v6871_v5 }
 0x487   :  { %2027 = vmatpush1.msra.mxu1 %v11676_v32  ;;  %5589 = vmatpush3.msra.mxu0 %v11677_v38  ;;  %v11696_v32 = vld [vmem:[#allocation6_spill] sm:$0xff] }
 0x488   :  { %2028 = vmatprep.subr.mxu1 %v11678_v16  ;;  %5590 = vmatprep.subr.mxu0 %v11489_v44 }
 0x489   :  { %2029 = vmatpush1.msra.mxu1 %v11679_v36  ;;  %5591 = vmatpush3.msra.mxu0 %v11680_v57 }
 0x48a   :  { %2030 = vmatprep.subr.mxu1 %v11681_v58  ;;  %5592 = vmatprep.subr.mxu0 %v11489_v44 }
 0x48b   :  { %2031 = vmatpush1.msra.mxu1 %v11682_v28  ;;  %5593 = vmatpush3.msra.mxu0 %v11683_v14 }
 0x48c   :  { %2032 = vmatprep.subr.mxu1 %v11684_v49  ;;  %5594 = vmatprep.subr.mxu0 %v11489_v44 }
 0x48d   :  { %2033 = vmatpush1.msra.mxu1 %v11685_v20  ;;  %5595 = vmatpush3.msra.mxu0 %v11686_v1  ;;  %v6366_v1 = vld [vmem:[%s11189_s6 + $0x168] sm:$0xff] }
 0x48e   :  { %2034 = vmatprep.subr.mxu1 %v11687_v0  ;;  %5596 = vmatprep.subr.mxu0 %v11489_v44  ;;  %v6367_v0 = vld [vmem:[%s11189_s6 + $0x178] sm:$0xff] }
 0x48f   :  { %2035 = vmatpush1.msra.mxu1 %v11688_v26  ;;  %5597 = vmatpush3.msra.mxu0 %v11689_v18  ;;  %v6369_v18 = vld [vmem:[%s11189_s6 + $0x150] sm:$0xff] }
 0x490   :  { %2068 = vmatprep.mubr.f32.mxu1 %v11489_v44  ;;  %5598 = vmatprep.mubr.msk.f32.mxu0 %vm6420_vm2, %v11489_v44 }
 0x491   :  { %2145 = vmatprep.subr.mxu1 %v6364_v15  ;;  %5601 = vmatprep.subr.mxu0 %v11489_v44  ;;  %v6370_v15 = vld [vmem:[%s11189_s6 + $0x160] sm:$0xff] }
 0x4ec   :  { %v1626_v24 = vpop.f32.mrf.mxu0  ;;  %v1555_v22 = vpop.f32.mrf.mxu1 }
 0x4ed   :  { %v1556_v63 = vadd.f32 %v1555_v22, %v11690_v12  ;;  %v1627_v33 = vadd.f32 %v1626_v24, %v11693_v19  ;;  %v6371_v24 = vld [vmem:[%s11189_s6 + $0x140] sm:$0xff]  ;;  %v6372_v22 = vld [vmem:[%s11189_s6 + $0x138] sm:$0xff] }
 0x4ee   :  { %v5495_v8 = vpop.f32.mrf.mxu0  ;;  %v1557_v13 = vpop.f32.mrf.mxu1 }
 0x4ef   :  { %v1558_v38 = vadd.f32 %v1557_v13, %v11696_v32  ;;  %v6373_v13 = vld [vmem:[%s11189_s6 + $0x148] sm:$0xff] }
 0x50d   :  { %v1744_v51 = vpop.f32.mrf.mxu1  ;;  %v1815_v6 = vpop.f32.mrf.mxu0 }
 0x50e   :  { %v1819_v11 = vadd.f32 %v1744_v51, %v1556_v63  ;;  %v1833_v29 = vadd.f32 %v8422_v27, %v1815_v6  ;;  %v6374_v63 = vld [vmem:[%s11189_s6 + $0x128] sm:$0xff]  ;;  %v6375_v51 = vld [vmem:[%s11189_s6 + $0x120] sm:$0xff]  ;;  %v6376_v6 = vld [vmem:[%s11189_s6 + $0x130] sm:$0xff] }
 0x50f   :  { %v5530_v60 = vpop.f32.mrf.mxu0  ;;  %v1746_v45 = vpop.f32.mrf.mxu1 }
 0x510   :  { %v4764_v30 = vmul.f32 -1.442695, %v1819_v11  ;;  %v1826_v36 = vadd.f32 %v1746_v45, %v1558_v38  ;;  %v6377_v11 = vld [vmem:[%s11189_s6 + $0x110] sm:$0xff]  ;;  %v6378_v60 = vld [vmem:[%s11189_s6 + $0x108] sm:$0xff]  ;;  %v6382_v45 = vld [vmem:[%s11189_s6 + $0x100] sm:$0xff] }
 0x511   :  { %v6406_v38 = vld [vmem:[%s11189_s6 + $0x40] sm:$0xff] }
 0x512   :  { %6214 = vpow2.f32 %v4764_v30  ;;  %v4765_v57 = vmul.f32 -1.442695, %v1826_v36  ;;  %v6379_v30 = vld [vmem:[%s11189_s6 + $0x118] sm:$0xff]  ;;  %v6407_v36 = vld [vmem:[%s11189_s6 + $0x20] sm:$0xff] }
 0x51f   :  { %v6215_v2 = vpop.eup %6214 }
 0x520   :  { %v1823_v10 = vadd.f32 1.0, %v6215_v2  ;;  %v6380_v2 = vld [vmem:[%s11189_s6 + $0xf8] sm:$0xff] }
 0x522   :  { %6216 = vrcp.f32 %v1823_v10  ;;  %v6381_v10 = vld [vmem:[%s11189_s6 + $0xf0] sm:$0xff] }
 0x52f   :  { %v6217_v37 = vpop.eup %6216  ;;  %v1907_v4 = vpop.f32.mrf.mxu1 }
 0x530   :  { %v1978_v3 = vpop.f32.mrf.mxu0  ;;  %v1834_v50 = vmul.f32 %v6217_v37, %v1833_v29  ;;  %v1982_v62 = vadd.f32 %v1907_v4, %v223_v48  ;;  %v6384_v48 = vld [vmem:[%s11189_s6 + $0xd8] sm:$0xff]  ;;  %v6385_v29 = vld [vmem:[%s11189_s6 + $0xe8] sm:$0xff]  ;;  %v6387_v4 = vld [vmem:[%s11189_s6 + $0xc0] sm:$0xff] }
 0x531   :  { %v1909_v55 = vpop.f32.mrf.mxu1  ;;  %v1996_v41 = vadd.f32 %v8121_v35, %v1978_v3  ;;  %v6386_v37 = vld [vmem:[%s11189_s6 + $0xc8] sm:$0xff]  ;;  %v6388_v3 = vld [vmem:[%s11189_s6 + $0xd0] sm:$0xff] }
 0x532   :  { %v5565_v52 = vpop.f32.mrf.mxu0  ;;  %v8426_v53 = vadd.f32 %v1834_v50, %v1627_v33  ;;  %v4766_v54 = vmul.f32 -1.442695, %v1982_v62  ;;  %v1989_v7 = vadd.f32 %v1909_v55, %v225_v59  ;;  %v6389_v33 = vld [vmem:[%s11189_s6 + $0xb0] sm:$0xff]  ;;  %v6390_v50 = vld [vmem:[%s11189_s6 + $0xa8] sm:$0xff]  ;;  %v6391_v62 = vld [vmem:[%s11189_s6 + $0xb8] sm:$0xff] }
 0x533   :  { %v6392_v52 = vld [vmem:[%s11189_s6 + $0x98] sm:$0xff]  ;;  %v6395_v55 = vld [vmem:[%s11189_s6 + $0x80] sm:$0xff]  ;;  %v6397_v59 = vld [vmem:[%s11189_s6 + $0x88] sm:$0xff] }
 0x534   :  { %6218 = vpow2.f32 %v4766_v54  ;;  %v4767_v34 = vmul.f32 -1.442695, %v1989_v7  ;;  %v6394_v54 = vld [vmem:[%s11189_s6 + $0xa0] sm:$0xff] }
 0x536   :  { %6220 = vpow2.f32 %v4767_v34  ;;  %v6398_v34 = vld [vmem:[%s11189_s6 + $0x68] sm:$0xff] }
 0x541   :  { %v6219_v47 = vpop.eup %6218 }
 0x542   :  { %v1986_v46 = vadd.f32 1.0, %v6219_v47  ;;  %v6399_v47 = vld [vmem:[%s11189_s6 + $0x60] sm:$0xff] }
 0x543   :  { %v6221_v39 = vpop.eup %6220 }
 0x544   :  { %6222 = vrcp.f32 %v1986_v46  ;;  %v1993_v40 = vadd.f32 1.0, %v6221_v39  ;;  %v6400_v46 = vld [vmem:[%s11189_s6 + $0x70] sm:$0xff] }
 0x546   :  { %6224 = vrcp.f32 %v1993_v40  ;;  %v6401_v40 = vld [vmem:[%s11189_s6 + $0x50] sm:$0xff] }
 0x551   :  { %v6223_v42 = vpop.eup %6222 }
 0x552   :  { %v1997_v9 = vmul.f32 %v6223_v42, %v1996_v41  ;;  %v6402_v41 = vld [vmem:[%s11189_s6 + $0x48] sm:$0xff]  ;;  %v6403_v42 = vld [vmem:[%s11189_s6 + $0x58] sm:$0xff] }
 0x553   :  { %v6225_v58 = vpop.eup %6224 }
 0x554   :  { %v1998_v16 = vadd.f32 %v1997_v9, %v333_v21  ;;  %v2000_v28 = vsub.f32 1.0, %v6225_v58  ;;  %v2002_v20 = vmul.f32 %v6225_v58, %v8127_v61  ;;  %v6368_v61 = vld [vmem:[%s11189_s6 + $0x158] sm:$0xff]  ;;  %v6405_v9 = vld [vmem:[%s11189_s6 + $0x30] sm:$0xff]  ;;  %v6409_v58 = vld [vmem:[%s11189_s6 + $0x28] sm:$0xff] }
 0x555   :  { %v6404_v21 = vld [vmem:[%s11189_s6 + $0x38] sm:$0xff] }
 0x556   :  { %6226 = vtanh.f32 %v1998_v16 }
 0x557   :  { %6228 = vpow2.f32 %v4765_v57  ;;  %v6408_v57 = vld [vmem:[%s11189_s6 + $0x18] sm:$0xff] }
 0x563   :  { %v6227_v14 = vpop.eup %6226 }
 0x564   :  { %v2001_v49 = vmul.f32 %v6227_v14, %v2000_v28  ;;  %v6229_v26 = vpop.eup %6228  ;;  %v6410_v14 = vld [vmem:[%s11189_s6 + $0x8] sm:$0xff] }
 0x565   :  { %v1830_v8 = vadd.f32 1.0, %v6229_v26  ;;  %v8617_v26 = vld [vmem:[%s11186_s2 + $0x158] sm:$0xff] }
 0x566   :  { %v8435_v35 = vadd.f32 %v2002_v20, %v2001_v49  ;;  %v6411_v49 = vld [vmem:[%s11189_s6] sm:$0xff] }
 0x567   :  { %6230 = vrcp.f32 %v1830_v8  ;;  %v8651_v8 = vld [vmem:[%s11186_s2 + $0x120] sm:$0xff] }
 0x568   :  { %2069 = vmatmul.mubr.f32.vlgmr.msra.gmra.mxu1 %v8435_v35  ;;  %5599 = vmatmul.mubr.f32.vlgmr.msra.gmra.mxu0 %v8435_v35  ;;  %6232 = vtanh.f32 %v8426_v53  ;;  %v6393_v53 = vld [vmem:[%s11189_s6 + $0x90] sm:$0xff] }
 0x569   :  { %2146 = vmatpush1.msra.mxu1 %v6366_v1  ;;  %5602 = vmatpush3.msra.mxu0 %v6367_v0  ;;  %v6412_v1 = vld [vmem:[%s11189_s6 + $0x10] sm:$0xff]  ;;  %v8610_v0 = vld [vmem:[%s11186_s2 + $0x168] sm:$0xff] }
 0x56a   :  { %2147 = vmatprep.subr.mxu1 %v6368_v61  ;;  %5603 = vmatprep.subr.mxu0 %v11489_v44  ;;  %v8623_v61 = vld [vmem:[%s11186_s2 + $0x150] sm:$0xff] }
 0x56b   :  { %2148 = vmatpush1.msra.mxu1 %v6369_v18  ;;  %5604 = vmatpush3.msra.mxu0 %v6370_v15  ;;  %v8630_v18 = vld [vmem:[%s11186_s2 + $0x140] sm:$0xff]  ;;  %v8637_v15 = vld [vmem:[%s11186_s2 + $0x138] sm:$0xff] }
 0x56c   :  { %2149 = vmatprep.subr.mxu1 %v6371_v24  ;;  %5605 = vmatprep.subr.mxu0 %v11489_v44  ;;  %v8645_v24 = vld [vmem:[%s11186_s2 + $0x128] sm:$0xff] }
 0x56d   :  { %2150 = vmatpush1.msra.mxu1 %v6372_v22  ;;  %5606 = vmatpush3.msra.mxu0 %v6373_v13  ;;  %v8657_v22 = vld [vmem:[%s11186_s2 + $0x110] sm:$0xff]  ;;  %v8663_v13 = vld [vmem:[%s11186_s2 + $0x108] sm:$0xff] }
 0x56e   :  { %2151 = vmatprep.subr.mxu1 %v6374_v63  ;;  %5607 = vmatprep.subr.mxu0 %v11489_v44  ;;  %v8669_v63 = vld [vmem:[%s11186_s2 + $0xf8] sm:$0xff] }
 0x56f   :  { %2152 = vmatpush1.msra.mxu1 %v6375_v51  ;;  %5608 = vmatpush3.msra.mxu0 %v6376_v6  ;;  %v8675_v51 = vld [vmem:[%s11186_s2 + $0xf0] sm:$0xff]  ;;  %v8681_v6 = vld [vmem:[%s11186_s2 + $0xe0] sm:$0xff] }
 0x570   :  { %2153 = vmatprep.subr.mxu1 %v6377_v11  ;;  %5609 = vmatprep.subr.mxu0 %v11489_v44  ;;  %v8687_v11 = vld [vmem:[%s11186_s2 + $0xd8] sm:$0xff] }
 0x571   :  { %2154 = vmatpush1.msra.mxu1 %v6378_v60  ;;  %5610 = vmatpush3.msra.mxu0 %v6379_v30  ;;  %v8693_v60 = vld [vmem:[%s11186_s2 + $0xc8] sm:$0xff]  ;;  %v8699_v30 = vld [vmem:[%s11186_s2 + $0xc0] sm:$0xff] }
 0x572   :  { %2155 = vmatprep.subr.mxu1 %v6380_v2  ;;  %5611 = vmatprep.subr.mxu0 %v11489_v44  ;;  %v8705_v2 = vld [vmem:[%s11186_s2 + $0xb0] sm:$0xff] }
 0x573   :  { %2156 = vmatpush1.msra.mxu1 %v6381_v10  ;;  %5612 = vmatpush3.msra.mxu0 %v6382_v45  ;;  %v8711_v10 = vld [vmem:[%s11186_s2 + $0xa8] sm:$0xff]  ;;  %v8717_v45 = vld [vmem:[%s11186_s2 + $0x98] sm:$0xff] }
 0x574   :  { %2157 = vmatprep.subr.mxu1 %v6383_v31  ;;  %5613 = vmatprep.subr.mxu0 %v11489_v44  ;;  %v6231_v7 = vpop.eup %6230  ;;  %v8723_v31 = vld [vmem:[%s11186_s2 + $0x90] sm:$0xff] }
 0x575   :  { %2158 = vmatpush1.msra.mxu1 %v6384_v48  ;;  %5614 = vmatpush3.msra.mxu0 %v6385_v29  ;;  %v6233_v39 = vpop.eup %6232  ;;  %v1837_v43 = vsub.f32 1.0, %v6231_v7  ;;  %v1839_v28 = vmul.f32 %v6231_v7, %v7717_v25  ;;  %v8600_v25 = vld [vmem:[%s11186_s2 + $0x170] sm:$0xff]  ;;  %v8729_v48 = vld [vmem:[%s11186_s2 + $0x80] sm:$0xff]  ;;  %v8735_v29 = vld [vmem:[%s11186_s2 + $0x78] sm:$0xff] }
 0x576   :  { %2159 = vmatprep.subr.mxu1 %v6386_v37  ;;  %5615 = vmatprep.subr.mxu0 %v11489_v44  ;;  %v8741_v37 = vld [vmem:[%s11186_s2 + $0x68] sm:$0xff] }
 0x577   :  { %2160 = vmatpush1.msra.mxu1 %v6387_v4  ;;  %5616 = vmatpush3.msra.mxu0 %v6388_v3  ;;  %v1838_v16 = vmul.f32 %v6233_v39, %v1837_v43  ;;  %v8747_v4 = vld [vmem:[%s11186_s2 + $0x60] sm:$0xff]  ;;  %v8753_v3 = vld [vmem:[%s11186_s2 + $0x50] sm:$0xff]  ;;  %v2322_v7 = vld [vmem:[%s11192_s9 + $0x68] sm:$0xff] }
 0x578   :  { %2161 = vmatprep.subr.mxu1 %v6389_v33  ;;  %5617 = vmatprep.subr.mxu0 %v11489_v44  ;;  %v8759_v33 = vld [vmem:[%s11186_s2 + $0x48] sm:$0xff] }
 0x579   :  { %2162 = vmatpush1.msra.mxu1 %v6390_v50  ;;  %5618 = vmatpush3.msra.mxu0 %v6391_v62  ;;  %v8595_v20 = vadd.f32 %v1839_v28, %v1838_v16  ;;  %v8765_v50 = vld [vmem:[%s11186_s2 + $0x38] sm:$0xff]  ;;  %v8771_v62 = vld [vmem:[%s11186_s2 + $0x30] sm:$0xff]  ;;  %v2318_v39 = vld [vmem:[%s11192_s9 + $0x48] sm:$0xff] }
 0x57a   :  { %2163 = vmatprep.subr.mxu1 %v6392_v52  ;;  %5619 = vmatprep.subr.mxu0 %v11489_v44  ;;  %v8777_v52 = vld [vmem:[%s11186_s2 + $0x20] sm:$0xff]  ;;  %v2314_v43 = vld [vmem:[%s11192_s9 + $0x28] sm:$0xff] }
 0x57b   :  { %2164 = vmatpush1.msra.mxu1 %v6393_v53  ;;  %5620 = vmatpush3.msra.mxu0 %v6394_v54  ;;  %v8783_v53 = vld [vmem:[%s11186_s2 + $0x18] sm:$0xff]  ;;  %v8789_v54 = vld [vmem:[%s11186_s2 + $0x8] sm:$0xff] }
 0x57c   :  { %2165 = vmatprep.subr.mxu1 %v6395_v55  ;;  %5621 = vmatprep.subr.mxu0 %v11489_v44  ;;  %11697 = vst [vmem:[#allocation51_spill] sm:$0xff] %v8789_v54  ;;  %v8795_v55 = vld [vmem:[%s11186_s2] sm:$0xff]  ;;  %v2310_v16 = vld [vmem:[%s11192_s9 + $0x8] sm:$0xff] }
 0x57d   :  { %2166 = vmatpush1.msra.mxu1 %v6396_v56  ;;  %5622 = vmatpush3.msra.mxu0 %v6397_v59  ;;  %11698 = vst [vmem:[#allocation52_spill] sm:$0xff] %v8795_v55  ;;  %v2324_v56 = vld [vmem:[%s11192_s9 + $0x78] sm:$0xff]  ;;  %v2323_v59 = vld [vmem:[%s11192_s9 + $0x70] sm:$0xff] }
 0x57e   :  { %2167 = vmatprep.subr.mxu1 %v6398_v34  ;;  %5623 = vmatprep.subr.mxu0 %v11489_v44  ;;  %v2321_v34 = vld [vmem:[%s11192_s9 + $0x60] sm:$0xff] }
 0x57f   :  { %2168 = vmatpush1.msra.mxu1 %v6399_v47  ;;  %5624 = vmatpush3.msra.mxu0 %v6400_v46  ;;  %v2320_v47 = vld [vmem:[%s11192_s9 + $0x58] sm:$0xff]  ;;  %v2319_v46 = vld [vmem:[%s11192_s9 + $0x50] sm:$0xff] }
 0x580   :  { %2169 = vmatprep.subr.mxu1 %v6401_v40  ;;  %5625 = vmatprep.subr.mxu0 %v11489_v44  ;;  %v2317_v40 = vld [vmem:[%s11192_s9 + $0x40] sm:$0xff] }
 0x581   :  { %2170 = vmatpush1.msra.mxu1 %v6402_v41  ;;  %5626 = vmatpush3.msra.mxu0 %v6403_v42  ;;  %v2316_v41 = vld [vmem:[%s11192_s9 + $0x38] sm:$0xff]  ;;  %v2315_v42 = vld [vmem:[%s11192_s9 + $0x30] sm:$0xff] }
 0x582   :  { %2171 = vmatprep.subr.mxu1 %v6404_v21  ;;  %5627 = vmatprep.subr.mxu0 %v11489_v44  ;;  %v2313_v21 = vld [vmem:[%s11192_s9 + $0x20] sm:$0xff] }
 0x583   :  { %2172 = vmatpush1.msra.mxu1 %v6405_v9  ;;  %5628 = vmatpush3.msra.mxu0 %v6406_v38  ;;  %v2312_v9 = vld [vmem:[%s11192_s9 + $0x18] sm:$0xff]  ;;  %v2311_v38 = vld [vmem:[%s11192_s9 + $0x10] sm:$0xff] }
 0x584   :  { %2173 = vmatprep.subr.mxu1 %v6407_v36  ;;  %5629 = vmatprep.subr.mxu0 %v11489_v44  ;;  %v2309_v36 = vld [vmem:[%s11192_s9] sm:$0xff] }
 0x585   :  { %2174 = vmatpush1.msra.mxu1 %v6408_v57  ;;  %5630 = vmatpush3.msra.mxu0 %v6409_v58 }
 0x586   :  { %2175 = vmatprep.subr.mxu1 %v6410_v14  ;;  %5631 = vmatprep.subr.mxu0 %v11489_v44 }
 0x587   :  { %2176 = vmatpush1.msra.mxu1 %v6411_v49  ;;  %2209 = vmatprep.mubr.f32.mxu1 %v11489_v44 }
 0x588   :  { %5632 = vmatpush3.msra.mxu0 %v6412_v1  ;;  %5633 = vmatprep.mubr.msk.f32.mxu0 %vm6420_vm2, %v11489_v44 }
 0x589   :  { %2210 = vmatmul.mubr.f32.vlgmr.msra.gmra.mxu1 %v8595_v20  ;;  %5634 = vmatmul.mubr.f32.vlgmr.msra.gmra.mxu0 %v8595_v20 }
 0x58a   :  { %2444 = vmatprep.subr.mxu0 %v8600_v25  ;;  %2508 = vmatprep.mubr.f32.mxu0 %v11489_v44 }
 0x58b   :  { %2445 = vmatpush1.msra.mxu0 %v8610_v0  ;;  %5636 = vmatprep.subr.mxu1 %v11489_v44 }
 0x58c   :  { %2446 = vmatprep.subr.mxu0 %v8617_v26  ;;  %5668 = vmatprep.mubr.msk.f32.mxu1 %vm6420_vm2, %v11489_v44 }
 0x58d   :  { %2447 = vmatpush1.msra.mxu0 %v8623_v61  ;;  %5637 = vmatpush3.msra.mxu1 %v2324_v56 }
 0x58e   :  { %2448 = vmatprep.subr.mxu0 %v8630_v18  ;;  %5638 = vmatprep.subr.mxu1 %v11489_v44 }
 0x58f   :  { %2449 = vmatpush1.msra.mxu0 %v8637_v15  ;;  %5639 = vmatpush3.msra.mxu1 %v2323_v59 }
 0x590   :  { %2450 = vmatprep.subr.mxu0 %v8645_v24  ;;  %5640 = vmatprep.subr.mxu1 %v11489_v44 }
 0x591   :  { %2451 = vmatpush1.msra.mxu0 %v8651_v8  ;;  %5641 = vmatpush3.msra.mxu1 %v2322_v7 }
 0x592   :  { %2452 = vmatprep.subr.mxu0 %v8657_v22  ;;  %5642 = vmatprep.subr.mxu1 %v11489_v44 }
 0x593   :  { %2453 = vmatpush1.msra.mxu0 %v8663_v13  ;;  %5643 = vmatpush3.msra.mxu1 %v2321_v34 }
 0x594   :  { %2454 = vmatprep.subr.mxu0 %v8669_v63  ;;  %5644 = vmatprep.subr.mxu1 %v11489_v44 }
 0x595   :  { %2455 = vmatpush1.msra.mxu0 %v8675_v51  ;;  %5645 = vmatpush3.msra.mxu1 %v2320_v47 }
 0x596   :  { %2456 = vmatprep.subr.mxu0 %v8681_v6  ;;  %5646 = vmatprep.subr.mxu1 %v11489_v44 }
 0x597   :  { %2457 = vmatpush1.msra.mxu0 %v8687_v11  ;;  %5647 = vmatpush3.msra.mxu1 %v2319_v46 }
 0x598   :  { %2458 = vmatprep.subr.mxu0 %v8693_v60  ;;  %5648 = vmatprep.subr.mxu1 %v11489_v44 }
 0x599   :  { %2459 = vmatpush1.msra.mxu0 %v8699_v30  ;;  %5649 = vmatpush3.msra.mxu1 %v2318_v39 }
 0x59a   :  { %2460 = vmatprep.subr.mxu0 %v8705_v2  ;;  %5650 = vmatprep.subr.mxu1 %v11489_v44 }
 0x59b   :  { %2461 = vmatpush1.msra.mxu0 %v8711_v10  ;;  %5651 = vmatpush3.msra.mxu1 %v2317_v40 }
 0x59c   :  { %2462 = vmatprep.subr.mxu0 %v8717_v45  ;;  %5652 = vmatprep.subr.mxu1 %v11489_v44 }
 0x59d   :  { %2463 = vmatpush1.msra.mxu0 %v8723_v31  ;;  %5653 = vmatpush3.msra.mxu1 %v2316_v41 }
 0x59e   :  { %2464 = vmatprep.subr.mxu0 %v8729_v48  ;;  %5654 = vmatprep.subr.mxu1 %v11489_v44 }
 0x59f   :  { %2465 = vmatpush1.msra.mxu0 %v8735_v29  ;;  %5655 = vmatpush3.msra.mxu1 %v2315_v42 }
 0x5a0   :  { %2466 = vmatprep.subr.mxu0 %v8741_v37  ;;  %5656 = vmatprep.subr.mxu1 %v11489_v44 }
 0x5a1   :  { %2467 = vmatpush1.msra.mxu0 %v8747_v4  ;;  %5657 = vmatpush3.msra.mxu1 %v2314_v43 }
 0x5a2   :  { %2468 = vmatprep.subr.mxu0 %v8753_v3  ;;  %5658 = vmatprep.subr.mxu1 %v11489_v44 }
 0x5a3   :  { %2469 = vmatpush1.msra.mxu0 %v8759_v33  ;;  %5659 = vmatpush3.msra.mxu1 %v2313_v21 }
 0x5a4   :  { %2470 = vmatprep.subr.mxu0 %v8765_v50  ;;  %5660 = vmatprep.subr.mxu1 %v11489_v44 }
 0x5a5   :  { %2471 = vmatpush1.msra.mxu0 %v8771_v62  ;;  %5661 = vmatpush3.msra.mxu1 %v2312_v9 }
 0x5a6   :  { %2472 = vmatprep.subr.mxu0 %v8777_v52  ;;  %5662 = vmatprep.subr.mxu1 %v11489_v44 }
 0x5a7   :  { %2473 = vmatpush1.msra.mxu0 %v8783_v53  ;;  %5663 = vmatpush3.msra.mxu1 %v2311_v38 }
 0x5a8   :  { %2474 = vmatprep.subr.mxu0 %v8789_v54  ;;  %5664 = vmatprep.subr.mxu1 %v11489_v44 }
 0x5a9   :  { %2475 = vmatpush1.msra.mxu0 %v8795_v55  ;;  %5665 = vmatpush3.msra.mxu1 %v2310_v16 }
 0x5aa   :  { %2509 = vmatmul.mubr.f32.vlgmr.msra.gmra.mxu0 %v8435_v35  ;;  %5666 = vmatprep.subr.mxu1 %v11489_v44 }
 0x5ab   :  { %2719 = vmatprep.mubr.f32.mxu0 %v11489_v44  ;;  %5667 = vmatpush3.msra.mxu1 %v2309_v36 }
 0x5ac   :  { %5671 = vmatprep.subr.mxu1 %v11489_v44 }
 0x628   :  { %v2141_v57 = vpop.f32.mrf.mxu0  ;;  %v2070_v28 = vpop.f32.mrf.mxu1 }
 0x629   :  { %v2071_v49 = vadd.f32 %v2070_v28, %v11690_v12  ;;  %v2142_v16 = vadd.f32 %v2141_v57, %v11693_v19  ;;  %v8883_v57 = vld [vmem:[%s11186_s2 + $0x160] sm:$0xff]  ;;  %v9041_v19 = vld [vmem:[%s11185_s5 + $0x138] sm:$0xff]  ;;  %v9048_v12 = vld [vmem:[%s11185_s5 + $0x128] sm:$0xff] }
 0x62a   :  { %v5600_v58 = vpop.f32.mrf.mxu0  ;;  %v2072_v14 = vpop.f32.mrf.mxu1  ;;  %11709 = vst [vmem:[#allocation63_spill] sm:$0xff] %v9041_v19  ;;  %11710 = vst [vmem:[#allocation64_spill] sm:$0xff] %v9048_v12 }
 0x62b   :  { %v2073_v46 = vadd.f32 %v2072_v14, %v11696_v32  ;;  %v9034_v32 = vld [vmem:[%s11185_s5 + $0x148] sm:$0xff] }
 0x62c   :  { %11708 = vst [vmem:[#allocation62_spill] sm:$0xff] %v9034_v32 }
 0x649   :  { %v2211_v1 = vpop.f32.mrf.mxu1  ;;  %v2282_v56 = vpop.f32.mrf.mxu0 }
 0x64a   :  { %v2286_v59 = vadd.f32 %v2211_v1, %v2071_v49  ;;  %v2300_v9 = vadd.f32 %v8422_v27, %v2282_v56  ;;  %v8878_v27 = vld [vmem:[%s11186_s2 + $0x178] sm:$0xff]  ;;  %v8899_v56 = vld [vmem:[%s11186_s2 + $0x130] sm:$0xff] }
 0x64b   :  { %v5635_v7 = vpop.f32.mrf.mxu0  ;;  %v2213_v47 = vpop.f32.mrf.mxu1 }
 0x64c   :  { %v4768_v34 = vmul.f32 -1.442695, %v2286_v59  ;;  %v2293_v39 = vadd.f32 %v2213_v47, %v2073_v46  ;;  %v8906_v47 = vld [vmem:[%s11186_s2 + $0x118] sm:$0xff]  ;;  %v8913_v46 = vld [vmem:[%s11186_s2 + $0x100] sm:$0xff] }
 0x64e   :  { %6234 = vpow2.f32 %v4768_v34  ;;  %v4769_v40 = vmul.f32 -1.442695, %v2293_v39  ;;  %v8920_v39 = vld [vmem:[%s11186_s2 + $0xe8] sm:$0xff] }
 0x650   :  { %6236 = vpow2.f32 %v4769_v40  ;;  %v8927_v40 = vld [vmem:[%s11186_s2 + $0xd0] sm:$0xff] }
 0x65b   :  { %v6235_v41 = vpop.eup %6234 }
 0x65c   :  { %v2290_v42 = vadd.f32 1.0, %v6235_v41  ;;  %v8934_v41 = vld [vmem:[%s11186_s2 + $0xb8] sm:$0xff] }
 0x65d   :  { %v6237_v43 = vpop.eup %6236 }
 0x65e   :  { %6238 = vrcp.f32 %v2290_v42  ;;  %v2297_v21 = vadd.f32 1.0, %v6237_v43  ;;  %v8941_v42 = vld [vmem:[%s11186_s2 + $0xa0] sm:$0xff]  ;;  %v8948_v43 = vld [vmem:[%s11186_s2 + $0x88] sm:$0xff] }
 0x660   :  { %6240 = vrcp.f32 %v2297_v21  ;;  %v8955_v21 = vld [vmem:[%s11186_s2 + $0x70] sm:$0xff] }
 0x66b   :  { %v6239_v38 = vpop.eup %6238 }
 0x66c   :  { %v2301_v36 = vmul.f32 %v6239_v38, %v2300_v9  ;;  %v8962_v9 = vld [vmem:[%s11186_s2 + $0x58] sm:$0xff]  ;;  %v8969_v38 = vld [vmem:[%s11186_s2 + $0x40] sm:$0xff] }
 0x66d   :  { %v6241_v28 = vpop.eup %6240 }
 0x66e   :  { %v2302_v58 = vadd.f32 %v2301_v36, %v2142_v16  ;;  %v2304_v14 = vsub.f32 1.0, %v6241_v28  ;;  %v2306_v59 = vmul.f32 %v6241_v28, %v8595_v20  ;;  %v8976_v16 = vld [vmem:[%s11186_s2 + $0x28] sm:$0xff]  ;;  %v8983_v36 = vld [vmem:[%s11186_s2 + $0x10] sm:$0xff] }
 0x66f   :  { %11699 = vst [vmem:[#allocation53_spill] sm:$0xff] %v8976_v16  ;;  %11700 = vst [vmem:[#allocation54_spill] sm:$0xff] %v8983_v36  ;;  %v9000_v28 = vld [vmem:[%s11185_s5 + $0x168] sm:$0xff] }
 0x670   :  { %6242 = vtanh.f32 %v2302_v58  ;;  %v8995_v58 = vld [vmem:[%s11185_s5 + $0x170] sm:$0xff]  ;;  %11702 = vst [vmem:[#allocation56_spill] sm:$0xff] %v9000_v28 }
 0x671   :  { %11701 = vst [vmem:[#allocation55_spill] sm:$0xff] %v8995_v58  ;;  %2655 = vmatprep.subr.mxu0 %v8995_v58 }
 0x672   :  { %2656 = vmatpush1.msra.mxu0 %v9000_v28 }
 0x67d   :  { %v6243_v49 = vpop.eup %6242 }
 0x67e   :  { %v2305_v1 = vmul.f32 %v6243_v49, %v2304_v14  ;;  %v9005_v14 = vld [vmem:[%s11185_s5 + $0x178] sm:$0xff] }
 0x67f   :  { %11703 = vst [vmem:[#allocation57_spill] sm:$0xff] %v9005_v14  ;;  %v9012_v49 = vld [vmem:[%s11185_s5 + $0x158] sm:$0xff] }
 0x680   :  { %v8871_v7 = vadd.f32 %v2306_v59, %v2305_v1  ;;  %11704 = vst [vmem:[#allocation58_spill] sm:$0xff] %v9012_v49  ;;  %v9017_v1 = vld [vmem:[%s11185_s5 + $0x150] sm:$0xff]  ;;  %v9022_v59 = vld [vmem:[%s11185_s5 + $0x160] sm:$0xff]  ;;  %2657 = vmatprep.subr.mxu0 %v9012_v49 }
 0x681   :  { %11705 = vst [vmem:[#allocation59_spill] sm:$0xff] %v9017_v1  ;;  %11706 = vst [vmem:[#allocation60_spill] sm:$0xff] %v9022_v59  ;;  %2658 = vmatpush1.msra.mxu0 %v9017_v1  ;;  %v9053_v49 = vld [vmem:[%s11185_s5 + $0x130] sm:$0xff]  ;;  %v9187_v1 = vld [vmem:[%s11185_s5 + $0x78] sm:$0xff] }
 0x682   :  { %v2308_v34 = vmax.f32 %v8595_v20, %v8871_v7  ;;  %v8892_v20 = vld [vmem:[%s11186_s2 + $0x148] sm:$0xff]  ;;  %11711 = vst [vmem:[#allocation65_spill] sm:$0xff] %v9053_v49  ;;  %11732 = vst [vmem:[#allocation25_spill] sm:$0xff] %v9187_v1 }
 0x684   :  { %5669 = vmatmul.mubr.f32.vlgmr.msra.gmra.mxu1 %v2308_v34  ;;  %v9029_v34 = vld [vmem:[%s11185_s5 + $0x140] sm:$0xff] }
 0x685   :  { %5672 = vmatpush3.msra.mxu1 %v8878_v27  ;;  %5703 = vmatprep.mubr.msk.f32.mxu1 %vm6420_vm2, %v11489_v44  ;;  %11707 = vst [vmem:[#allocation61_spill] sm:$0xff] %v9029_v34 }
 0x686   :  { %5673 = vmatprep.subr.mxu1 %v11489_v44  ;;  %2659 = vmatprep.subr.mxu0 %v9029_v34  ;;  %v9173_v34 = vld [vmem:[%s11185_s5 + $0xa0] sm:$0xff] }
 0x687   :  { %5674 = vmatpush3.msra.mxu1 %v8883_v57  ;;  %2660 = vmatpush1.msra.mxu0 %v9041_v19  ;;  %v9077_v19 = vld [vmem:[%s11185_s5 + $0x108] sm:$0xff]  ;;  %11730 = vst [vmem:[#allocation22_spill] sm:$0xff] %v9173_v34 }
 0x688   :  { %5675 = vmatprep.subr.mxu1 %v11489_v44  ;;  %2661 = vmatprep.subr.mxu0 %v9048_v12  ;;  %11714 = vst [vmem:[#allocation2_spill] sm:$0xff] %v9077_v19  ;;  %v9156_v12 = vld [vmem:[%s11185_s5 + $0xb8] sm:$0xff] }
 0x689   :  { %5676 = vmatpush3.msra.mxu1 %v8892_v20  ;;  %11727 = vst [vmem:[#allocation19_spill] sm:$0xff] %v9156_v12 }
 0x68a   :  { %5677 = vmatprep.subr.mxu1 %v11489_v44 }
 0x68b   :  { %5678 = vmatpush3.msra.mxu1 %v8899_v56 }
 0x68c   :  { %5679 = vmatprep.subr.mxu1 %v11489_v44 }
 0x68d   :  { %5680 = vmatpush3.msra.mxu1 %v8906_v47 }
 0x68e   :  { %5681 = vmatprep.subr.mxu1 %v11489_v44 }
 0x68f   :  { %5682 = vmatpush3.msra.mxu1 %v8913_v46 }
 0x690   :  { %5683 = vmatprep.subr.mxu1 %v11489_v44 }
 0x691   :  { %5684 = vmatpush3.msra.mxu1 %v8920_v39 }
 0x692   :  { %5685 = vmatprep.subr.mxu1 %v11489_v44 }
 0x693   :  { %5686 = vmatpush3.msra.mxu1 %v8927_v40 }
 0x694   :  { %5687 = vmatprep.subr.mxu1 %v11489_v44 }
 0x695   :  { %5688 = vmatpush3.msra.mxu1 %v8934_v41 }
 0x696   :  { %5689 = vmatprep.subr.mxu1 %v11489_v44 }
 0x697   :  { %5690 = vmatpush3.msra.mxu1 %v8941_v42 }
 0x698   :  { %5691 = vmatprep.subr.mxu1 %v11489_v44 }
 0x699   :  { %5692 = vmatpush3.msra.mxu1 %v8948_v43 }
 0x69a   :  { %5693 = vmatprep.subr.mxu1 %v11489_v44 }
 0x69b   :  { %5694 = vmatpush3.msra.mxu1 %v8955_v21 }
 0x69c   :  { %5695 = vmatprep.subr.mxu1 %v11489_v44 }
 0x69d   :  { %5696 = vmatpush3.msra.mxu1 %v8962_v9 }
 0x69e   :  { %5697 = vmatprep.subr.mxu1 %v11489_v44 }
 0x69f   :  { %5698 = vmatpush3.msra.mxu1 %v8969_v38 }
 0x6a0   :  { %5699 = vmatprep.subr.mxu1 %v11489_v44 }
 0x6a1   :  { %5700 = vmatpush3.msra.mxu1 %v8976_v16 }
 0x6a2   :  { %5701 = vmatprep.subr.mxu1 %v11489_v44 }
 0x6a3   :  { %5702 = vmatpush3.msra.mxu1 %v8983_v36 }
 0x6a4   :  { %5704 = vmatmul.mubr.f32.vlgmr.msra.gmra.mxu1 %v8435_v35  ;;  %5706 = vmatprep.subr.mxu1 %v11489_v44 }
 0x6a5   :  { %5738 = vmatprep.mubr.msk.f32.mxu1 %vm6420_vm2, %v11489_v44  ;;  %5707 = vmatpush3.msra.mxu1 %v9005_v14 }
 0x6a6   :  { %5708 = vmatprep.subr.mxu1 %v11489_v44 }
 0x6a7   :  { %5709 = vmatpush3.msra.mxu1 %v9022_v59  ;;  %v9060_v59 = vld [vmem:[%s11185_s5 + $0x120] sm:$0xff] }
 0x6a8   :  { %5710 = vmatprep.subr.mxu1 %v11489_v44  ;;  %11712 = vst [vmem:[#allocation66_spill] sm:$0xff] %v9060_v59  ;;  %2662 = vmatpush1.msra.mxu0 %v9060_v59  ;;  %v9089_v59 = vld [vmem:[%s11185_s5 + $0xf8] sm:$0xff] }
 0x6a9   :  { %5711 = vmatpush3.msra.mxu1 %v9034_v32  ;;  %v9071_v32 = vld [vmem:[%s11185_s5 + $0x110] sm:$0xff]  ;;  %11716 = vst [vmem:[#allocation8_spill] sm:$0xff] %v9089_v59 }
 0x6aa   :  { %5712 = vmatprep.subr.mxu1 %v11489_v44  ;;  %11713 = vst [vmem:[#allocation67_spill] sm:$0xff] %v9071_v32  ;;  %2663 = vmatprep.subr.mxu0 %v9071_v32  ;;  %v9096_v32 = vld [vmem:[%s11185_s5 + $0xf0] sm:$0xff] }
 0x6ab   :  { %5713 = vmatpush3.msra.mxu1 %v9053_v49  ;;  %v9082_v49 = vld [vmem:[%s11185_s5 + $0x118] sm:$0xff]  ;;  %2664 = vmatpush1.msra.mxu0 %v9077_v19  ;;  %11717 = vst [vmem:[#allocation10_spill] sm:$0xff] %v9096_v32  ;;  %v9101_v19 = vld [vmem:[%s11185_s5 + $0x100] sm:$0xff] }
 0x6ac   :  { %5714 = vmatprep.subr.mxu1 %v11489_v44  ;;  %11715 = vst [vmem:[#allocation7_spill] sm:$0xff] %v9082_v49  ;;  %2665 = vmatprep.subr.mxu0 %v9089_v59  ;;  %11718 = vst [vmem:[#allocation9_spill] sm:$0xff] %v9101_v19  ;;  %v9108_v59 = vld [vmem:[%s11185_s5 + $0xe0] sm:$0xff] }
 0x6ad   :  { %5715 = vmatpush3.msra.mxu1 %v9082_v49  ;;  %2666 = vmatpush1.msra.mxu0 %v9096_v32  ;;  %11719 = vst [vmem:[#allocation11_spill] sm:$0xff] %v9108_v59  ;;  %v9115_v49 = vld [vmem:[%s11185_s5 + $0xd8] sm:$0xff]  ;;  %v9120_v32 = vld [vmem:[%s11185_s5 + $0xe8] sm:$0xff] }
 0x6ae   :  { %5716 = vmatprep.subr.mxu1 %v11489_v44  ;;  %2667 = vmatprep.subr.mxu0 %v9108_v59  ;;  %11720 = vst [vmem:[#allocation13_spill] sm:$0xff] %v9115_v49  ;;  %11721 = vst [vmem:[#allocation12_spill] sm:$0xff] %v9120_v32  ;;  %v9127_v59 = vld [vmem:[%s11185_s5 + $0xc8] sm:$0xff] }
 0x6af   :  { %5717 = vmatpush3.msra.mxu1 %v9101_v19  ;;  %2668 = vmatpush1.msra.mxu0 %v9115_v49  ;;  %11722 = vst [vmem:[#allocation14_spill] sm:$0xff] %v9127_v59  ;;  %v9134_v19 = vld [vmem:[%s11185_s5 + $0xc0] sm:$0xff]  ;;  %v9139_v49 = vld [vmem:[%s11185_s5 + $0xd0] sm:$0xff] }
 0x6b0   :  { %5718 = vmatprep.subr.mxu1 %v11489_v44  ;;  %2669 = vmatprep.subr.mxu0 %v9127_v59  ;;  %11723 = vst [vmem:[#allocation15_spill] sm:$0xff] %v9134_v19  ;;  %11724 = vst [vmem:[#allocation16_spill] sm:$0xff] %v9139_v49  ;;  %v9146_v59 = vld [vmem:[%s11185_s5 + $0xb0] sm:$0xff] }
 0x6b1   :  { %5719 = vmatpush3.msra.mxu1 %v9120_v32  ;;  %2670 = vmatpush1.msra.mxu0 %v9134_v19  ;;  %11725 = vst [vmem:[#allocation17_spill] sm:$0xff] %v9146_v59  ;;  %v9151_v32 = vld [vmem:[%s11185_s5 + $0xa8] sm:$0xff]  ;;  %v9168_v19 = vld [vmem:[%s11185_s5 + $0x90] sm:$0xff] }
 0x6b2   :  { %5720 = vmatprep.subr.mxu1 %v11489_v44  ;;  %11726 = vst [vmem:[#allocation18_spill] sm:$0xff] %v9151_v32  ;;  %2671 = vmatprep.subr.mxu0 %v9146_v59  ;;  %11729 = vst [vmem:[#allocation21_spill] sm:$0xff] %v9168_v19  ;;  %v9180_v59 = vld [vmem:[%s11185_s5 + $0x80] sm:$0xff] }
 0x6b3   :  { %5721 = vmatpush3.msra.mxu1 %v9139_v49  ;;  %v9163_v49 = vld [vmem:[%s11185_s5 + $0x98] sm:$0xff]  ;;  %2672 = vmatpush1.msra.mxu0 %v9151_v32  ;;  %11731 = vst [vmem:[#allocation24_spill] sm:$0xff] %v9180_v59  ;;  %v9192_v32 = vld [vmem:[%s11185_s5 + $0x88] sm:$0xff] }
 0x6b4   :  { %5722 = vmatprep.subr.mxu1 %v11489_v44  ;;  %11728 = vst [vmem:[#allocation20_spill] sm:$0xff] %v9163_v49  ;;  %2673 = vmatprep.subr.mxu0 %v9163_v49  ;;  %11733 = vst [vmem:[#allocation27_spill] sm:$0xff] %v9192_v32  ;;  %v9199_v49 = vld [vmem:[%s11185_s5 + $0x68] sm:$0xff] }
 0x6b5   :  { %5723 = vmatpush3.msra.mxu1 %v9156_v12  ;;  %2674 = vmatpush1.msra.mxu0 %v9168_v19  ;;  %11734 = vst [vmem:[#allocation28_spill] sm:$0xff] %v9199_v49  ;;  %v9206_v12 = vld [vmem:[%s11185_s5 + $0x60] sm:$0xff]  ;;  %v9211_v19 = vld [vmem:[%s11185_s5 + $0x70] sm:$0xff] }
 0x6b6   :  { %5724 = vmatprep.subr.mxu1 %v11489_v44  ;;  %2675 = vmatprep.subr.mxu0 %v9180_v59  ;;  %11735 = vst [vmem:[#allocation30_spill] sm:$0xff] %v9206_v12  ;;  %11736 = vst [vmem:[#allocation31_spill] sm:$0xff] %v9211_v19  ;;  %v9218_v59 = vld [vmem:[%s11185_s5 + $0x50] sm:$0xff] }
 0x6b7   :  { %5725 = vmatpush3.msra.mxu1 %v9173_v34  ;;  %2676 = vmatpush1.msra.mxu0 %v9187_v1  ;;  %11737 = vst [vmem:[#allocation33_spill] sm:$0xff] %v9218_v59  ;;  %v9225_v34 = vld [vmem:[%s11185_s5 + $0x48] sm:$0xff]  ;;  %v9230_v1 = vld [vmem:[%s11185_s5 + $0x58] sm:$0xff] }
 0x6b8   :  { %5726 = vmatprep.subr.mxu1 %v11489_v44  ;;  %2677 = vmatprep.subr.mxu0 %v9199_v49  ;;  %11738 = vst [vmem:[#allocation23_spill] sm:$0xff] %v9225_v34  ;;  %11739 = vst [vmem:[#allocation26_spill] sm:$0xff] %v9230_v1  ;;  %v9237_v49 = vld [vmem:[%s11185_s5 + $0x38] sm:$0xff] }
 0x6b9   :  { %5727 = vmatpush3.msra.mxu1 %v9192_v32  ;;  %2678 = vmatpush1.msra.mxu0 %v9206_v12  ;;  %11740 = vst [vmem:[#allocation29_spill] sm:$0xff] %v9237_v49  ;;  %v9244_v32 = vld [vmem:[%s11185_s5 + $0x30] sm:$0xff]  ;;  %v9249_v12 = vld [vmem:[%s11185_s5 + $0x40] sm:$0xff] }
 0x6ba   :  { %5728 = vmatprep.subr.mxu1 %v11489_v44  ;;  %2679 = vmatprep.subr.mxu0 %v9218_v59  ;;  %11741 = vst [vmem:[#allocation32_spill] sm:$0xff] %v9244_v32  ;;  %11742 = vst [vmem:[#allocation34_spill] sm:$0xff] %v9249_v12  ;;  %v9256_v59 = vld [vmem:[%s11185_s5 + $0x20] sm:$0xff] }
 0x6bb   :  { %5729 = vmatpush3.msra.mxu1 %v9211_v19  ;;  %2680 = vmatpush1.msra.mxu0 %v9225_v34  ;;  %11743 = vst [vmem:[#allocation68_spill] sm:$0xff] %v9256_v59  ;;  %v9263_v19 = vld [vmem:[%s11185_s5 + $0x18] sm:$0xff]  ;;  %v9268_v34 = vld [vmem:[%s11185_s5 + $0x28] sm:$0xff] }
 0x6bc   :  { %5730 = vmatprep.subr.mxu1 %v11489_v44  ;;  %2681 = vmatprep.subr.mxu0 %v9237_v49  ;;  %11744 = vst [vmem:[#allocation69_spill] sm:$0xff] %v9263_v19  ;;  %11745 = vst [vmem:[#allocation70_spill] sm:$0xff] %v9268_v34  ;;  %v9275_v49 = vld [vmem:[%s11185_s5 + $0x8] sm:$0xff] }
 0x6bd   :  { %5731 = vmatpush3.msra.mxu1 %v9230_v1  ;;  %2682 = vmatpush1.msra.mxu0 %v9244_v32  ;;  %11746 = vst [vmem:[#allocation71_spill] sm:$0xff] %v9275_v49  ;;  %v9282_v1 = vld [vmem:[%s11185_s5] sm:$0xff]  ;;  %v9287_v32 = vld [vmem:[%s11185_s5 + $0x10] sm:$0xff] }
 0x6be   :  { %5732 = vmatprep.subr.mxu1 %v11489_v44  ;;  %2683 = vmatprep.subr.mxu0 %v9256_v59  ;;  %11747 = vst [vmem:[#allocation72_spill] sm:$0xff] %v9282_v1  ;;  %11748 = vst [vmem:[#allocation73_spill] sm:$0xff] %v9287_v32  ;;  %v9294_v59 = vld [vmem:[%s11189_s6 + $0x170] sm:$0xff] }
 0x6bf   :  { %5733 = vmatpush3.msra.mxu1 %v9249_v12  ;;  %2684 = vmatpush1.msra.mxu0 %v9263_v19  ;;  %11749 = vst [vmem:[#allocation74_spill] sm:$0xff] %v9294_v59  ;;  %v2510_v19 = vpop.f32.mrf.mxu0 }
 0x6c0   :  { %5734 = vmatprep.subr.mxu1 %v11489_v44  ;;  %2685 = vmatprep.subr.mxu0 %v9275_v49  ;;  %v6413_v49 = vld [vmem:[%s11193_s10] ss:$0 sm:$0xff] }
 0x6c1   :  { %5735 = vmatpush3.msra.mxu1 %v9268_v34  ;;  %2686 = vmatpush1.msra.mxu0 %v9282_v1  ;;  %v11750_v34 = vld [vmem:[#allocation42_spill] sm:$0xff] }
 0x6c2   :  { %5736 = vmatprep.subr.mxu1 %v11489_v44  ;;  %2844 = vmatprep.subr.mxu0 %v9294_v59  ;;  %v229_v12 = vadd.f32 %v11750_v34, %v11691_v17  ;;  %v2512_v59 = vpop.f32.mrf.mxu0 }
 0x6c3   :  { %5737 = vmatpush3.msra.mxu1 %v9287_v32  ;;  %v11751_v32 = vld [vmem:[#allocation43_spill] sm:$0xff] }
 0x6c4   :  { %5741 = vmatprep.subr.mxu1 %v11489_v44  ;;  %v2585_v14 = vadd.f32 %v2510_v19, %v229_v12  ;;  %v231_v55 = vadd.f32 %v11751_v32, %v6863_v23  ;;  %v11752_v32 = vld [vmem:[#allocation37_spill] sm:$0xff] }
 0x6c6   :  { %v4770_v28 = vmul.f32 -1.442695, %v2585_v14  ;;  %v2592_v54 = vadd.f32 %v2512_v59, %v231_v55  ;;  %v338_v55 = vadd.f32 %v11752_v32, %v6871_v5  ;;  %v9367_v32 = vld [vmem:[%s11189_s6 + $0x148] sm:$0xff] }
 0x6c8   :  { %6244 = vpow2.f32 %v4770_v28  ;;  %v4771_v34 = vmul.f32 -1.442695, %v2592_v54 }
 0x6ca   :  { %6246 = vpow2.f32 %v4771_v34 }
 0x6d5   :  { %v6245_v12 = vpop.eup %6244 }
 0x6d6   :  { %v2589_v19 = vadd.f32 1.0, %v6245_v12 }
 0x6d7   :  { %v6247_v28 = vpop.eup %6246 }
 0x6d8   :  { %6248 = vrcp.f32 %v2589_v19  ;;  %v2596_v14 = vadd.f32 1.0, %v6247_v28 }
 0x6da   :  { %6250 = vrcp.f32 %v2596_v14  ;;  %v9331_v14 = vld [vmem:[%s11189_s6 + $0x178] sm:$0xff] }
 0x744   :  { %v2391_v58 = vpop.f32.mrf.mxu1 }
 0x745   :  { %v2392_v36 = vadd.f32 %v6413_v49, %v2391_v58  ;;  %v9315_v58 = vld [vmem:[%s11188_s4] ss:$0 sm:$0xff]  ;;  %v6249_v49 = vpop.eup %6248 }
 0x746   :  { %v5670_v1 = vpop.f32.mrf.mxu1  ;;  %v6251_v34 = vpop.eup %6250 }
 0x747   :  { %2395 = vst [vmem:[%s11194_s11 + $0x8] sm:$0xff] %v2392_v36  ;;  %v2603_v12 = vsub.f32 1.0, %v6251_v34  ;;  %v2605_v23 = vmul.f32 %v6251_v34, %v8435_v35  ;;  %v9348_v35 = vld [vmem:[%s11189_s6 + $0x160] sm:$0xff]  ;;  %v9393_v34 = vld [vmem:[%s11189_s6 + $0x110] sm:$0xff] }
 0x748   :  { %11756 = vst [vmem:[#allocation78_spill] sm:$0xff] %v9393_v34 }
 0x764   :  { %v2581_v17 = vpop.f32.mrf.mxu1 }
 0x765   :  { %v2599_v36 = vadd.f32 %v9315_v58, %v2581_v17  ;;  %v9326_v17 = vld [vmem:[%s11189_s6 + $0x168] sm:$0xff] }
 0x766   :  { %v5705_v1 = vpop.f32.mrf.mxu1 }
 0x767   :  { %v2600_v54 = vmul.f32 %v6249_v49, %v2599_v36  ;;  %v9336_v36 = vld [vmem:[%s11189_s6 + $0x158] sm:$0xff]  ;;  %v9355_v49 = vld [vmem:[%s11189_s6 + $0x140] sm:$0xff] }
 0x768   :  { %v9362_v1 = vld [vmem:[%s11189_s6 + $0x138] sm:$0xff] }
 0x769   :  { %v2601_v59 = vadd.f32 %v2600_v54, %v338_v55  ;;  %v9374_v55 = vld [vmem:[%s11189_s6 + $0x128] sm:$0xff]  ;;  %v9381_v54 = vld [vmem:[%s11189_s6 + $0x120] sm:$0xff] }
 0x76a   :  { %11753 = vst [vmem:[#allocation75_spill] sm:$0xff] %v9374_v55  ;;  %11754 = vst [vmem:[#allocation76_spill] sm:$0xff] %v9381_v54 }
 0x76b   :  { %6252 = vtanh.f32 %v2601_v59  ;;  %v9386_v59 = vld [vmem:[%s11189_s6 + $0x130] sm:$0xff] }
 0x76c   :  { %11755 = vst [vmem:[#allocation77_spill] sm:$0xff] %v9386_v59 }
 0x778   :  { %v6253_v19 = vpop.eup %6252 }
 0x779   :  { %v2604_v28 = vmul.f32 %v6253_v19, %v2603_v12  ;;  %v9400_v12 = vld [vmem:[%s11189_s6 + $0x108] sm:$0xff]  ;;  %v9405_v19 = vld [vmem:[%s11189_s6 + $0x118] sm:$0xff] }
 0x77a   :  { %11757 = vst [vmem:[#allocation79_spill] sm:$0xff] %v9400_v12  ;;  %11758 = vst [vmem:[#allocation80_spill] sm:$0xff] %v9405_v19 }
 0x77b   :  { %v9321_v16 = vadd.f32 %v2605_v23, %v2604_v28  ;;  %v9343_v23 = vld [vmem:[%s11189_s6 + $0x150] sm:$0xff]  ;;  %v9412_v28 = vld [vmem:[%s11189_s6 + $0xf8] sm:$0xff] }
 0x77c   :  { %11759 = vst [vmem:[#allocation81_spill] sm:$0xff] %v9412_v28 }
 0x77d   :  { %2720 = vmatmul.mubr.f32.vlgmr.msra.gmra.mxu0 %v9321_v16  ;;  %5739 = vmatmul.mubr.f32.vlgmr.msra.gmra.mxu1 %v9321_v16 }
 0x77e   :  { %2845 = vmatpush1.msra.mxu0 %v9326_v17  ;;  %5742 = vmatpush3.msra.mxu1 %v9331_v14 }
 0x77f   :  { %2846 = vmatprep.subr.mxu0 %v9336_v36  ;;  %5743 = vmatprep.subr.mxu1 %v11489_v44 }
 0x780   :  { %2847 = vmatpush1.msra.mxu0 %v9343_v23  ;;  %5744 = vmatpush3.msra.mxu1 %v9348_v35 }
 0x781   :  { %2848 = vmatprep.subr.mxu0 %v9355_v49  ;;  %5745 = vmatprep.subr.mxu1 %v11489_v44 }
 0x782   :  { %2849 = vmatpush1.msra.mxu0 %v9362_v1  ;;  %5746 = vmatpush3.msra.mxu1 %v9367_v32 }
 0x783   :  { %2850 = vmatprep.subr.mxu0 %v9374_v55  ;;  %5747 = vmatprep.subr.mxu1 %v11489_v44  ;;  %v9419_v55 = vld [vmem:[%s11189_s6 + $0xf0] sm:$0xff] }
 0x784   :  { %2851 = vmatpush1.msra.mxu0 %v9381_v54  ;;  %5748 = vmatpush3.msra.mxu1 %v9386_v59  ;;  %11760 = vst [vmem:[#allocation82_spill] sm:$0xff] %v9419_v55  ;;  %v9424_v54 = vld [vmem:[%s11189_s6 + $0x100] sm:$0xff]  ;;  %v9438_v59 = vld [vmem:[%s11189_s6 + $0xd8] sm:$0xff] }
 0x785   :  { %2852 = vmatprep.subr.mxu0 %v9393_v34  ;;  %5749 = vmatprep.subr.mxu1 %v11489_v44  ;;  %11761 = vst [vmem:[#allocation38_spill] sm:$0xff] %v9424_v54  ;;  %v9431_v34 = vld [vmem:[%s11189_s6 + $0xe0] sm:$0xff]  ;;  %11763 = vst [vmem:[#allocation35_spill] sm:$0xff] %v9438_v59 }
 0x786   :  { %2853 = vmatpush1.msra.mxu0 %v9400_v12  ;;  %5750 = vmatpush3.msra.mxu1 %v9405_v19  ;;  %11762 = vst [vmem:[#allocation40_spill] sm:$0xff] %v9431_v34  ;;  %v9443_v12 = vld [vmem:[%s11189_s6 + $0xe8] sm:$0xff]  ;;  %v9457_v19 = vld [vmem:[%s11189_s6 + $0xc0] sm:$0xff] }
 0x787   :  { %2854 = vmatprep.subr.mxu0 %v9412_v28  ;;  %5751 = vmatprep.subr.mxu1 %v11489_v44  ;;  %11764 = vst [vmem:[#allocation42_spill] sm:$0xff] %v9443_v12  ;;  %v9450_v28 = vld [vmem:[%s11189_s6 + $0xc8] sm:$0xff]  ;;  %11766 = vst [vmem:[#allocation37_spill] sm:$0xff] %v9457_v19 }
 0x788   :  { %2855 = vmatpush1.msra.mxu0 %v9419_v55  ;;  %5752 = vmatpush3.msra.mxu1 %v9424_v54  ;;  %11765 = vst [vmem:[#allocation43_spill] sm:$0xff] %v9450_v28  ;;  %v9462_v55 = vld [vmem:[%s11189_s6 + $0xd0] sm:$0xff]  ;;  %v9476_v54 = vld [vmem:[%s11189_s6 + $0xa8] sm:$0xff] }
 0x789   :  { %2856 = vmatprep.subr.mxu0 %v9431_v34  ;;  %5753 = vmatprep.subr.mxu1 %v11489_v44  ;;  %11767 = vst [vmem:[#allocation83_spill] sm:$0xff] %v9462_v55  ;;  %v9469_v34 = vld [vmem:[%s11189_s6 + $0xb0] sm:$0xff]  ;;  %11769 = vst [vmem:[#allocation85_spill] sm:$0xff] %v9476_v54 }
 0x78a   :  { %2857 = vmatpush1.msra.mxu0 %v9438_v59  ;;  %5754 = vmatpush3.msra.mxu1 %v9443_v12  ;;  %11768 = vst [vmem:[#allocation84_spill] sm:$0xff] %v9469_v34  ;;  %v9481_v59 = vld [vmem:[%s11189_s6 + $0xb8] sm:$0xff]  ;;  %v9495_v12 = vld [vmem:[%s11189_s6 + $0x90] sm:$0xff] }
 0x78b   :  { %2858 = vmatprep.subr.mxu0 %v9450_v28  ;;  %5755 = vmatprep.subr.mxu1 %v11489_v44  ;;  %11770 = vst [vmem:[#allocation86_spill] sm:$0xff] %v9481_v59  ;;  %v9488_v28 = vld [vmem:[%s11189_s6 + $0x98] sm:$0xff]  ;;  %11772 = vst [vmem:[#allocation88_spill] sm:$0xff] %v9495_v12 }
 0x78c   :  { %2859 = vmatpush1.msra.mxu0 %v9457_v19  ;;  %5756 = vmatpush3.msra.mxu1 %v9462_v55  ;;  %11771 = vst [vmem:[#allocation87_spill] sm:$0xff] %v9488_v28  ;;  %v9500_v19 = vld [vmem:[%s11189_s6 + $0xa0] sm:$0xff]  ;;  %v9514_v55 = vld [vmem:[%s11189_s6 + $0x78] sm:$0xff] }
 0x78d   :  { %2860 = vmatprep.subr.mxu0 %v9469_v34  ;;  %5757 = vmatprep.subr.mxu1 %v11489_v44  ;;  %11773 = vst [vmem:[#allocation89_spill] sm:$0xff] %v9500_v19  ;;  %v9507_v34 = vld [vmem:[%s11189_s6 + $0x80] sm:$0xff]  ;;  %11775 = vst [vmem:[#allocation91_spill] sm:$0xff] %v9514_v55 }
 0x78e   :  { %2861 = vmatpush1.msra.mxu0 %v9476_v54  ;;  %5758 = vmatpush3.msra.mxu1 %v9481_v59  ;;  %11774 = vst [vmem:[#allocation90_spill] sm:$0xff] %v9507_v34  ;;  %v9519_v54 = vld [vmem:[%s11189_s6 + $0x88] sm:$0xff]  ;;  %v9533_v59 = vld [vmem:[%s11189_s6 + $0x60] sm:$0xff] }
 0x78f   :  { %2862 = vmatprep.subr.mxu0 %v9488_v28  ;;  %5759 = vmatprep.subr.mxu1 %v11489_v44  ;;  %11776 = vst [vmem:[#allocation92_spill] sm:$0xff] %v9519_v54  ;;  %v9526_v28 = vld [vmem:[%s11189_s6 + $0x68] sm:$0xff]  ;;  %11778 = vst [vmem:[#allocation94_spill] sm:$0xff] %v9533_v59 }
 0x790   :  { %2863 = vmatpush1.msra.mxu0 %v9495_v12  ;;  %5760 = vmatpush3.msra.mxu1 %v9500_v19  ;;  %11777 = vst [vmem:[#allocation93_spill] sm:$0xff] %v9526_v28  ;;  %v9538_v12 = vld [vmem:[%s11189_s6 + $0x70] sm:$0xff]  ;;  %v9552_v19 = vld [vmem:[%s11189_s6 + $0x48] sm:$0xff] }
 0x791   :  { %2864 = vmatprep.subr.mxu0 %v9507_v34  ;;  %5761 = vmatprep.subr.mxu1 %v11489_v44  ;;  %11779 = vst [vmem:[#allocation95_spill] sm:$0xff] %v9538_v12  ;;  %v9545_v34 = vld [vmem:[%s11189_s6 + $0x50] sm:$0xff]  ;;  %11781 = vst [vmem:[#allocation97_spill] sm:$0xff] %v9552_v19 }
 0x792   :  { %2865 = vmatpush1.msra.mxu0 %v9514_v55  ;;  %5762 = vmatpush3.msra.mxu1 %v9519_v54  ;;  %11780 = vst [vmem:[#allocation96_spill] sm:$0xff] %v9545_v34  ;;  %v9557_v55 = vld [vmem:[%s11189_s6 + $0x58] sm:$0xff]  ;;  %v9571_v54 = vld [vmem:[%s11189_s6 + $0x30] sm:$0xff] }
 0x793   :  { %2866 = vmatprep.subr.mxu0 %v9526_v28  ;;  %5763 = vmatprep.subr.mxu1 %v11489_v44  ;;  %11782 = vst [vmem:[#allocation98_spill] sm:$0xff] %v9557_v55  ;;  %v9564_v28 = vld [vmem:[%s11189_s6 + $0x38] sm:$0xff] }
 0x794   :  { %2867 = vmatpush1.msra.mxu0 %v9533_v59  ;;  %5764 = vmatpush3.msra.mxu1 %v9538_v12  ;;  %11783 = vst [vmem:[#allocation99_spill] sm:$0xff] %v9564_v28  ;;  %v9576_v59 = vld [vmem:[%s11189_s6 + $0x40] sm:$0xff]  ;;  %v9590_v12 = vld [vmem:[%s11189_s6 + $0x18] sm:$0xff] }
 0x795   :  { %2868 = vmatprep.subr.mxu0 %v9545_v34  ;;  %5765 = vmatprep.subr.mxu1 %v11489_v44  ;;  %11784 = vst [vmem:[#allocation100_spill] sm:$0xff] %v9576_v59  ;;  %v9583_v34 = vld [vmem:[%s11189_s6 + $0x20] sm:$0xff] }
 0x796   :  { %2869 = vmatpush1.msra.mxu0 %v9552_v19  ;;  %5766 = vmatpush3.msra.mxu1 %v9557_v55  ;;  %v9595_v19 = vld [vmem:[%s11189_s6 + $0x28] sm:$0xff]  ;;  %v9609_v55 = vld [vmem:[%s11189_s6] sm:$0xff] }
 0x797   :  { %2870 = vmatprep.subr.mxu0 %v9564_v28  ;;  %5767 = vmatprep.subr.mxu1 %v11489_v44  ;;  %v9602_v28 = vld [vmem:[%s11189_s6 + $0x8] sm:$0xff] }
 0x798   :  { %2871 = vmatpush1.msra.mxu0 %v9571_v54  ;;  %5768 = vmatpush3.msra.mxu1 %v9576_v59  ;;  %v9616_v59 = vld [vmem:[%s11189_s6 + $0x10] sm:$0xff] }
 0x799   :  { %2872 = vmatprep.subr.mxu0 %v9583_v34  ;;  %5769 = vmatprep.subr.mxu1 %v11489_v44 }
 0x79a   :  { %2873 = vmatpush1.msra.mxu0 %v9590_v12  ;;  %5770 = vmatpush3.msra.mxu1 %v9595_v19 }
 0x79b   :  { %2874 = vmatprep.subr.mxu0 %v9602_v28  ;;  %5771 = vmatprep.subr.mxu1 %v11489_v44 }
 0x79c   :  { %2875 = vmatpush1.msra.mxu0 %v9609_v55  ;;  %2908 = vmatprep.mubr.f32.mxu0 %v11489_v44 }
 0x79d   :  { %5772 = vmatpush3.msra.mxu1 %v9616_v59  ;;  %5773 = vmatprep.mubr.msk.f32.mxu1 %vm6420_vm2, %v11489_v44 }
 0x79e   :  { %2909 = vmatmul.mubr.f32.vlgmr.msra.gmra.mxu0 %v8871_v7  ;;  %5774 = vmatmul.mubr.f32.vlgmr.msra.gmra.mxu1 %v8871_v7 }
 0x79f   :  { %3007 = vmatprep.subr.mxu0 %v8600_v25  ;;  %5776 = vmatprep.subr.mxu1 %v11489_v44  ;;  %v11785_v25 = vld [vmem:[#allocation53_spill] sm:$0xff] }
 0x7a0   :  { %3008 = vmatpush1.msra.mxu0 %v8610_v0  ;;  %5777 = vmatpush3.msra.mxu1 %v8878_v27  ;;  %v11786_v0 = vld [vmem:[#allocation51_spill] sm:$0xff] }
 0x7a1   :  { %3009 = vmatprep.subr.mxu0 %v8617_v26  ;;  %5778 = vmatprep.subr.mxu1 %v11489_v44  ;;  %v11787_v26 = vld [vmem:[#allocation52_spill] sm:$0xff]  ;;  %v11815_v27 = vld [vmem:[#allocation19_spill] sm:$0xff] }
 0x7a2   :  { %3010 = vmatpush1.msra.mxu0 %v8623_v61  ;;  %5779 = vmatpush3.msra.mxu1 %v8883_v57  ;;  %v11788_v61 = vld [vmem:[#allocation54_spill] sm:$0xff]  ;;  %v11816_v57 = vld [vmem:[#allocation20_spill] sm:$0xff] }
 0x7a3   :  { %3011 = vmatprep.subr.mxu0 %v8630_v18  ;;  %5780 = vmatprep.subr.mxu1 %v11489_v44  ;;  %v11789_v18 = vld [vmem:[#allocation55_spill] sm:$0xff] }
 0x7a4   :  { %3012 = vmatpush1.msra.mxu0 %v8637_v15  ;;  %5781 = vmatpush3.msra.mxu1 %v8892_v20  ;;  %v11790_v15 = vld [vmem:[#allocation56_spill] sm:$0xff]  ;;  %v11817_v20 = vld [vmem:[#allocation21_spill] sm:$0xff] }
 0x7a5   :  { %3013 = vmatprep.subr.mxu0 %v8645_v24  ;;  %5782 = vmatprep.subr.mxu1 %v11489_v44  ;;  %v11791_v24 = vld [vmem:[#allocation57_spill] sm:$0xff] }
 0x7a6   :  { %3014 = vmatpush1.msra.mxu0 %v8651_v8  ;;  %5783 = vmatpush3.msra.mxu1 %v8899_v56  ;;  %v11792_v8 = vld [vmem:[#allocation58_spill] sm:$0xff] }
 0x7a7   :  { %3015 = vmatprep.subr.mxu0 %v8657_v22  ;;  %5784 = vmatprep.subr.mxu1 %v11489_v44  ;;  %v11793_v22 = vld [vmem:[#allocation59_spill] sm:$0xff]  ;;  %v11818_v56 = vld [vmem:[#allocation22_spill] sm:$0xff] }
 0x7a8   :  { %3016 = vmatpush1.msra.mxu0 %v8663_v13  ;;  %5785 = vmatpush3.msra.mxu1 %v8906_v47  ;;  %v11794_v13 = vld [vmem:[#allocation60_spill] sm:$0xff] }
 0x7a9   :  { %3017 = vmatprep.subr.mxu0 %v8669_v63  ;;  %5786 = vmatprep.subr.mxu1 %v11489_v44  ;;  %v11795_v63 = vld [vmem:[#allocation61_spill] sm:$0xff]  ;;  %v11819_v47 = vld [vmem:[#allocation24_spill] sm:$0xff] }
 0x7aa   :  { %3018 = vmatpush1.msra.mxu0 %v8675_v51  ;;  %5787 = vmatpush3.msra.mxu1 %v8913_v46  ;;  %v11796_v51 = vld [vmem:[#allocation63_spill] sm:$0xff]  ;;  %v11820_v46 = vld [vmem:[#allocation25_spill] sm:$0xff] }
 0x7ab   :  { %3019 = vmatprep.subr.mxu0 %v8681_v6  ;;  %5788 = vmatprep.subr.mxu1 %v11489_v44  ;;  %v11797_v6 = vld [vmem:[#allocation62_spill] sm:$0xff] }
 0x7ac   :  { %3020 = vmatpush1.msra.mxu0 %v8687_v11  ;;  %5789 = vmatpush3.msra.mxu1 %v8920_v39  ;;  %v11798_v11 = vld [vmem:[#allocation64_spill] sm:$0xff]  ;;  %v11821_v39 = vld [vmem:[#allocation27_spill] sm:$0xff] }
 0x7ad   :  { %3021 = vmatprep.subr.mxu0 %v8693_v60  ;;  %5790 = vmatprep.subr.mxu1 %v11489_v44  ;;  %v11799_v60 = vld [vmem:[#allocation66_spill] sm:$0xff] }
 0x7ae   :  { %3022 = vmatpush1.msra.mxu0 %v8699_v30  ;;  %5791 = vmatpush3.msra.mxu1 %v8927_v40  ;;  %v11800_v30 = vld [vmem:[#allocation65_spill] sm:$0xff]  ;;  %v11822_v40 = vld [vmem:[#allocation28_spill] sm:$0xff] }
 0x7af   :  { %3023 = vmatprep.subr.mxu0 %v8705_v2  ;;  %5792 = vmatprep.subr.mxu1 %v11489_v44  ;;  %v11801_v2 = vld [vmem:[#allocation67_spill] sm:$0xff] }
 0x7b0   :  { %3024 = vmatpush1.msra.mxu0 %v8711_v10  ;;  %5793 = vmatpush3.msra.mxu1 %v8934_v41  ;;  %v11802_v10 = vld [vmem:[#allocation2_spill] sm:$0xff] }
 0x7b1   :  { %3025 = vmatprep.subr.mxu0 %v8717_v45  ;;  %5794 = vmatprep.subr.mxu1 %v11489_v44  ;;  %v11803_v45 = vld [vmem:[#allocation7_spill] sm:$0xff]  ;;  %v11823_v41 = vld [vmem:[#allocation30_spill] sm:$0xff] }
 0x7b2   :  { %3026 = vmatpush1.msra.mxu0 %v8723_v31  ;;  %5795 = vmatpush3.msra.mxu1 %v8941_v42  ;;  %v11804_v31 = vld [vmem:[#allocation8_spill] sm:$0xff]  ;;  %v11824_v42 = vld [vmem:[#allocation31_spill] sm:$0xff] }
 0x7b3   :  { %3027 = vmatprep.subr.mxu0 %v8729_v48  ;;  %5796 = vmatprep.subr.mxu1 %v11489_v44  ;;  %v11805_v48 = vld [vmem:[#allocation10_spill] sm:$0xff] }
 0x7b4   :  { %3028 = vmatpush1.msra.mxu0 %v8735_v29  ;;  %5797 = vmatpush3.msra.mxu1 %v8948_v43  ;;  %v11806_v29 = vld [vmem:[#allocation9_spill] sm:$0xff] }
 0x7b5   :  { %3029 = vmatprep.subr.mxu0 %v8741_v37  ;;  %5798 = vmatprep.subr.mxu1 %v11489_v44  ;;  %v11807_v37 = vld [vmem:[#allocation11_spill] sm:$0xff]  ;;  %v11825_v43 = vld [vmem:[#allocation33_spill] sm:$0xff] }
 0x7b6   :  { %3030 = vmatpush1.msra.mxu0 %v8747_v4  ;;  %5799 = vmatpush3.msra.mxu1 %v8955_v21  ;;  %v11808_v4 = vld [vmem:[#allocation13_spill] sm:$0xff]  ;;  %v11826_v21 = vld [vmem:[#allocation23_spill] sm:$0xff] }
 0x7b7   :  { %3031 = vmatprep.subr.mxu0 %v8753_v3  ;;  %5800 = vmatprep.subr.mxu1 %v11489_v44  ;;  %v11809_v3 = vld [vmem:[#allocation12_spill] sm:$0xff] }
 0x7b8   :  { %3032 = vmatpush1.msra.mxu0 %v8759_v33  ;;  %5801 = vmatpush3.msra.mxu1 %v8962_v9  ;;  %v11810_v33 = vld [vmem:[#allocation14_spill] sm:$0xff] }
 0x7b9   :  { %3033 = vmatprep.subr.mxu0 %v8765_v50  ;;  %5802 = vmatprep.subr.mxu1 %v11489_v44  ;;  %v11811_v50 = vld [vmem:[#allocation15_spill] sm:$0xff]  ;;  %v11827_v9 = vld [vmem:[#allocation26_spill] sm:$0xff] }
 0x7ba   :  { %3034 = vmatpush1.msra.mxu0 %v8771_v62  ;;  %5803 = vmatpush3.msra.mxu1 %v8969_v38  ;;  %v11812_v62 = vld [vmem:[#allocation16_spill] sm:$0xff]  ;;  %v11828_v38 = vld [vmem:[#allocation29_spill] sm:$0xff] }
 0x7bb   :  { %3035 = vmatprep.subr.mxu0 %v8777_v52  ;;  %5804 = vmatprep.subr.mxu1 %v11489_v44  ;;  %v11813_v52 = vld [vmem:[#allocation17_spill] sm:$0xff] }
 0x7bc   :  { %3036 = vmatpush1.msra.mxu0 %v8783_v53  ;;  %5805 = vmatpush3.msra.mxu1 %v11785_v25  ;;  %v11814_v53 = vld [vmem:[#allocation18_spill] sm:$0xff]  ;;  %v11829_v25 = vld [vmem:[#allocation32_spill] sm:$0xff] }
 0x7bd   :  { %3037 = vmatprep.subr.mxu0 %v11786_v0  ;;  %5806 = vmatprep.subr.mxu1 %v11489_v44  ;;  %v11830_v0 = vld [vmem:[#allocation34_spill] sm:$0xff] }
 0x7be   :  { %3038 = vmatpush1.msra.mxu0 %v11787_v26  ;;  %3071 = vmatprep.mubr.f32.mxu0 %v11489_v44  ;;  %v11831_v26 = vld [vmem:[#allocation68_spill] sm:$0xff] }
 0x7bf   :  { %5807 = vmatpush3.msra.mxu1 %v11788_v61  ;;  %5808 = vmatprep.mubr.msk.f32.mxu1 %vm6420_vm2, %v11489_v44  ;;  %v11832_v61 = vld [vmem:[#allocation69_spill] sm:$0xff] }
 0x7c0   :  { %3072 = vmatmul.mubr.f32.vlgmr.msra.gmra.mxu0 %v9321_v16  ;;  %5809 = vmatmul.mubr.f32.vlgmr.msra.gmra.mxu1 %v9321_v16 }
 0x7c1   :  { %3170 = vmatprep.subr.mxu0 %v11789_v18  ;;  %5811 = vmatprep.subr.mxu1 %v11489_v44  ;;  %v11833_v18 = vld [vmem:[#allocation70_spill] sm:$0xff] }
 0x7c2   :  { %3171 = vmatpush1.msra.mxu0 %v11790_v15  ;;  %5812 = vmatpush3.msra.mxu1 %v11791_v24  ;;  %v11834_v15 = vld [vmem:[#allocation71_spill] sm:$0xff]  ;;  %v11835_v24 = vld [vmem:[#allocation72_spill] sm:$0xff] }
 0x7c3   :  { %3172 = vmatprep.subr.mxu0 %v11792_v8  ;;  %5813 = vmatprep.subr.mxu1 %v11489_v44  ;;  %v11836_v8 = vld [vmem:[#allocation73_spill] sm:$0xff] }
 0x7c4   :  { %3173 = vmatpush1.msra.mxu0 %v11793_v22  ;;  %5814 = vmatpush3.msra.mxu1 %v11794_v13  ;;  %v11837_v22 = vld [vmem:[#allocation74_spill] sm:$0xff] }
 0x7c5   :  { %3174 = vmatprep.subr.mxu0 %v11795_v63  ;;  %5815 = vmatprep.subr.mxu1 %v11489_v44 }
 0x7c6   :  { %3175 = vmatpush1.msra.mxu0 %v11796_v51  ;;  %5816 = vmatpush3.msra.mxu1 %v11797_v6 }
 0x7c7   :  { %3176 = vmatprep.subr.mxu0 %v11798_v11  ;;  %5817 = vmatprep.subr.mxu1 %v11489_v44  ;;  %v11838_v11 = vld [vmem:[#allocation3_spill] sm:$0xff] }
 0x7c8   :  { %3177 = vmatpush1.msra.mxu0 %v11799_v60  ;;  %5818 = vmatpush3.msra.mxu1 %v11800_v30 }
 0x7c9   :  { %3178 = vmatprep.subr.mxu0 %v11801_v2  ;;  %5819 = vmatprep.subr.mxu1 %v11489_v44 }
 0x7ca   :  { %3179 = vmatpush1.msra.mxu0 %v11802_v10  ;;  %5820 = vmatpush3.msra.mxu1 %v11803_v45 }
 0x7cb   :  { %3180 = vmatprep.subr.mxu0 %v11804_v31  ;;  %5821 = vmatprep.subr.mxu1 %v11489_v44 }
 0x7cc   :  { %3181 = vmatpush1.msra.mxu0 %v11805_v48  ;;  %5822 = vmatpush3.msra.mxu1 %v11806_v29 }
 0x7cd   :  { %3182 = vmatprep.subr.mxu0 %v11807_v37  ;;  %5823 = vmatprep.subr.mxu1 %v11489_v44 }
 0x7ce   :  { %3183 = vmatpush1.msra.mxu0 %v11808_v4  ;;  %5824 = vmatpush3.msra.mxu1 %v11809_v3  ;;  %v11839_v4 = vld [vmem:[#allocation4_spill] sm:$0xff] }
 0x7cf   :  { %3184 = vmatprep.subr.mxu0 %v11810_v33  ;;  %5825 = vmatprep.subr.mxu1 %v11489_v44  ;;  %v11840_v3 = vld [vmem:[#allocation44_spill] sm:$0xff] }
 0x7d0   :  { %3185 = vmatpush1.msra.mxu0 %v11811_v50  ;;  %5826 = vmatpush3.msra.mxu1 %v11812_v62  ;;  %v235_v33 = vadd.f32 %v11840_v3, %v11839_v4  ;;  %v9771_v50 = vld [vmem:[%s11191_s8] ss:$0 sm:$0xff]  ;;  %v11856_v3 = vld [vmem:[#allocation35_spill] sm:$0xff] }
 0x7d1   :  { %3186 = vmatprep.subr.mxu0 %v11813_v52  ;;  %5827 = vmatprep.subr.mxu1 %v11489_v44 }
 0x7d2   :  { %3187 = vmatpush1.msra.mxu0 %v11814_v53  ;;  %5828 = vmatpush3.msra.mxu1 %v11815_v27 }
 0x7d3   :  { %3188 = vmatprep.subr.mxu0 %v11816_v57  ;;  %5829 = vmatprep.subr.mxu1 %v11489_v44  ;;  %v11841_v57 = vld [vmem:[#allocation50_spill] sm:$0xff] }
 0x7d4   :  { %3189 = vmatpush1.msra.mxu0 %v11817_v20  ;;  %5830 = vmatpush3.msra.mxu1 %v11818_v56 }
 0x7d5   :  { %3190 = vmatprep.subr.mxu0 %v11819_v47  ;;  %5831 = vmatprep.subr.mxu1 %v11489_v44 }
 0x7d6   :  { %3191 = vmatpush1.msra.mxu0 %v11820_v46  ;;  %5832 = vmatpush3.msra.mxu1 %v11821_v39 }
 0x7d7   :  { %3192 = vmatprep.subr.mxu0 %v11822_v40  ;;  %5833 = vmatprep.subr.mxu1 %v11489_v44 }
 0x7d8   :  { %3193 = vmatpush1.msra.mxu0 %v11823_v41  ;;  %5834 = vmatpush3.msra.mxu1 %v11824_v42  ;;  %v11842_v42 = vld [vmem:[#allocation5_spill] sm:$0xff] }
 0x7d9   :  { %3194 = vmatprep.subr.mxu0 %v11825_v43  ;;  %5835 = vmatprep.subr.mxu1 %v11489_v44  ;;  %v11843_v43 = vld [vmem:[#allocation45_spill] sm:$0xff] }
 0x7da   :  { %3195 = vmatpush1.msra.mxu0 %v11826_v21  ;;  %5836 = vmatpush3.msra.mxu1 %v11827_v9  ;;  %v237_v21 = vadd.f32 %v11843_v43, %v11842_v42  ;;  %v11869_v43 = vld [vmem:[#allocation92_spill] sm:$0xff] }
 0x7db   :  { %3196 = vmatprep.subr.mxu0 %v11828_v38  ;;  %5837 = vmatprep.subr.mxu1 %v11489_v44 }
 0x7dc   :  { %3197 = vmatpush1.msra.mxu0 %v11829_v25  ;;  %5838 = vmatpush3.msra.mxu1 %v11830_v0 }
 0x7dd   :  { %3198 = vmatprep.subr.mxu0 %v11831_v26  ;;  %5839 = vmatprep.subr.mxu1 %v11489_v44 }
 0x7de   :  { %3199 = vmatpush1.msra.mxu0 %v11832_v61  ;;  %5840 = vmatpush3.msra.mxu1 %v11833_v18 }
 0x7df   :  { %3200 = vmatprep.subr.mxu0 %v11834_v15  ;;  %5841 = vmatprep.subr.mxu1 %v11489_v44 }
 0x7e0   :  { %3201 = vmatpush1.msra.mxu0 %v11835_v24  ;;  %5842 = vmatpush3.msra.mxu1 %v11836_v8  ;;  %v11844_v24 = vld [vmem:[#allocation36_spill] sm:$0xff] }
 0x7e1   :  { %3234 = vmatprep.mubr.f32.mxu0 %v11489_v44  ;;  %5843 = vmatprep.mubr.msk.f32.mxu1 %vm6420_vm2, %v11489_v44  ;;  %v343_v8 = vadd.f32 %v11844_v24, %v6871_v5  ;;  %v11876_v24 = vld [vmem:[#allocation99_spill] sm:$0xff] }
 0x7e2   :  { %3311 = vmatprep.subr.mxu0 %v11837_v22  ;;  %5846 = vmatprep.subr.mxu1 %v11489_v44 }
 0x83d   :  { %v2792_v13 = vpop.f32.mrf.mxu1  ;;  %v2721_v51 = vpop.f32.mrf.mxu0 }
 0x83e   :  { %v2722_v60 = vadd.f32 %v2721_v51, %v11838_v11  ;;  %v2793_v20 = vadd.f32 %v2792_v13, %v11841_v57  ;;  %v11845_v13 = vld [vmem:[#allocation6_spill] sm:$0xff] }
 0x83f   :  { %v5740_v63 = vpop.f32.mrf.mxu1  ;;  %v2723_v6 = vpop.f32.mrf.mxu0 }
 0x840   :  { %v2724_v63 = vadd.f32 %v2723_v6, %v11845_v13 }
 0x85e   :  { %v2910_v30 = vpop.f32.mrf.mxu0  ;;  %v2981_v2 = vpop.f32.mrf.mxu1 }
 0x85f   :  { %v2985_v10 = vadd.f32 %v2910_v30, %v2722_v60  ;;  %v2999_v62 = vadd.f32 %v9771_v50, %v2981_v2 }
 0x860   :  { %v5775_v45 = vpop.f32.mrf.mxu1  ;;  %v2912_v37 = vpop.f32.mrf.mxu0 }
 0x861   :  { %v4772_v31 = vmul.f32 -1.442695, %v2985_v10  ;;  %v2992_v60 = vadd.f32 %v2912_v37, %v2724_v63  ;;  %v11855_v37 = vld [vmem:[#allocation40_spill] sm:$0xff] }
 0x863   :  { %6254 = vpow2.f32 %v4772_v31  ;;  %v4773_v30 = vmul.f32 -1.442695, %v2992_v60  ;;  %v9909_v60 = vld [vmem:[%s11186_s2 + $0x110] sm:$0xff] }
 0x870   :  { %v6255_v48 = vpop.eup %6254 }
 0x871   :  { %v2989_v29 = vadd.f32 1.0, %v6255_v48 }
 0x873   :  { %6256 = vrcp.f32 %v2989_v29  ;;  %v11854_v29 = vld [vmem:[#allocation38_spill] sm:$0xff] }
 0x880   :  { %v6257_v52 = vpop.eup %6256  ;;  %v3073_v53 = vpop.f32.mrf.mxu0 }
 0x881   :  { %v3144_v27 = vpop.f32.mrf.mxu1  ;;  %v3000_v56 = vmul.f32 %v6257_v52, %v2999_v62  ;;  %v3148_v47 = vadd.f32 %v3073_v53, %v235_v33  ;;  %v11857_v33 = vld [vmem:[#allocation42_spill] sm:$0xff]  ;;  %v11858_v62 = vld [vmem:[#allocation43_spill] sm:$0xff]  ;;  %v11859_v52 = vld [vmem:[#allocation37_spill] sm:$0xff] }
 0x882   :  { %v3075_v41 = vpop.f32.mrf.mxu0  ;;  %v3162_v18 = vadd.f32 %v9315_v58, %v3144_v27  ;;  %v11860_v53 = vld [vmem:[#allocation83_spill] sm:$0xff]  ;;  %v11861_v27 = vld [vmem:[#allocation84_spill] sm:$0xff] }
 0x883   :  { %v5810_v46 = vpop.f32.mrf.mxu1  ;;  %v3001_v39 = vadd.f32 %v3000_v56, %v2793_v20  ;;  %v4774_v40 = vmul.f32 -1.442695, %v3148_v47  ;;  %v3155_v9 = vadd.f32 %v3075_v41, %v237_v21  ;;  %v11862_v20 = vld [vmem:[#allocation85_spill] sm:$0xff]  ;;  %v11863_v56 = vld [vmem:[#allocation86_spill] sm:$0xff]  ;;  %v11864_v47 = vld [vmem:[#allocation87_spill] sm:$0xff] }
 0x884   :  { %v11865_v46 = vld [vmem:[#allocation88_spill] sm:$0xff]  ;;  %v11868_v41 = vld [vmem:[#allocation91_spill] sm:$0xff] }
 0x885   :  { %6258 = vpow2.f32 %v4774_v40  ;;  %v4775_v38 = vmul.f32 -1.442695, %v3155_v9  ;;  %v11867_v40 = vld [vmem:[#allocation90_spill] sm:$0xff]  ;;  %v11870_v9 = vld [vmem:[#allocation93_spill] sm:$0xff] }
 0x887   :  { %6260 = vpow2.f32 %v4775_v38  ;;  %v11871_v38 = vld [vmem:[#allocation94_spill] sm:$0xff] }
 0x892   :  { %v6259_v25 = vpop.eup %6258 }
 0x893   :  { %v3152_v0 = vadd.f32 1.0, %v6259_v25  ;;  %v11872_v25 = vld [vmem:[#allocation95_spill] sm:$0xff] }
 0x894   :  { %v6261_v26 = vpop.eup %6260 }
 0x895   :  { %6262 = vrcp.f32 %v3152_v0  ;;  %v3159_v61 = vadd.f32 1.0, %v6261_v26  ;;  %v11873_v26 = vld [vmem:[#allocation96_spill] sm:$0xff] }
 0x897   :  { %6264 = vrcp.f32 %v3159_v61  ;;  %v11874_v61 = vld [vmem:[#allocation97_spill] sm:$0xff] }
 0x8a2   :  { %v6263_v15 = vpop.eup %6262 }
 0x8a3   :  { %v3163_v22 = vmul.f32 %v6263_v15, %v3162_v18  ;;  %v11875_v18 = vld [vmem:[#allocation98_spill] sm:$0xff] }
 0x8a4   :  { %v6265_v2 = vpop.eup %6264 }
 0x8a5   :  { %v3164_v51 = vadd.f32 %v3163_v22, %v343_v8  ;;  %v3166_v10 = vsub.f32 1.0, %v6265_v2  ;;  %v3168_v48 = vmul.f32 %v6265_v2, %v9321_v16  ;;  %v11877_v8 = vld [vmem:[#allocation100_spill] sm:$0xff]  ;;  %v9921_v2 = vld [vmem:[%s11186_s2 + $0xf8] sm:$0xff] }
 0x8a7   :  { %6266 = vtanh.f32 %v3164_v51  ;;  %v9903_v51 = vld [vmem:[%s11186_s2 + $0x120] sm:$0xff] }
 0x8a8   :  { %6268 = vpow2.f32 %v4773_v30  ;;  %v9915_v30 = vld [vmem:[%s11186_s2 + $0x108] sm:$0xff] }
 0x8b4   :  { %v6267_v45 = vpop.eup %6266 }
 0x8b5   :  { %v3167_v31 = vmul.f32 %v6267_v45, %v3166_v10  ;;  %v6269_v6 = vpop.eup %6268  ;;  %v9927_v10 = vld [vmem:[%s11186_s2 + $0xf0] sm:$0xff]  ;;  %v9933_v45 = vld [vmem:[%s11186_s2 + $0xe0] sm:$0xff] }
 0x8b6   :  { %v2996_v16 = vadd.f32 1.0, %v6269_v6  ;;  %v9951_v6 = vld [vmem:[%s11186_s2 + $0xc0] sm:$0xff] }
 0x8b7   :  { %v9782_v58 = vadd.f32 %v3168_v48, %v3167_v31  ;;  %v9939_v31 = vld [vmem:[%s11186_s2 + $0xd8] sm:$0xff]  ;;  %v9945_v48 = vld [vmem:[%s11186_s2 + $0xc8] sm:$0xff] }
 0x8b8   :  { %6270 = vrcp.f32 %v2996_v16  ;;  %v9957_v16 = vld [vmem:[%s11186_s2 + $0xb0] sm:$0xff] }
 0x8b9   :  { %3235 = vmatmul.mubr.f32.vlgmr.msra.gmra.mxu0 %v9782_v58  ;;  %5844 = vmatmul.mubr.f32.vlgmr.msra.gmra.mxu1 %v9782_v58  ;;  %6272 = vtanh.f32 %v3001_v39  ;;  %v11866_v39 = vld [vmem:[#allocation89_spill] sm:$0xff] }
 0x8ba   :  { %3312 = vmatpush1.msra.mxu0 %v9326_v17  ;;  %5847 = vmatpush3.msra.mxu1 %v9331_v14  ;;  %v11846_v17 = vld [vmem:[#allocation75_spill] sm:$0xff]  ;;  %v11847_v14 = vld [vmem:[#allocation76_spill] sm:$0xff] }
 0x8bb   :  { %3313 = vmatprep.subr.mxu0 %v9336_v36  ;;  %5848 = vmatprep.subr.mxu1 %v11489_v44  ;;  %v11848_v36 = vld [vmem:[#allocation77_spill] sm:$0xff] }
 0x8bc   :  { %3314 = vmatpush1.msra.mxu0 %v9343_v23  ;;  %5849 = vmatpush3.msra.mxu1 %v9348_v35  ;;  %v11849_v23 = vld [vmem:[#allocation78_spill] sm:$0xff]  ;;  %v11850_v35 = vld [vmem:[#allocation79_spill] sm:$0xff] }
 0x8bd   :  { %3315 = vmatprep.subr.mxu0 %v9355_v49  ;;  %5850 = vmatprep.subr.mxu1 %v11489_v44  ;;  %v11851_v49 = vld [vmem:[#allocation80_spill] sm:$0xff] }
 0x8be   :  { %3316 = vmatpush1.msra.mxu0 %v9362_v1  ;;  %5851 = vmatpush3.msra.mxu1 %v9367_v32  ;;  %v11852_v1 = vld [vmem:[#allocation81_spill] sm:$0xff]  ;;  %v11853_v32 = vld [vmem:[#allocation82_spill] sm:$0xff] }
 0x8bf   :  { %3317 = vmatprep.subr.mxu0 %v11846_v17  ;;  %5852 = vmatprep.subr.mxu1 %v11489_v44  ;;  %v9963_v17 = vld [vmem:[%s11186_s2 + $0xa8] sm:$0xff] }
 0x8c0   :  { %3318 = vmatpush1.msra.mxu0 %v11847_v14  ;;  %5853 = vmatpush3.msra.mxu1 %v11848_v36  ;;  %v9969_v14 = vld [vmem:[%s11186_s2 + $0x98] sm:$0xff]  ;;  %v9975_v36 = vld [vmem:[%s11186_s2 + $0x90] sm:$0xff] }
 0x8c1   :  { %3319 = vmatprep.subr.mxu0 %v11849_v23  ;;  %5854 = vmatprep.subr.mxu1 %v11489_v44  ;;  %v9981_v23 = vld [vmem:[%s11186_s2 + $0x80] sm:$0xff] }
 0x8c2   :  { %3320 = vmatpush1.msra.mxu0 %v11850_v35  ;;  %5855 = vmatpush3.msra.mxu1 %v11851_v49  ;;  %v9987_v35 = vld [vmem:[%s11186_s2 + $0x78] sm:$0xff]  ;;  %v9993_v49 = vld [vmem:[%s11186_s2 + $0x68] sm:$0xff] }
 0x8c3   :  { %3321 = vmatprep.subr.mxu0 %v11852_v1  ;;  %5856 = vmatprep.subr.mxu1 %v11489_v44  ;;  %v9999_v1 = vld [vmem:[%s11186_s2 + $0x60] sm:$0xff] }
 0x8c4   :  { %3322 = vmatpush1.msra.mxu0 %v11853_v32  ;;  %5857 = vmatpush3.msra.mxu1 %v11854_v29  ;;  %v10005_v32 = vld [vmem:[%s11186_s2 + $0x50] sm:$0xff]  ;;  %v10011_v29 = vld [vmem:[%s11186_s2 + $0x48] sm:$0xff] }
 0x8c5   :  { %3323 = vmatprep.subr.mxu0 %v11855_v37  ;;  %5858 = vmatprep.subr.mxu1 %v11489_v44  ;;  %v6271_v21 = vpop.eup %6270  ;;  %v10017_v37 = vld [vmem:[%s11186_s2 + $0x38] sm:$0xff] }
 0x8c6   :  { %3324 = vmatpush1.msra.mxu0 %v11856_v3  ;;  %5859 = vmatpush3.msra.mxu1 %v11857_v33  ;;  %v6273_v0 = vpop.eup %6272  ;;  %v3003_v15 = vsub.f32 1.0, %v6271_v21  ;;  %v3005_v63 = vmul.f32 %v6271_v21, %v8871_v7  ;;  %v9862_v7 = vld [vmem:[%s11186_s2 + $0x168] sm:$0xff]  ;;  %v10023_v3 = vld [vmem:[%s11186_s2 + $0x30] sm:$0xff]  ;;  %v10029_v33 = vld [vmem:[%s11186_s2 + $0x20] sm:$0xff] }
 0x8c7   :  { %3325 = vmatprep.subr.mxu0 %v11858_v62  ;;  %5860 = vmatprep.subr.mxu1 %v11489_v44  ;;  %v10035_v62 = vld [vmem:[%s11186_s2 + $0x18] sm:$0xff]  ;;  %v3481_v21 = vld [vmem:[%s11192_s9 + $0x30] sm:$0xff] }
 0x8c8   :  { %3326 = vmatpush1.msra.mxu0 %v11859_v52  ;;  %5861 = vmatpush3.msra.mxu1 %v11860_v53  ;;  %v3004_v22 = vmul.f32 %v6273_v0, %v3003_v15  ;;  %v10041_v52 = vld [vmem:[%s11186_s2 + $0x8] sm:$0xff]  ;;  %v10047_v53 = vld [vmem:[%s11186_s2] sm:$0xff]  ;;  %v3477_v0 = vld [vmem:[%s11192_s9 + $0x10] sm:$0xff] }
 0x8c9   :  { %3327 = vmatprep.subr.mxu0 %v11861_v27  ;;  %5862 = vmatprep.subr.mxu1 %v11489_v44  ;;  %11878 = vst [vmem:[#allocation53_spill] sm:$0xff] %v10041_v52  ;;  %11879 = vst [vmem:[#allocation51_spill] sm:$0xff] %v10047_v53  ;;  %v3490_v27 = vld [vmem:[%s11192_s9 + $0x78] sm:$0xff] }
 0x8ca   :  { %3328 = vmatpush1.msra.mxu0 %v11862_v20  ;;  %5863 = vmatpush3.msra.mxu1 %v11863_v56  ;;  %v3489_v20 = vld [vmem:[%s11192_s9 + $0x70] sm:$0xff]  ;;  %v3488_v56 = vld [vmem:[%s11192_s9 + $0x68] sm:$0xff] }
 0x8cb   :  { %3329 = vmatprep.subr.mxu0 %v11864_v47  ;;  %5864 = vmatprep.subr.mxu1 %v11489_v44  ;;  %v3487_v47 = vld [vmem:[%s11192_s9 + $0x60] sm:$0xff] }
 0x8cc   :  { %3330 = vmatpush1.msra.mxu0 %v11865_v46  ;;  %5865 = vmatpush3.msra.mxu1 %v11866_v39  ;;  %v3486_v46 = vld [vmem:[%s11192_s9 + $0x58] sm:$0xff]  ;;  %v3485_v39 = vld [vmem:[%s11192_s9 + $0x50] sm:$0xff] }
 0x8cd   :  { %3331 = vmatprep.subr.mxu0 %v11867_v40  ;;  %5866 = vmatprep.subr.mxu1 %v11489_v44  ;;  %v3484_v40 = vld [vmem:[%s11192_s9 + $0x48] sm:$0xff] }
 0x8ce   :  { %3332 = vmatpush1.msra.mxu0 %v11868_v41  ;;  %5867 = vmatpush3.msra.mxu1 %v11869_v43  ;;  %v3483_v41 = vld [vmem:[%s11192_s9 + $0x40] sm:$0xff]  ;;  %v3482_v43 = vld [vmem:[%s11192_s9 + $0x38] sm:$0xff] }
 0x8cf   :  { %3333 = vmatprep.subr.mxu0 %v11870_v9  ;;  %5868 = vmatprep.subr.mxu1 %v11489_v44  ;;  %v3480_v9 = vld [vmem:[%s11192_s9 + $0x28] sm:$0xff] }
 0x8d0   :  { %3334 = vmatpush1.msra.mxu0 %v11871_v38  ;;  %5869 = vmatpush3.msra.mxu1 %v11872_v25  ;;  %v3479_v38 = vld [vmem:[%s11192_s9 + $0x20] sm:$0xff]  ;;  %v3478_v25 = vld [vmem:[%s11192_s9 + $0x18] sm:$0xff] }
 0x8d1   :  { %3335 = vmatprep.subr.mxu0 %v11873_v26  ;;  %5870 = vmatprep.subr.mxu1 %v11489_v44  ;;  %v3476_v26 = vld [vmem:[%s11192_s9 + $0x8] sm:$0xff] }
 0x8d2   :  { %3336 = vmatpush1.msra.mxu0 %v11874_v61  ;;  %5871 = vmatpush3.msra.mxu1 %v11875_v18  ;;  %v3475_v61 = vld [vmem:[%s11192_s9] sm:$0xff] }
 0x8d3   :  { %3337 = vmatprep.subr.mxu0 %v11876_v24  ;;  %5872 = vmatprep.subr.mxu1 %v11489_v44 }
 0x8d4   :  { %3338 = vmatpush1.msra.mxu0 %v9571_v54  ;;  %5873 = vmatpush3.msra.mxu1 %v11877_v8  ;;  %v9849_v54 = vadd.f32 %v3005_v63, %v3004_v22 }
 0x8d5   :  { %3339 = vmatprep.subr.mxu0 %v9583_v34  ;;  %5874 = vmatprep.subr.mxu1 %v11489_v44  ;;  %v9854_v34 = vld [vmem:[%s11186_s2 + $0x170] sm:$0xff] }
 0x8d6   :  { %3340 = vmatpush1.msra.mxu0 %v9590_v12  ;;  %5875 = vmatpush3.msra.mxu1 %v9595_v19  ;;  %v9882_v12 = vld [vmem:[%s11186_s2 + $0x140] sm:$0xff]  ;;  %v9889_v19 = vld [vmem:[%s11186_s2 + $0x138] sm:$0xff] }
 0x8d7   :  { %3341 = vmatprep.subr.mxu0 %v9602_v28  ;;  %5876 = vmatprep.subr.mxu1 %v11489_v44  ;;  %v9897_v28 = vld [vmem:[%s11186_s2 + $0x128] sm:$0xff] }
 0x8d8   :  { %3342 = vmatpush1.msra.mxu0 %v9609_v55  ;;  %3375 = vmatprep.mubr.f32.mxu0 %v11489_v44  ;;  %v9869_v55 = vld [vmem:[%s11186_s2 + $0x158] sm:$0xff] }
 0x8d9   :  { %5877 = vmatpush3.msra.mxu1 %v9616_v59  ;;  %5878 = vmatprep.mubr.msk.f32.mxu1 %vm6420_vm2, %v11489_v44  ;;  %v9875_v59 = vld [vmem:[%s11186_s2 + $0x150] sm:$0xff] }
 0x8da   :  { %3376 = vmatmul.mubr.f32.vlgmr.msra.gmra.mxu0 %v9849_v54  ;;  %5879 = vmatmul.mubr.f32.vlgmr.msra.gmra.mxu1 %v9849_v54 }
 0x8db   :  { %3610 = vmatprep.subr.mxu1 %v9854_v34  ;;  %3674 = vmatprep.mubr.f32.mxu1 %v11489_v44 }
 0x8dc   :  { %3611 = vmatpush1.msra.mxu1 %v9862_v7  ;;  %5881 = vmatprep.subr.mxu0 %v11489_v44 }
 0x8dd   :  { %3612 = vmatprep.subr.mxu1 %v9869_v55  ;;  %5913 = vmatprep.mubr.msk.f32.mxu0 %vm6420_vm2, %v11489_v44 }
 0x8de   :  { %3613 = vmatpush1.msra.mxu1 %v9875_v59  ;;  %5882 = vmatpush3.msra.mxu0 %v3490_v27 }
 0x8df   :  { %3614 = vmatprep.subr.mxu1 %v9882_v12  ;;  %5883 = vmatprep.subr.mxu0 %v11489_v44 }
 0x8e0   :  { %3615 = vmatpush1.msra.mxu1 %v9889_v19  ;;  %5884 = vmatpush3.msra.mxu0 %v3489_v20 }
 0x8e1   :  { %3616 = vmatprep.subr.mxu1 %v9897_v28  ;;  %5885 = vmatprep.subr.mxu0 %v11489_v44 }
 0x8e2   :  { %3617 = vmatpush1.msra.mxu1 %v9903_v51  ;;  %5886 = vmatpush3.msra.mxu0 %v3488_v56 }
 0x8e3   :  { %3618 = vmatprep.subr.mxu1 %v9909_v60  ;;  %5887 = vmatprep.subr.mxu0 %v11489_v44 }
 0x8e4   :  { %3619 = vmatpush1.msra.mxu1 %v9915_v30  ;;  %5888 = vmatpush3.msra.mxu0 %v3487_v47 }
 0x8e5   :  { %3620 = vmatprep.subr.mxu1 %v9921_v2  ;;  %5889 = vmatprep.subr.mxu0 %v11489_v44 }
 0x8e6   :  { %3621 = vmatpush1.msra.mxu1 %v9927_v10  ;;  %5890 = vmatpush3.msra.mxu0 %v3486_v46 }
 0x8e7   :  { %3622 = vmatprep.subr.mxu1 %v9933_v45  ;;  %5891 = vmatprep.subr.mxu0 %v11489_v44 }
 0x8e8   :  { %3623 = vmatpush1.msra.mxu1 %v9939_v31  ;;  %5892 = vmatpush3.msra.mxu0 %v3485_v39 }
 0x8e9   :  { %3624 = vmatprep.subr.mxu1 %v9945_v48  ;;  %5893 = vmatprep.subr.mxu0 %v11489_v44 }
 0x8ea   :  { %3625 = vmatpush1.msra.mxu1 %v9951_v6  ;;  %5894 = vmatpush3.msra.mxu0 %v3484_v40 }
 0x8eb   :  { %3626 = vmatprep.subr.mxu1 %v9957_v16  ;;  %5895 = vmatprep.subr.mxu0 %v11489_v44 }
 0x8ec   :  { %3627 = vmatpush1.msra.mxu1 %v9963_v17  ;;  %5896 = vmatpush3.msra.mxu0 %v3483_v41 }
 0x8ed   :  { %3628 = vmatprep.subr.mxu1 %v9969_v14  ;;  %5897 = vmatprep.subr.mxu0 %v11489_v44 }
 0x8ee   :  { %3629 = vmatpush1.msra.mxu1 %v9975_v36  ;;  %5898 = vmatpush3.msra.mxu0 %v3482_v43 }
 0x8ef   :  { %3630 = vmatprep.subr.mxu1 %v9981_v23  ;;  %5899 = vmatprep.subr.mxu0 %v11489_v44 }
 0x8f0   :  { %3631 = vmatpush1.msra.mxu1 %v9987_v35  ;;  %5900 = vmatpush3.msra.mxu0 %v3481_v21 }
 0x8f1   :  { %3632 = vmatprep.subr.mxu1 %v9993_v49  ;;  %5901 = vmatprep.subr.mxu0 %v11489_v44 }
 0x8f2   :  { %3633 = vmatpush1.msra.mxu1 %v9999_v1  ;;  %5902 = vmatpush3.msra.mxu0 %v3480_v9 }
 0x8f3   :  { %3634 = vmatprep.subr.mxu1 %v10005_v32  ;;  %5903 = vmatprep.subr.mxu0 %v11489_v44 }
 0x8f4   :  { %3635 = vmatpush1.msra.mxu1 %v10011_v29  ;;  %5904 = vmatpush3.msra.mxu0 %v3479_v38 }
 0x8f5   :  { %3636 = vmatprep.subr.mxu1 %v10017_v37  ;;  %5905 = vmatprep.subr.mxu0 %v11489_v44 }
 0x8f6   :  { %3637 = vmatpush1.msra.mxu1 %v10023_v3  ;;  %5906 = vmatpush3.msra.mxu0 %v3478_v25 }
 0x8f7   :  { %3638 = vmatprep.subr.mxu1 %v10029_v33  ;;  %5907 = vmatprep.subr.mxu0 %v11489_v44 }
 0x8f8   :  { %3639 = vmatpush1.msra.mxu1 %v10035_v62  ;;  %5908 = vmatpush3.msra.mxu0 %v3477_v0 }
 0x8f9   :  { %3640 = vmatprep.subr.mxu1 %v10041_v52  ;;  %5909 = vmatprep.subr.mxu0 %v11489_v44 }
 0x8fa   :  { %3641 = vmatpush1.msra.mxu1 %v10047_v53  ;;  %5910 = vmatpush3.msra.mxu0 %v3476_v26 }
 0x8fb   :  { %3675 = vmatmul.mubr.f32.vlgmr.msra.gmra.mxu1 %v9782_v58  ;;  %5911 = vmatprep.subr.mxu0 %v11489_v44 }
 0x8fc   :  { %3885 = vmatprep.mubr.f32.mxu1 %v11489_v44  ;;  %5912 = vmatpush3.msra.mxu0 %v3475_v61 }
 0x8fd   :  { %5916 = vmatprep.subr.mxu0 %v11489_v44 }
 0x979   :  { %v3307_v18 = vpop.f32.mrf.mxu1  ;;  %v3236_v24 = vpop.f32.mrf.mxu0 }
 0x97a   :  { %v3237_v22 = vadd.f32 %v3236_v24, %v11838_v11  ;;  %v3308_v26 = vadd.f32 %v3307_v18, %v11841_v57  ;;  %v10135_v18 = vld [vmem:[%s11186_s2 + $0x160] sm:$0xff]  ;;  %v10293_v57 = vld [vmem:[%s11185_s5 + $0x138] sm:$0xff]  ;;  %v10300_v11 = vld [vmem:[%s11185_s5 + $0x128] sm:$0xff] }
 0x97b   :  { %v5845_v15 = vpop.f32.mrf.mxu1  ;;  %v3238_v8 = vpop.f32.mrf.mxu0  ;;  %11890 = vst [vmem:[#allocation62_spill] sm:$0xff] %v10293_v57  ;;  %11891 = vst [vmem:[#allocation64_spill] sm:$0xff] %v10300_v11 }
 0x97c   :  { %v3239_v39 = vadd.f32 %v3238_v8, %v11845_v13  ;;  %v10286_v13 = vld [vmem:[%s11185_s5 + $0x148] sm:$0xff] }
 0x97d   :  { %11889 = vst [vmem:[#allocation63_spill] sm:$0xff] %v10286_v13 }
 0x99a   :  { %v3377_v63 = vpop.f32.mrf.mxu0  ;;  %v3448_v27 = vpop.f32.mrf.mxu1 }
 0x99b   :  { %v3452_v20 = vadd.f32 %v3377_v63, %v3237_v22  ;;  %v3466_v25 = vadd.f32 %v9771_v50, %v3448_v27  ;;  %v10130_v50 = vld [vmem:[%s11186_s2 + $0x178] sm:$0xff]  ;;  %v10151_v27 = vld [vmem:[%s11186_s2 + $0x130] sm:$0xff] }
 0x99c   :  { %v5880_v56 = vpop.f32.mrf.mxu1  ;;  %v3379_v46 = vpop.f32.mrf.mxu0 }
 0x99d   :  { %v4776_v47 = vmul.f32 -1.442695, %v3452_v20  ;;  %v3459_v40 = vadd.f32 %v3379_v46, %v3239_v39  ;;  %v10158_v46 = vld [vmem:[%s11186_s2 + $0x118] sm:$0xff]  ;;  %v10165_v39 = vld [vmem:[%s11186_s2 + $0x100] sm:$0xff] }
 0x99f   :  { %6274 = vpow2.f32 %v4776_v47  ;;  %v4777_v41 = vmul.f32 -1.442695, %v3459_v40  ;;  %v10172_v40 = vld [vmem:[%s11186_s2 + $0xe8] sm:$0xff] }
 0x9a1   :  { %6276 = vpow2.f32 %v4777_v41  ;;  %v10179_v41 = vld [vmem:[%s11186_s2 + $0xd0] sm:$0xff] }
 0x9ac   :  { %v6275_v43 = vpop.eup %6274 }
 0x9ad   :  { %v3456_v21 = vadd.f32 1.0, %v6275_v43  ;;  %v10186_v43 = vld [vmem:[%s11186_s2 + $0xb8] sm:$0xff] }
 0x9ae   :  { %v6277_v9 = vpop.eup %6276 }
 0x9af   :  { %6278 = vrcp.f32 %v3456_v21  ;;  %v3463_v38 = vadd.f32 1.0, %v6277_v9  ;;  %v10193_v21 = vld [vmem:[%s11186_s2 + $0xa0] sm:$0xff]  ;;  %v10200_v9 = vld [vmem:[%s11186_s2 + $0x88] sm:$0xff] }
 0x9b1   :  { %6280 = vrcp.f32 %v3463_v38  ;;  %v10207_v38 = vld [vmem:[%s11186_s2 + $0x70] sm:$0xff] }
 0x9bc   :  { %v6279_v0 = vpop.eup %6278 }
 0x9bd   :  { %v3467_v61 = vmul.f32 %v6279_v0, %v3466_v25  ;;  %v10214_v25 = vld [vmem:[%s11186_s2 + $0x58] sm:$0xff]  ;;  %v10221_v0 = vld [vmem:[%s11186_s2 + $0x40] sm:$0xff] }
 0x9be   :  { %v6281_v24 = vpop.eup %6280 }
 0x9bf   :  { %v3468_v15 = vadd.f32 %v3467_v61, %v3308_v26  ;;  %v3470_v8 = vsub.f32 1.0, %v6281_v24  ;;  %v3472_v20 = vmul.f32 %v6281_v24, %v9849_v54  ;;  %v10228_v26 = vld [vmem:[%s11186_s2 + $0x28] sm:$0xff]  ;;  %v10235_v61 = vld [vmem:[%s11186_s2 + $0x10] sm:$0xff] }
 0x9c0   :  { %11880 = vst [vmem:[#allocation52_spill] sm:$0xff] %v10228_v26  ;;  %11881 = vst [vmem:[#allocation54_spill] sm:$0xff] %v10235_v61  ;;  %v10252_v24 = vld [vmem:[%s11185_s5 + $0x168] sm:$0xff] }
 0x9c1   :  { %6282 = vtanh.f32 %v3468_v15  ;;  %v10247_v15 = vld [vmem:[%s11185_s5 + $0x170] sm:$0xff]  ;;  %11883 = vst [vmem:[#allocation56_spill] sm:$0xff] %v10252_v24 }
 0x9c2   :  { %11882 = vst [vmem:[#allocation55_spill] sm:$0xff] %v10247_v15  ;;  %3821 = vmatprep.subr.mxu1 %v10247_v15 }
 0x9c3   :  { %3822 = vmatpush1.msra.mxu1 %v10252_v24 }
 0x9ce   :  { %v6283_v22 = vpop.eup %6282 }
 0x9cf   :  { %v3471_v63 = vmul.f32 %v6283_v22, %v3470_v8  ;;  %v10257_v8 = vld [vmem:[%s11185_s5 + $0x178] sm:$0xff] }
 0x9d0   :  { %11884 = vst [vmem:[#allocation57_spill] sm:$0xff] %v10257_v8  ;;  %v10264_v22 = vld [vmem:[%s11185_s5 + $0x158] sm:$0xff] }
 0x9d1   :  { %v10123_v56 = vadd.f32 %v3472_v20, %v3471_v63  ;;  %11885 = vst [vmem:[#allocation58_spill] sm:$0xff] %v10264_v22  ;;  %v10269_v63 = vld [vmem:[%s11185_s5 + $0x150] sm:$0xff]  ;;  %v10274_v20 = vld [vmem:[%s11185_s5 + $0x160] sm:$0xff]  ;;  %3823 = vmatprep.subr.mxu1 %v10264_v22 }
 0x9d2   :  { %11886 = vst [vmem:[#allocation59_spill] sm:$0xff] %v10269_v63  ;;  %11887 = vst [vmem:[#allocation60_spill] sm:$0xff] %v10274_v20  ;;  %3824 = vmatpush1.msra.mxu1 %v10269_v63  ;;  %v10305_v22 = vld [vmem:[%s11185_s5 + $0x130] sm:$0xff]  ;;  %v10439_v63 = vld [vmem:[%s11185_s5 + $0x78] sm:$0xff] }
 0x9d3   :  { %v3474_v47 = vmax.f32 %v9849_v54, %v10123_v56  ;;  %v10144_v54 = vld [vmem:[%s11186_s2 + $0x148] sm:$0xff]  ;;  %11892 = vst [vmem:[#allocation66_spill] sm:$0xff] %v10305_v22  ;;  %11913 = vst [vmem:[#allocation25_spill] sm:$0xff] %v10439_v63 }
 0x9d5   :  { %5914 = vmatmul.mubr.f32.vlgmr.msra.gmra.mxu0 %v3474_v47  ;;  %v10281_v47 = vld [vmem:[%s11185_s5 + $0x140] sm:$0xff] }
 0x9d6   :  { %5917 = vmatpush3.msra.mxu0 %v10130_v50  ;;  %5948 = vmatprep.mubr.msk.f32.mxu0 %vm6420_vm2, %v11489_v44  ;;  %11888 = vst [vmem:[#allocation61_spill] sm:$0xff] %v10281_v47 }
 0x9d7   :  { %5918 = vmatprep.subr.mxu0 %v11489_v44  ;;  %3825 = vmatprep.subr.mxu1 %v10281_v47  ;;  %v10425_v47 = vld [vmem:[%s11185_s5 + $0xa0] sm:$0xff] }
 0x9d8   :  { %5919 = vmatpush3.msra.mxu0 %v10135_v18  ;;  %3826 = vmatpush1.msra.mxu1 %v10293_v57  ;;  %v10329_v57 = vld [vmem:[%s11185_s5 + $0x108] sm:$0xff]  ;;  %11911 = vst [vmem:[#allocation22_spill] sm:$0xff] %v10425_v47 }
 0x9d9   :  { %5920 = vmatprep.subr.mxu0 %v11489_v44  ;;  %3827 = vmatprep.subr.mxu1 %v10300_v11  ;;  %11895 = vst [vmem:[#allocation2_spill] sm:$0xff] %v10329_v57  ;;  %v10408_v11 = vld [vmem:[%s11185_s5 + $0xb8] sm:$0xff] }
 0x9da   :  { %5921 = vmatpush3.msra.mxu0 %v10144_v54  ;;  %11908 = vst [vmem:[#allocation19_spill] sm:$0xff] %v10408_v11 }
 0x9db   :  { %5922 = vmatprep.subr.mxu0 %v11489_v44 }
 0x9dc   :  { %5923 = vmatpush3.msra.mxu0 %v10151_v27 }
 0x9dd   :  { %5924 = vmatprep.subr.mxu0 %v11489_v44 }
 0x9de   :  { %5925 = vmatpush3.msra.mxu0 %v10158_v46 }
 0x9df   :  { %5926 = vmatprep.subr.mxu0 %v11489_v44 }
 0x9e0   :  { %5927 = vmatpush3.msra.mxu0 %v10165_v39 }
 0x9e1   :  { %5928 = vmatprep.subr.mxu0 %v11489_v44 }
 0x9e2   :  { %5929 = vmatpush3.msra.mxu0 %v10172_v40 }
 0x9e3   :  { %5930 = vmatprep.subr.mxu0 %v11489_v44 }
 0x9e4   :  { %5931 = vmatpush3.msra.mxu0 %v10179_v41 }
 0x9e5   :  { %5932 = vmatprep.subr.mxu0 %v11489_v44 }
 0x9e6   :  { %5933 = vmatpush3.msra.mxu0 %v10186_v43 }
 0x9e7   :  { %5934 = vmatprep.subr.mxu0 %v11489_v44 }
 0x9e8   :  { %5935 = vmatpush3.msra.mxu0 %v10193_v21 }
 0x9e9   :  { %5936 = vmatprep.subr.mxu0 %v11489_v44 }
 0x9ea   :  { %5937 = vmatpush3.msra.mxu0 %v10200_v9 }
 0x9eb   :  { %5938 = vmatprep.subr.mxu0 %v11489_v44 }
 0x9ec   :  { %5939 = vmatpush3.msra.mxu0 %v10207_v38 }
 0x9ed   :  { %5940 = vmatprep.subr.mxu0 %v11489_v44 }
 0x9ee   :  { %5941 = vmatpush3.msra.mxu0 %v10214_v25 }
 0x9ef   :  { %5942 = vmatprep.subr.mxu0 %v11489_v44 }
 0x9f0   :  { %5943 = vmatpush3.msra.mxu0 %v10221_v0 }
 0x9f1   :  { %5944 = vmatprep.subr.mxu0 %v11489_v44 }
 0x9f2   :  { %5945 = vmatpush3.msra.mxu0 %v10228_v26 }
 0x9f3   :  { %5946 = vmatprep.subr.mxu0 %v11489_v44 }
 0x9f4   :  { %5947 = vmatpush3.msra.mxu0 %v10235_v61  ;;  %v11933_v61 = vld [vmem:[#allocation47_spill] sm:$0xff] }
 0x9f5   :  { %5949 = vmatmul.mubr.f32.vlgmr.msra.gmra.mxu0 %v9782_v58  ;;  %5951 = vmatprep.subr.mxu0 %v11489_v44 }
 0x9f6   :  { %5983 = vmatprep.mubr.msk.f32.mxu0 %vm6420_vm2, %v11489_v44  ;;  %5952 = vmatpush3.msra.mxu0 %v10257_v8 }
 0x9f7   :  { %5953 = vmatprep.subr.mxu0 %v11489_v44 }
 0x9f8   :  { %5954 = vmatpush3.msra.mxu0 %v10274_v20  ;;  %v10312_v20 = vld [vmem:[%s11185_s5 + $0x120] sm:$0xff] }
 0x9f9   :  { %5955 = vmatprep.subr.mxu0 %v11489_v44  ;;  %11893 = vst [vmem:[#allocation65_spill] sm:$0xff] %v10312_v20  ;;  %3828 = vmatpush1.msra.mxu1 %v10312_v20  ;;  %v10341_v20 = vld [vmem:[%s11185_s5 + $0xf8] sm:$0xff] }
 0x9fa   :  { %5956 = vmatpush3.msra.mxu0 %v10286_v13  ;;  %v10323_v13 = vld [vmem:[%s11185_s5 + $0x110] sm:$0xff]  ;;  %11897 = vst [vmem:[#allocation8_spill] sm:$0xff] %v10341_v20 }
 0x9fb   :  { %5957 = vmatprep.subr.mxu0 %v11489_v44  ;;  %11894 = vst [vmem:[#allocation67_spill] sm:$0xff] %v10323_v13  ;;  %3829 = vmatprep.subr.mxu1 %v10323_v13  ;;  %v10348_v13 = vld [vmem:[%s11185_s5 + $0xf0] sm:$0xff] }
 0x9fc   :  { %5958 = vmatpush3.msra.mxu0 %v10305_v22  ;;  %v10334_v22 = vld [vmem:[%s11185_s5 + $0x118] sm:$0xff]  ;;  %3830 = vmatpush1.msra.mxu1 %v10329_v57  ;;  %11898 = vst [vmem:[#allocation10_spill] sm:$0xff] %v10348_v13  ;;  %v10353_v57 = vld [vmem:[%s11185_s5 + $0x100] sm:$0xff] }
 0x9fd   :  { %5959 = vmatprep.subr.mxu0 %v11489_v44  ;;  %11896 = vst [vmem:[#allocation7_spill] sm:$0xff] %v10334_v22  ;;  %3831 = vmatprep.subr.mxu1 %v10341_v20  ;;  %11899 = vst [vmem:[#allocation9_spill] sm:$0xff] %v10353_v57  ;;  %v10360_v20 = vld [vmem:[%s11185_s5 + $0xe0] sm:$0xff] }
 0x9fe   :  { %5960 = vmatpush3.msra.mxu0 %v10334_v22  ;;  %3832 = vmatpush1.msra.mxu1 %v10348_v13  ;;  %11900 = vst [vmem:[#allocation11_spill] sm:$0xff] %v10360_v20  ;;  %v10367_v22 = vld [vmem:[%s11185_s5 + $0xd8] sm:$0xff]  ;;  %v10372_v13 = vld [vmem:[%s11185_s5 + $0xe8] sm:$0xff] }
 0x9ff   :  { %5961 = vmatprep.subr.mxu0 %v11489_v44  ;;  %3833 = vmatprep.subr.mxu1 %v10360_v20  ;;  %11901 = vst [vmem:[#allocation13_spill] sm:$0xff] %v10367_v22  ;;  %11902 = vst [vmem:[#allocation12_spill] sm:$0xff] %v10372_v13  ;;  %v10379_v20 = vld [vmem:[%s11185_s5 + $0xc8] sm:$0xff] }
 0xa00   :  { %5962 = vmatpush3.msra.mxu0 %v10353_v57  ;;  %3834 = vmatpush1.msra.mxu1 %v10367_v22  ;;  %11903 = vst [vmem:[#allocation14_spill] sm:$0xff] %v10379_v20  ;;  %v10386_v57 = vld [vmem:[%s11185_s5 + $0xc0] sm:$0xff]  ;;  %v10391_v22 = vld [vmem:[%s11185_s5 + $0xd0] sm:$0xff] }
 0xa01   :  { %5963 = vmatprep.subr.mxu0 %v11489_v44  ;;  %3835 = vmatprep.subr.mxu1 %v10379_v20  ;;  %11904 = vst [vmem:[#allocation15_spill] sm:$0xff] %v10386_v57  ;;  %11905 = vst [vmem:[#allocation16_spill] sm:$0xff] %v10391_v22  ;;  %v10398_v20 = vld [vmem:[%s11185_s5 + $0xb0] sm:$0xff] }
 0xa02   :  { %5964 = vmatpush3.msra.mxu0 %v10372_v13  ;;  %3836 = vmatpush1.msra.mxu1 %v10386_v57  ;;  %11906 = vst [vmem:[#allocation17_spill] sm:$0xff] %v10398_v20  ;;  %v10403_v13 = vld [vmem:[%s11185_s5 + $0xa8] sm:$0xff]  ;;  %v10420_v57 = vld [vmem:[%s11185_s5 + $0x90] sm:$0xff] }
 0xa03   :  { %5965 = vmatprep.subr.mxu0 %v11489_v44  ;;  %11907 = vst [vmem:[#allocation18_spill] sm:$0xff] %v10403_v13  ;;  %3837 = vmatprep.subr.mxu1 %v10398_v20  ;;  %11910 = vst [vmem:[#allocation21_spill] sm:$0xff] %v10420_v57  ;;  %v10432_v20 = vld [vmem:[%s11185_s5 + $0x80] sm:$0xff] }
 0xa04   :  { %5966 = vmatpush3.msra.mxu0 %v10391_v22  ;;  %v10415_v22 = vld [vmem:[%s11185_s5 + $0x98] sm:$0xff]  ;;  %3838 = vmatpush1.msra.mxu1 %v10403_v13  ;;  %11912 = vst [vmem:[#allocation24_spill] sm:$0xff] %v10432_v20  ;;  %v10444_v13 = vld [vmem:[%s11185_s5 + $0x88] sm:$0xff] }
 0xa05   :  { %5967 = vmatprep.subr.mxu0 %v11489_v44  ;;  %11909 = vst [vmem:[#allocation20_spill] sm:$0xff] %v10415_v22  ;;  %3839 = vmatprep.subr.mxu1 %v10415_v22  ;;  %11914 = vst [vmem:[#allocation27_spill] sm:$0xff] %v10444_v13  ;;  %v10451_v22 = vld [vmem:[%s11185_s5 + $0x68] sm:$0xff] }
 0xa06   :  { %5968 = vmatpush3.msra.mxu0 %v10408_v11  ;;  %3840 = vmatpush1.msra.mxu1 %v10420_v57  ;;  %11915 = vst [vmem:[#allocation28_spill] sm:$0xff] %v10451_v22  ;;  %v10458_v11 = vld [vmem:[%s11185_s5 + $0x60] sm:$0xff]  ;;  %v10463_v57 = vld [vmem:[%s11185_s5 + $0x70] sm:$0xff] }
 0xa07   :  { %5969 = vmatprep.subr.mxu0 %v11489_v44  ;;  %3841 = vmatprep.subr.mxu1 %v10432_v20  ;;  %11916 = vst [vmem:[#allocation30_spill] sm:$0xff] %v10458_v11  ;;  %11917 = vst [vmem:[#allocation31_spill] sm:$0xff] %v10463_v57  ;;  %v10470_v20 = vld [vmem:[%s11185_s5 + $0x50] sm:$0xff] }
 0xa08   :  { %5970 = vmatpush3.msra.mxu0 %v10425_v47  ;;  %3842 = vmatpush1.msra.mxu1 %v10439_v63  ;;  %11918 = vst [vmem:[#allocation33_spill] sm:$0xff] %v10470_v20  ;;  %v10477_v47 = vld [vmem:[%s11185_s5 + $0x48] sm:$0xff]  ;;  %v10482_v63 = vld [vmem:[%s11185_s5 + $0x58] sm:$0xff] }
 0xa09   :  { %5971 = vmatprep.subr.mxu0 %v11489_v44  ;;  %3843 = vmatprep.subr.mxu1 %v10451_v22  ;;  %11919 = vst [vmem:[#allocation23_spill] sm:$0xff] %v10477_v47  ;;  %11920 = vst [vmem:[#allocation26_spill] sm:$0xff] %v10482_v63  ;;  %v10489_v22 = vld [vmem:[%s11185_s5 + $0x38] sm:$0xff] }
 0xa0a   :  { %5972 = vmatpush3.msra.mxu0 %v10444_v13  ;;  %3844 = vmatpush1.msra.mxu1 %v10458_v11  ;;  %11921 = vst [vmem:[#allocation29_spill] sm:$0xff] %v10489_v22  ;;  %v10496_v13 = vld [vmem:[%s11185_s5 + $0x30] sm:$0xff]  ;;  %v10501_v11 = vld [vmem:[%s11185_s5 + $0x40] sm:$0xff] }
 0xa0b   :  { %5973 = vmatprep.subr.mxu0 %v11489_v44  ;;  %3845 = vmatprep.subr.mxu1 %v10470_v20  ;;  %11922 = vst [vmem:[#allocation32_spill] sm:$0xff] %v10496_v13  ;;  %11923 = vst [vmem:[#allocation34_spill] sm:$0xff] %v10501_v11  ;;  %v10508_v20 = vld [vmem:[%s11185_s5 + $0x20] sm:$0xff] }
 0xa0c   :  { %5974 = vmatpush3.msra.mxu0 %v10463_v57  ;;  %3846 = vmatpush1.msra.mxu1 %v10477_v47  ;;  %11924 = vst [vmem:[#allocation68_spill] sm:$0xff] %v10508_v20  ;;  %v10515_v57 = vld [vmem:[%s11185_s5 + $0x18] sm:$0xff]  ;;  %v10520_v47 = vld [vmem:[%s11185_s5 + $0x28] sm:$0xff] }
 0xa0d   :  { %5975 = vmatprep.subr.mxu0 %v11489_v44  ;;  %3847 = vmatprep.subr.mxu1 %v10489_v22  ;;  %11925 = vst [vmem:[#allocation69_spill] sm:$0xff] %v10515_v57  ;;  %11926 = vst [vmem:[#allocation70_spill] sm:$0xff] %v10520_v47  ;;  %v10527_v22 = vld [vmem:[%s11185_s5 + $0x8] sm:$0xff] }
 0xa0e   :  { %5976 = vmatpush3.msra.mxu0 %v10482_v63  ;;  %3848 = vmatpush1.msra.mxu1 %v10496_v13  ;;  %11927 = vst [vmem:[#allocation71_spill] sm:$0xff] %v10527_v22  ;;  %v10534_v63 = vld [vmem:[%s11185_s5] sm:$0xff]  ;;  %v10539_v13 = vld [vmem:[%s11185_s5 + $0x10] sm:$0xff] }
 0xa0f   :  { %5977 = vmatprep.subr.mxu0 %v11489_v44  ;;  %3849 = vmatprep.subr.mxu1 %v10508_v20  ;;  %11928 = vst [vmem:[#allocation72_spill] sm:$0xff] %v10534_v63  ;;  %11929 = vst [vmem:[#allocation73_spill] sm:$0xff] %v10539_v13  ;;  %v10546_v20 = vld [vmem:[%s11189_s6 + $0x170] sm:$0xff] }
 0xa10   :  { %5978 = vmatpush3.msra.mxu0 %v10501_v11  ;;  %3850 = vmatpush1.msra.mxu1 %v10515_v57  ;;  %11930 = vst [vmem:[#allocation74_spill] sm:$0xff] %v10546_v20  ;;  %v3676_v57 = vpop.f32.mrf.mxu1 }
 0xa11   :  { %5979 = vmatprep.subr.mxu0 %v11489_v44  ;;  %3851 = vmatprep.subr.mxu1 %v10527_v22  ;;  %v10559_v22 = vld [vmem:[%s11193_s10] ss:$0 sm:$0xff] }
 0xa12   :  { %5980 = vmatpush3.msra.mxu0 %v10520_v47  ;;  %3852 = vmatpush1.msra.mxu1 %v10534_v63  ;;  %v11931_v47 = vld [vmem:[#allocation46_spill] sm:$0xff]  ;;  %11932 = vst [vmem:[#allocation44_spill] sm:$0xff] %v10559_v22 }
 0xa13   :  { %5981 = vmatprep.subr.mxu0 %v11489_v44  ;;  %4010 = vmatprep.subr.mxu1 %v10546_v20  ;;  %v241_v11 = vadd.f32 %v11931_v47, %v11839_v4  ;;  %v3678_v20 = vpop.f32.mrf.mxu1  ;;  %v243_v47 = vadd.f32 %v11933_v61, %v11842_v42  ;;  %v11934_v61 = vld [vmem:[#allocation41_spill] sm:$0xff] }
 0xa14   :  { %5982 = vmatpush3.msra.mxu0 %v10539_v13 }
 0xa15   :  { %5986 = vmatprep.subr.mxu0 %v11489_v44  ;;  %v3751_v8 = vadd.f32 %v3676_v57, %v241_v11  ;;  %v3758_v11 = vadd.f32 %v3678_v20, %v243_v47  ;;  %v348_v20 = vadd.f32 %v11934_v61, %v6871_v5  ;;  %v10622_v61 = vld [vmem:[%s11189_s6 + $0x148] sm:$0xff] }
 0xa17   :  { %v4778_v24 = vmul.f32 -1.442695, %v3751_v8  ;;  %v4779_v57 = vmul.f32 -1.442695, %v3758_v11 }
 0xa19   :  { %6284 = vpow2.f32 %v4778_v24 }
 0xa1a   :  { %6286 = vpow2.f32 %v4779_v57 }
 0xa26   :  { %v6285_v8 = vpop.eup %6284 }
 0xa27   :  { %v3755_v24 = vadd.f32 1.0, %v6285_v8  ;;  %v6287_v4 = vpop.eup %6286 }
 0xa28   :  { %v3762_v53 = vadd.f32 1.0, %v6287_v4 }
 0xa29   :  { %6288 = vrcp.f32 %v3755_v24 }
 0xa2a   :  { %6290 = vrcp.f32 %v3762_v53  ;;  %v10586_v53 = vld [vmem:[%s11189_s6 + $0x178] sm:$0xff] }
 0xa95   :  { %v3557_v15 = vpop.f32.mrf.mxu0 }
 0xa96   :  { %v3558_v63 = vadd.f32 %v10559_v22, %v3557_v15 }
 0xa97   :  { %v5915_v13 = vpop.f32.mrf.mxu0 }
 0xa98   :  { %3561 = vst [vmem:[%s11194_s11 + $0x10] sm:$0xff] %v3558_v63  ;;  %v10570_v13 = vld [vmem:[%s11188_s4] ss:$0 sm:$0xff]  ;;  %v6289_v63 = vpop.eup %6288 }
 0xa99   :  { %v6291_v57 = vpop.eup %6290 }
 0xa9a   :  { %v3769_v8 = vsub.f32 1.0, %v6291_v57  ;;  %v3771_v42 = vmul.f32 %v6291_v57, %v9782_v58  ;;  %v10603_v58 = vld [vmem:[%s11189_s6 + $0x160] sm:$0xff]  ;;  %v10648_v57 = vld [vmem:[%s11189_s6 + $0x110] sm:$0xff] }
 0xa9b   :  { %11938 = vst [vmem:[#allocation76_spill] sm:$0xff] %v10648_v57 }
 0xab5   :  { %v3747_v52 = vpop.f32.mrf.mxu0 }
 0xab6   :  { %v3765_v15 = vadd.f32 %v10570_v13, %v3747_v52  ;;  %v10581_v52 = vld [vmem:[%s11189_s6 + $0x168] sm:$0xff] }
 0xab7   :  { %v5950_v22 = vpop.f32.mrf.mxu0 }
 0xab8   :  { %v3766_v47 = vmul.f32 %v6289_v63, %v3765_v15  ;;  %v10591_v22 = vld [vmem:[%s11189_s6 + $0x158] sm:$0xff]  ;;  %v10610_v15 = vld [vmem:[%s11189_s6 + $0x140] sm:$0xff] }
 0xab9   :  { %v10617_v63 = vld [vmem:[%s11189_s6 + $0x138] sm:$0xff] }
 0xaba   :  { %v3767_v11 = vadd.f32 %v3766_v47, %v348_v20  ;;  %v10629_v20 = vld [vmem:[%s11189_s6 + $0x128] sm:$0xff]  ;;  %v10636_v47 = vld [vmem:[%s11189_s6 + $0x120] sm:$0xff] }
 0xabb   :  { %11935 = vst [vmem:[#allocation45_spill] sm:$0xff] %v10629_v20  ;;  %11936 = vst [vmem:[#allocation36_spill] sm:$0xff] %v10636_v47 }
 0xabc   :  { %6292 = vtanh.f32 %v3767_v11  ;;  %v10641_v11 = vld [vmem:[%s11189_s6 + $0x130] sm:$0xff] }
 0xabd   :  { %11937 = vst [vmem:[#allocation75_spill] sm:$0xff] %v10641_v11 }
 0xac9   :  { %v6293_v4 = vpop.eup %6292 }
 0xaca   :  { %v3770_v24 = vmul.f32 %v6293_v4, %v3769_v8  ;;  %v10655_v8 = vld [vmem:[%s11189_s6 + $0x108] sm:$0xff]  ;;  %v10660_v4 = vld [vmem:[%s11189_s6 + $0x118] sm:$0xff] }
 0xacb   :  { %11939 = vst [vmem:[#allocation77_spill] sm:$0xff] %v10655_v8  ;;  %11940 = vst [vmem:[#allocation78_spill] sm:$0xff] %v10660_v4 }
 0xacc   :  { %v10576_v26 = vadd.f32 %v3771_v42, %v3770_v24  ;;  %v10598_v42 = vld [vmem:[%s11189_s6 + $0x150] sm:$0xff]  ;;  %v10667_v24 = vld [vmem:[%s11189_s6 + $0xf8] sm:$0xff] }
 0xacd   :  { %11941 = vst [vmem:[#allocation79_spill] sm:$0xff] %v10667_v24 }
 0xace   :  { %3886 = vmatmul.mubr.f32.vlgmr.msra.gmra.mxu1 %v10576_v26  ;;  %5984 = vmatmul.mubr.f32.vlgmr.msra.gmra.mxu0 %v10576_v26 }
 0xacf   :  { %4011 = vmatpush1.msra.mxu1 %v10581_v52  ;;  %5987 = vmatpush3.msra.mxu0 %v10586_v53 }
 0xad0   :  { %4012 = vmatprep.subr.mxu1 %v10591_v22  ;;  %5988 = vmatprep.subr.mxu0 %v11489_v44 }
 0xad1   :  { %4013 = vmatpush1.msra.mxu1 %v10598_v42  ;;  %5989 = vmatpush3.msra.mxu0 %v10603_v58 }
 0xad2   :  { %4014 = vmatprep.subr.mxu1 %v10610_v15  ;;  %5990 = vmatprep.subr.mxu0 %v11489_v44 }
 0xad3   :  { %4015 = vmatpush1.msra.mxu1 %v10617_v63  ;;  %5991 = vmatpush3.msra.mxu0 %v10622_v61 }
 0xad4   :  { %4016 = vmatprep.subr.mxu1 %v10629_v20  ;;  %5992 = vmatprep.subr.mxu0 %v11489_v44  ;;  %v10674_v20 = vld [vmem:[%s11189_s6 + $0xf0] sm:$0xff] }
 0xad5   :  { %4017 = vmatpush1.msra.mxu1 %v10636_v47  ;;  %5993 = vmatpush3.msra.mxu0 %v10641_v11  ;;  %11942 = vst [vmem:[#allocation80_spill] sm:$0xff] %v10674_v20  ;;  %v10679_v47 = vld [vmem:[%s11189_s6 + $0x100] sm:$0xff]  ;;  %v10693_v11 = vld [vmem:[%s11189_s6 + $0xd8] sm:$0xff] }
 0xad6   :  { %4018 = vmatprep.subr.mxu1 %v10648_v57  ;;  %5994 = vmatprep.subr.mxu0 %v11489_v44  ;;  %11943 = vst [vmem:[#allocation81_spill] sm:$0xff] %v10679_v47  ;;  %v10686_v57 = vld [vmem:[%s11189_s6 + $0xe0] sm:$0xff]  ;;  %11945 = vst [vmem:[#allocation38_spill] sm:$0xff] %v10693_v11 }
 0xad7   :  { %4019 = vmatpush1.msra.mxu1 %v10655_v8  ;;  %5995 = vmatpush3.msra.mxu0 %v10660_v4  ;;  %11944 = vst [vmem:[#allocation82_spill] sm:$0xff] %v10686_v57  ;;  %v10698_v8 = vld [vmem:[%s11189_s6 + $0xe8] sm:$0xff]  ;;  %v10712_v4 = vld [vmem:[%s11189_s6 + $0xc0] sm:$0xff] }
 0xad8   :  { %4020 = vmatprep.subr.mxu1 %v10667_v24  ;;  %5996 = vmatprep.subr.mxu0 %v11489_v44  ;;  %11946 = vst [vmem:[#allocation40_spill] sm:$0xff] %v10698_v8  ;;  %v10705_v24 = vld [vmem:[%s11189_s6 + $0xc8] sm:$0xff]  ;;  %11948 = vst [vmem:[#allocation42_spill] sm:$0xff] %v10712_v4 }
 0xad9   :  { %4021 = vmatpush1.msra.mxu1 %v10674_v20  ;;  %5997 = vmatpush3.msra.mxu0 %v10679_v47  ;;  %11947 = vst [vmem:[#allocation35_spill] sm:$0xff] %v10705_v24  ;;  %v10717_v20 = vld [vmem:[%s11189_s6 + $0xd0] sm:$0xff]  ;;  %v10731_v47 = vld [vmem:[%s11189_s6 + $0xa8] sm:$0xff] }
 0xada   :  { %4022 = vmatprep.subr.mxu1 %v10686_v57  ;;  %5998 = vmatprep.subr.mxu0 %v11489_v44  ;;  %11949 = vst [vmem:[#allocation43_spill] sm:$0xff] %v10717_v20  ;;  %v10724_v57 = vld [vmem:[%s11189_s6 + $0xb0] sm:$0xff]  ;;  %11951 = vst [vmem:[#allocation83_spill] sm:$0xff] %v10731_v47 }
 0xadb   :  { %4023 = vmatpush1.msra.mxu1 %v10693_v11  ;;  %5999 = vmatpush3.msra.mxu0 %v10698_v8  ;;  %11950 = vst [vmem:[#allocation37_spill] sm:$0xff] %v10724_v57  ;;  %v10736_v11 = vld [vmem:[%s11189_s6 + $0xb8] sm:$0xff]  ;;  %v10750_v8 = vld [vmem:[%s11189_s6 + $0x90] sm:$0xff] }
 0xadc   :  { %4024 = vmatprep.subr.mxu1 %v10705_v24  ;;  %6000 = vmatprep.subr.mxu0 %v11489_v44  ;;  %11952 = vst [vmem:[#allocation84_spill] sm:$0xff] %v10736_v11  ;;  %v10743_v24 = vld [vmem:[%s11189_s6 + $0x98] sm:$0xff]  ;;  %11954 = vst [vmem:[#allocation86_spill] sm:$0xff] %v10750_v8 }
 0xadd   :  { %4025 = vmatpush1.msra.mxu1 %v10712_v4  ;;  %6001 = vmatpush3.msra.mxu0 %v10717_v20  ;;  %11953 = vst [vmem:[#allocation85_spill] sm:$0xff] %v10743_v24  ;;  %v10755_v4 = vld [vmem:[%s11189_s6 + $0xa0] sm:$0xff]  ;;  %v10769_v20 = vld [vmem:[%s11189_s6 + $0x78] sm:$0xff] }
 0xade   :  { %4026 = vmatprep.subr.mxu1 %v10724_v57  ;;  %6002 = vmatprep.subr.mxu0 %v11489_v44  ;;  %11955 = vst [vmem:[#allocation87_spill] sm:$0xff] %v10755_v4  ;;  %v10762_v57 = vld [vmem:[%s11189_s6 + $0x80] sm:$0xff]  ;;  %11957 = vst [vmem:[#allocation89_spill] sm:$0xff] %v10769_v20 }
 0xadf   :  { %4027 = vmatpush1.msra.mxu1 %v10731_v47  ;;  %6003 = vmatpush3.msra.mxu0 %v10736_v11  ;;  %11956 = vst [vmem:[#allocation88_spill] sm:$0xff] %v10762_v57  ;;  %v10774_v47 = vld [vmem:[%s11189_s6 + $0x88] sm:$0xff]  ;;  %v10788_v11 = vld [vmem:[%s11189_s6 + $0x60] sm:$0xff] }
 0xae0   :  { %4028 = vmatprep.subr.mxu1 %v10743_v24  ;;  %6004 = vmatprep.subr.mxu0 %v11489_v44  ;;  %11958 = vst [vmem:[#allocation90_spill] sm:$0xff] %v10774_v47  ;;  %v10781_v24 = vld [vmem:[%s11189_s6 + $0x68] sm:$0xff]  ;;  %11960 = vst [vmem:[#allocation92_spill] sm:$0xff] %v10788_v11 }
 0xae1   :  { %4029 = vmatpush1.msra.mxu1 %v10750_v8  ;;  %6005 = vmatpush3.msra.mxu0 %v10755_v4  ;;  %11959 = vst [vmem:[#allocation91_spill] sm:$0xff] %v10781_v24  ;;  %v10793_v8 = vld [vmem:[%s11189_s6 + $0x70] sm:$0xff]  ;;  %v10807_v4 = vld [vmem:[%s11189_s6 + $0x48] sm:$0xff] }
 0xae2   :  { %4030 = vmatprep.subr.mxu1 %v10762_v57  ;;  %6006 = vmatprep.subr.mxu0 %v11489_v44  ;;  %11961 = vst [vmem:[#allocation93_spill] sm:$0xff] %v10793_v8  ;;  %v10800_v57 = vld [vmem:[%s11189_s6 + $0x50] sm:$0xff]  ;;  %11963 = vst [vmem:[#allocation95_spill] sm:$0xff] %v10807_v4 }
 0xae3   :  { %4031 = vmatpush1.msra.mxu1 %v10769_v20  ;;  %6007 = vmatpush3.msra.mxu0 %v10774_v47  ;;  %11962 = vst [vmem:[#allocation94_spill] sm:$0xff] %v10800_v57  ;;  %v10812_v20 = vld [vmem:[%s11189_s6 + $0x58] sm:$0xff]  ;;  %v10826_v47 = vld [vmem:[%s11189_s6 + $0x30] sm:$0xff] }
 0xae4   :  { %4032 = vmatprep.subr.mxu1 %v10781_v24  ;;  %6008 = vmatprep.subr.mxu0 %v11489_v44  ;;  %11964 = vst [vmem:[#allocation96_spill] sm:$0xff] %v10812_v20  ;;  %v10819_v24 = vld [vmem:[%s11189_s6 + $0x38] sm:$0xff] }
 0xae5   :  { %4033 = vmatpush1.msra.mxu1 %v10788_v11  ;;  %6009 = vmatpush3.msra.mxu0 %v10793_v8  ;;  %11965 = vst [vmem:[#allocation97_spill] sm:$0xff] %v10819_v24  ;;  %v10831_v11 = vld [vmem:[%s11189_s6 + $0x40] sm:$0xff]  ;;  %v10845_v8 = vld [vmem:[%s11189_s6 + $0x18] sm:$0xff] }
 0xae6   :  { %4034 = vmatprep.subr.mxu1 %v10800_v57  ;;  %6010 = vmatprep.subr.mxu0 %v11489_v44  ;;  %11966 = vst [vmem:[#allocation98_spill] sm:$0xff] %v10831_v11  ;;  %v10838_v57 = vld [vmem:[%s11189_s6 + $0x20] sm:$0xff] }
 0xae7   :  { %4035 = vmatpush1.msra.mxu1 %v10807_v4  ;;  %6011 = vmatpush3.msra.mxu0 %v10812_v20  ;;  %v10850_v4 = vld [vmem:[%s11189_s6 + $0x28] sm:$0xff]  ;;  %v10864_v20 = vld [vmem:[%s11189_s6] sm:$0xff] }
 0xae8   :  { %4036 = vmatprep.subr.mxu1 %v10819_v24  ;;  %6012 = vmatprep.subr.mxu0 %v11489_v44  ;;  %v10857_v24 = vld [vmem:[%s11189_s6 + $0x8] sm:$0xff] }
 0xae9   :  { %4037 = vmatpush1.msra.mxu1 %v10826_v47  ;;  %6013 = vmatpush3.msra.mxu0 %v10831_v11  ;;  %v10871_v11 = vld [vmem:[%s11189_s6 + $0x10] sm:$0xff] }
 0xaea   :  { %4038 = vmatprep.subr.mxu1 %v10838_v57  ;;  %6014 = vmatprep.subr.mxu0 %v11489_v44 }
 0xaeb   :  { %4039 = vmatpush1.msra.mxu1 %v10845_v8  ;;  %6015 = vmatpush3.msra.mxu0 %v10850_v4 }
 0xaec   :  { %4040 = vmatprep.subr.mxu1 %v10857_v24  ;;  %6016 = vmatprep.subr.mxu0 %v11489_v44 }
 0xaed   :  { %4041 = vmatpush1.msra.mxu1 %v10864_v20  ;;  %4074 = vmatprep.mubr.f32.mxu1 %v11489_v44 }
 0xaee   :  { %6017 = vmatpush3.msra.mxu0 %v10871_v11  ;;  %6018 = vmatprep.mubr.msk.f32.mxu0 %vm6420_vm2, %v11489_v44 }
 0xaef   :  { %4075 = vmatmul.mubr.f32.vlgmr.msra.gmra.mxu1 %v10123_v56  ;;  %6019 = vmatmul.mubr.f32.vlgmr.msra.gmra.mxu0 %v10123_v56 }
 0xaf0   :  { %4173 = vmatprep.subr.mxu1 %v9854_v34  ;;  %6021 = vmatprep.subr.mxu0 %v11489_v44  ;;  %v11967_v34 = vld [vmem:[#allocation52_spill] sm:$0xff] }
 0xaf1   :  { %4174 = vmatpush1.msra.mxu1 %v9862_v7  ;;  %6022 = vmatpush3.msra.mxu0 %v10130_v50  ;;  %v11968_v7 = vld [vmem:[#allocation53_spill] sm:$0xff]  ;;  %v11997_v50 = vld [vmem:[#allocation19_spill] sm:$0xff] }
 0xaf2   :  { %4175 = vmatprep.subr.mxu1 %v9869_v55  ;;  %6023 = vmatprep.subr.mxu0 %v11489_v44  ;;  %v11969_v55 = vld [vmem:[#allocation51_spill] sm:$0xff] }
 0xaf3   :  { %4176 = vmatpush1.msra.mxu1 %v9875_v59  ;;  %6024 = vmatpush3.msra.mxu0 %v10135_v18  ;;  %v11970_v59 = vld [vmem:[#allocation54_spill] sm:$0xff]  ;;  %v11998_v18 = vld [vmem:[#allocation20_spill] sm:$0xff] }
 0xaf4   :  { %4177 = vmatprep.subr.mxu1 %v9882_v12  ;;  %6025 = vmatprep.subr.mxu0 %v11489_v44  ;;  %v11971_v12 = vld [vmem:[#allocation55_spill] sm:$0xff] }
 0xaf5   :  { %4178 = vmatpush1.msra.mxu1 %v9889_v19  ;;  %6026 = vmatpush3.msra.mxu0 %v10144_v54  ;;  %v11972_v19 = vld [vmem:[#allocation56_spill] sm:$0xff]  ;;  %v11999_v54 = vld [vmem:[#allocation21_spill] sm:$0xff] }
 0xaf6   :  { %4179 = vmatprep.subr.mxu1 %v9897_v28  ;;  %6027 = vmatprep.subr.mxu0 %v11489_v44  ;;  %v11973_v28 = vld [vmem:[#allocation57_spill] sm:$0xff] }
 0xaf7   :  { %4180 = vmatpush1.msra.mxu1 %v9903_v51  ;;  %6028 = vmatpush3.msra.mxu0 %v10151_v27  ;;  %v11974_v51 = vld [vmem:[#allocation58_spill] sm:$0xff] }
 0xaf8   :  { %4181 = vmatprep.subr.mxu1 %v9909_v60  ;;  %6029 = vmatprep.subr.mxu0 %v11489_v44  ;;  %v11975_v60 = vld [vmem:[#allocation59_spill] sm:$0xff]  ;;  %v12000_v27 = vld [vmem:[#allocation22_spill] sm:$0xff] }
 0xaf9   :  { %4182 = vmatpush1.msra.mxu1 %v9915_v30  ;;  %6030 = vmatpush3.msra.mxu0 %v10158_v46  ;;  %v11976_v30 = vld [vmem:[#allocation60_spill] sm:$0xff] }
 0xafa   :  { %4183 = vmatprep.subr.mxu1 %v9921_v2  ;;  %6031 = vmatprep.subr.mxu0 %v11489_v44  ;;  %v11977_v2 = vld [vmem:[#allocation61_spill] sm:$0xff]  ;;  %v12001_v46 = vld [vmem:[#allocation24_spill] sm:$0xff] }
 0xafb   :  { %4184 = vmatpush1.msra.mxu1 %v9927_v10  ;;  %6032 = vmatpush3.msra.mxu0 %v10165_v39  ;;  %v11978_v10 = vld [vmem:[#allocation62_spill] sm:$0xff]  ;;  %v12002_v39 = vld [vmem:[#allocation25_spill] sm:$0xff] }
 0xafc   :  { %4185 = vmatprep.subr.mxu1 %v9933_v45  ;;  %6033 = vmatprep.subr.mxu0 %v11489_v44  ;;  %v11979_v45 = vld [vmem:[#allocation63_spill] sm:$0xff] }
 0xafd   :  { %4186 = vmatpush1.msra.mxu1 %v9939_v31  ;;  %6034 = vmatpush3.msra.mxu0 %v10172_v40  ;;  %v11980_v31 = vld [vmem:[#allocation64_spill] sm:$0xff]  ;;  %v12003_v40 = vld [vmem:[#allocation27_spill] sm:$0xff] }
 0xafe   :  { %4187 = vmatprep.subr.mxu1 %v9945_v48  ;;  %6035 = vmatprep.subr.mxu0 %v11489_v44  ;;  %v11981_v48 = vld [vmem:[#allocation65_spill] sm:$0xff] }
 0xaff   :  { %4188 = vmatpush1.msra.mxu1 %v9951_v6  ;;  %6036 = vmatpush3.msra.mxu0 %v10179_v41  ;;  %v11982_v6 = vld [vmem:[#allocation66_spill] sm:$0xff]  ;;  %v12004_v41 = vld [vmem:[#allocation28_spill] sm:$0xff] }
 0xb00   :  { %4189 = vmatprep.subr.mxu1 %v9957_v16  ;;  %6037 = vmatprep.subr.mxu0 %v11489_v44  ;;  %v11983_v16 = vld [vmem:[#allocation67_spill] sm:$0xff] }
 0xb01   :  { %4190 = vmatpush1.msra.mxu1 %v9963_v17  ;;  %6038 = vmatpush3.msra.mxu0 %v10186_v43  ;;  %v11984_v17 = vld [vmem:[#allocation2_spill] sm:$0xff] }
 0xb02   :  { %4191 = vmatprep.subr.mxu1 %v9969_v14  ;;  %6039 = vmatprep.subr.mxu0 %v11489_v44  ;;  %v11985_v14 = vld [vmem:[#allocation7_spill] sm:$0xff]  ;;  %v12005_v43 = vld [vmem:[#allocation30_spill] sm:$0xff] }
 0xb03   :  { %4192 = vmatpush1.msra.mxu1 %v9975_v36  ;;  %6040 = vmatpush3.msra.mxu0 %v10193_v21  ;;  %v11986_v36 = vld [vmem:[#allocation8_spill] sm:$0xff]  ;;  %v12006_v21 = vld [vmem:[#allocation31_spill] sm:$0xff] }
 0xb04   :  { %4193 = vmatprep.subr.mxu1 %v9981_v23  ;;  %6041 = vmatprep.subr.mxu0 %v11489_v44  ;;  %v11987_v23 = vld [vmem:[#allocation10_spill] sm:$0xff] }
 0xb05   :  { %4194 = vmatpush1.msra.mxu1 %v9987_v35  ;;  %6042 = vmatpush3.msra.mxu0 %v10200_v9  ;;  %v11988_v35 = vld [vmem:[#allocation9_spill] sm:$0xff] }
 0xb06   :  { %4195 = vmatprep.subr.mxu1 %v9993_v49  ;;  %6043 = vmatprep.subr.mxu0 %v11489_v44  ;;  %v11989_v49 = vld [vmem:[#allocation11_spill] sm:$0xff]  ;;  %v12007_v9 = vld [vmem:[#allocation33_spill] sm:$0xff] }
 0xb07   :  { %4196 = vmatpush1.msra.mxu1 %v9999_v1  ;;  %6044 = vmatpush3.msra.mxu0 %v10207_v38  ;;  %v11990_v1 = vld [vmem:[#allocation13_spill] sm:$0xff]  ;;  %v12008_v38 = vld [vmem:[#allocation23_spill] sm:$0xff] }
 0xb08   :  { %4197 = vmatprep.subr.mxu1 %v10005_v32  ;;  %6045 = vmatprep.subr.mxu0 %v11489_v44  ;;  %v11991_v32 = vld [vmem:[#allocation12_spill] sm:$0xff] }
 0xb09   :  { %4198 = vmatpush1.msra.mxu1 %v10011_v29  ;;  %6046 = vmatpush3.msra.mxu0 %v10214_v25  ;;  %v11992_v29 = vld [vmem:[#allocation14_spill] sm:$0xff] }
 0xb0a   :  { %4199 = vmatprep.subr.mxu1 %v10017_v37  ;;  %6047 = vmatprep.subr.mxu0 %v11489_v44  ;;  %v11993_v37 = vld [vmem:[#allocation15_spill] sm:$0xff]  ;;  %v12009_v25 = vld [vmem:[#allocation26_spill] sm:$0xff] }
 0xb0b   :  { %4200 = vmatpush1.msra.mxu1 %v10023_v3  ;;  %6048 = vmatpush3.msra.mxu0 %v10221_v0  ;;  %v11994_v3 = vld [vmem:[#allocation16_spill] sm:$0xff]  ;;  %v12010_v0 = vld [vmem:[#allocation29_spill] sm:$0xff] }
 0xb0c   :  { %4201 = vmatprep.subr.mxu1 %v10029_v33  ;;  %6049 = vmatprep.subr.mxu0 %v11489_v44  ;;  %v11995_v33 = vld [vmem:[#allocation17_spill] sm:$0xff] }
 0xb0d   :  { %4202 = vmatpush1.msra.mxu1 %v10035_v62  ;;  %6050 = vmatpush3.msra.mxu0 %v11967_v34  ;;  %v11996_v62 = vld [vmem:[#allocation18_spill] sm:$0xff]  ;;  %v12011_v34 = vld [vmem:[#allocation32_spill] sm:$0xff] }
 0xb0e   :  { %4203 = vmatprep.subr.mxu1 %v11968_v7  ;;  %6051 = vmatprep.subr.mxu0 %v11489_v44  ;;  %v12012_v7 = vld [vmem:[#allocation34_spill] sm:$0xff] }
 0xb0f   :  { %4204 = vmatpush1.msra.mxu1 %v11969_v55  ;;  %4237 = vmatprep.mubr.f32.mxu1 %v11489_v44  ;;  %v12013_v55 = vld [vmem:[#allocation68_spill] sm:$0xff] }
 0xb10   :  { %6052 = vmatpush3.msra.mxu0 %v11970_v59  ;;  %6053 = vmatprep.mubr.msk.f32.mxu0 %vm6420_vm2, %v11489_v44  ;;  %v12014_v59 = vld [vmem:[#allocation69_spill] sm:$0xff] }
 0xb11   :  { %4238 = vmatmul.mubr.f32.vlgmr.msra.gmra.mxu1 %v10576_v26  ;;  %6054 = vmatmul.mubr.f32.vlgmr.msra.gmra.mxu0 %v10576_v26 }
 0xb12   :  { %4336 = vmatprep.subr.mxu1 %v11971_v12  ;;  %6056 = vmatprep.subr.mxu0 %v11489_v44  ;;  %v12015_v12 = vld [vmem:[#allocation70_spill] sm:$0xff] }
 0xb13   :  { %4337 = vmatpush1.msra.mxu1 %v11972_v19  ;;  %6057 = vmatpush3.msra.mxu0 %v11973_v28  ;;  %v12016_v19 = vld [vmem:[#allocation71_spill] sm:$0xff]  ;;  %v12017_v28 = vld [vmem:[#allocation72_spill] sm:$0xff] }
 0xb14   :  { %4338 = vmatprep.subr.mxu1 %v11974_v51  ;;  %6058 = vmatprep.subr.mxu0 %v11489_v44  ;;  %v12018_v51 = vld [vmem:[#allocation73_spill] sm:$0xff] }
 0xb15   :  { %4339 = vmatpush1.msra.mxu1 %v11975_v60  ;;  %6059 = vmatpush3.msra.mxu0 %v11976_v30  ;;  %v12019_v60 = vld [vmem:[#allocation74_spill] sm:$0xff] }
 0xb16   :  { %4340 = vmatprep.subr.mxu1 %v11977_v2  ;;  %6060 = vmatprep.subr.mxu0 %v11489_v44 }
 0xb17   :  { %4341 = vmatpush1.msra.mxu1 %v11978_v10  ;;  %6061 = vmatpush3.msra.mxu0 %v11979_v45 }
 0xb18   :  { %4342 = vmatprep.subr.mxu1 %v11980_v31  ;;  %6062 = vmatprep.subr.mxu0 %v11489_v44  ;;  %v12020_v31 = vld [vmem:[#allocation3_spill] sm:$0xff] }
 0xb19   :  { %4343 = vmatpush1.msra.mxu1 %v11981_v48  ;;  %6063 = vmatpush3.msra.mxu0 %v11982_v6 }
 0xb1a   :  { %4344 = vmatprep.subr.mxu1 %v11983_v16  ;;  %6064 = vmatprep.subr.mxu0 %v11489_v44 }
 0xb1b   :  { %4345 = vmatpush1.msra.mxu1 %v11984_v17  ;;  %6065 = vmatpush3.msra.mxu0 %v11985_v14 }
 0xb1c   :  { %4346 = vmatprep.subr.mxu1 %v11986_v36  ;;  %6066 = vmatprep.subr.mxu0 %v11489_v44 }
 0xb1d   :  { %4347 = vmatpush1.msra.mxu1 %v11987_v23  ;;  %6067 = vmatpush3.msra.mxu0 %v11988_v35 }
 0xb1e   :  { %4348 = vmatprep.subr.mxu1 %v11989_v49  ;;  %6068 = vmatprep.subr.mxu0 %v11489_v44 }
 0xb1f   :  { %4349 = vmatpush1.msra.mxu1 %v11990_v1  ;;  %6069 = vmatpush3.msra.mxu0 %v11991_v32  ;;  %v12021_v1 = vld [vmem:[#allocation4_spill] sm:$0xff] }
 0xb20   :  { %4350 = vmatprep.subr.mxu1 %v11992_v29  ;;  %6070 = vmatprep.subr.mxu0 %v11489_v44  ;;  %v12022_v32 = vld [vmem:[#allocation48_spill] sm:$0xff] }
 0xb21   :  { %4351 = vmatpush1.msra.mxu1 %v11993_v37  ;;  %6071 = vmatpush3.msra.mxu0 %v11994_v3  ;;  %v247_v29 = vadd.f32 %v12022_v32, %v12021_v1  ;;  %v11026_v37 = vld [vmem:[%s11191_s8] ss:$0 sm:$0xff]  ;;  %v12039_v1 = vld [vmem:[#allocation40_spill] sm:$0xff]  ;;  %v12040_v32 = vld [vmem:[#allocation35_spill] sm:$0xff] }
 0xb22   :  { %4352 = vmatprep.subr.mxu1 %v11995_v33  ;;  %6072 = vmatprep.subr.mxu0 %v11489_v44 }
 0xb23   :  { %4353 = vmatpush1.msra.mxu1 %v11996_v62  ;;  %6073 = vmatpush3.msra.mxu0 %v11997_v50 }
 0xb24   :  { %4354 = vmatprep.subr.mxu1 %v11998_v18  ;;  %6074 = vmatprep.subr.mxu0 %v11489_v44  ;;  %v12023_v18 = vld [vmem:[#allocation50_spill] sm:$0xff] }
 0xb25   :  { %4355 = vmatpush1.msra.mxu1 %v11999_v54  ;;  %6075 = vmatpush3.msra.mxu0 %v12000_v27 }
 0xb26   :  { %4356 = vmatprep.subr.mxu1 %v12001_v46  ;;  %6076 = vmatprep.subr.mxu0 %v11489_v44 }
 0xb27   :  { %4357 = vmatpush1.msra.mxu1 %v12002_v39  ;;  %6077 = vmatpush3.msra.mxu0 %v12003_v40 }
 0xb28   :  { %4358 = vmatprep.subr.mxu1 %v12004_v41  ;;  %6078 = vmatprep.subr.mxu0 %v11489_v44 }
 0xb29   :  { %4359 = vmatpush1.msra.mxu1 %v12005_v43  ;;  %6079 = vmatpush3.msra.mxu0 %v12006_v21  ;;  %v12024_v21 = vld [vmem:[#allocation5_spill] sm:$0xff] }
 0xb2a   :  { %4360 = vmatprep.subr.mxu1 %v12007_v9  ;;  %6080 = vmatprep.subr.mxu0 %v11489_v44  ;;  %v12025_v9 = vld [vmem:[#allocation49_spill] sm:$0xff] }
 0xb2b   :  { %4361 = vmatpush1.msra.mxu1 %v12008_v38  ;;  %6081 = vmatpush3.msra.mxu0 %v12009_v25  ;;  %v249_v38 = vadd.f32 %v12025_v9, %v12024_v21  ;;  %v12052_v21 = vld [vmem:[#allocation91_spill] sm:$0xff]  ;;  %v12053_v9 = vld [vmem:[#allocation92_spill] sm:$0xff] }
 0xb2c   :  { %4362 = vmatprep.subr.mxu1 %v12010_v0  ;;  %6082 = vmatprep.subr.mxu0 %v11489_v44 }
 0xb2d   :  { %4363 = vmatpush1.msra.mxu1 %v12011_v34  ;;  %6083 = vmatpush3.msra.mxu0 %v12012_v7 }
 0xb2e   :  { %4364 = vmatprep.subr.mxu1 %v12013_v55  ;;  %6084 = vmatprep.subr.mxu0 %v11489_v44 }
 0xb2f   :  { %4365 = vmatpush1.msra.mxu1 %v12014_v59  ;;  %6085 = vmatpush3.msra.mxu0 %v12015_v12 }
 0xb30   :  { %4366 = vmatprep.subr.mxu1 %v12016_v19  ;;  %6086 = vmatprep.subr.mxu0 %v11489_v44 }
 0xb31   :  { %4367 = vmatpush1.msra.mxu1 %v12017_v28  ;;  %6087 = vmatpush3.msra.mxu0 %v12018_v51  ;;  %v12026_v28 = vld [vmem:[#allocation39_spill] sm:$0xff] }
 0xb32   :  { %4400 = vmatprep.mubr.f32.mxu1 %v11489_v44  ;;  %6088 = vmatprep.mubr.msk.f32.mxu0 %vm6420_vm2, %v11489_v44  ;;  %v353_v51 = vadd.f32 %v12026_v28, %v6871_v5 }
 0xb33   :  { %4477 = vmatprep.subr.mxu1 %v12019_v60  ;;  %6091 = vmatprep.subr.mxu0 %v11489_v44 }
 0xb8e   :  { %v3958_v30 = vpop.f32.mrf.mxu0  ;;  %v3887_v10 = vpop.f32.mrf.mxu1 }
 0xb8f   :  { %v3888_v48 = vadd.f32 %v3887_v10, %v12020_v31  ;;  %v3959_v54 = vadd.f32 %v3958_v30, %v12023_v18  ;;  %v12027_v30 = vld [vmem:[#allocation6_spill] sm:$0xff] }
 0xb90   :  { %v5985_v2 = vpop.f32.mrf.mxu0  ;;  %v3889_v45 = vpop.f32.mrf.mxu1 }
 0xb91   :  { %v3890_v2 = vadd.f32 %v3889_v45, %v12027_v30  ;;  %v12036_v45 = vld [vmem:[#allocation81_spill] sm:$0xff] }
 0xbaf   :  { %v4076_v6 = vpop.f32.mrf.mxu1  ;;  %v4147_v16 = vpop.f32.mrf.mxu0 }
 0xbb0   :  { %v4151_v17 = vadd.f32 %v4076_v6, %v3888_v48  ;;  %v4165_v3 = vadd.f32 %v11026_v37, %v4147_v16 }
 0xbb1   :  { %v6020_v14 = vpop.f32.mrf.mxu0  ;;  %v4078_v49 = vpop.f32.mrf.mxu1 }
 0xbb2   :  { %v4780_v36 = vmul.f32 -1.442695, %v4151_v17  ;;  %v4158_v48 = vadd.f32 %v4078_v49, %v3890_v2  ;;  %v12038_v49 = vld [vmem:[#allocation38_spill] sm:$0xff]  ;;  %v4647_v2 = vld [vmem:[%s11192_s9 + $0x30] sm:$0xff] }
 0xbb4   :  { %6294 = vpow2.f32 %v4780_v36  ;;  %v4781_v6 = vmul.f32 -1.442695, %v4158_v48  ;;  %v4645_v48 = vld [vmem:[%s11192_s9 + $0x20] sm:$0xff] }
 0xbc1   :  { %v6295_v23 = vpop.eup %6294 }
 0xbc2   :  { %v4155_v35 = vadd.f32 1.0, %v6295_v23 }
 0xbc4   :  { %6296 = vrcp.f32 %v4155_v35  ;;  %v12037_v35 = vld [vmem:[#allocation82_spill] sm:$0xff] }
 0xbd1   :  { %v6297_v33 = vpop.eup %6296  ;;  %v4239_v62 = vpop.f32.mrf.mxu1 }
 0xbd2   :  { %v4310_v50 = vpop.f32.mrf.mxu0  ;;  %v4166_v27 = vmul.f32 %v6297_v33, %v4165_v3  ;;  %v4314_v46 = vadd.f32 %v4239_v62, %v247_v29  ;;  %v12041_v29 = vld [vmem:[#allocation42_spill] sm:$0xff]  ;;  %v12042_v3 = vld [vmem:[#allocation43_spill] sm:$0xff]  ;;  %v12043_v33 = vld [vmem:[#allocation37_spill] sm:$0xff] }
 0xbd3   :  { %v4241_v43 = vpop.f32.mrf.mxu1  ;;  %v4328_v12 = vadd.f32 %v10570_v13, %v4310_v50  ;;  %v12044_v62 = vld [vmem:[#allocation83_spill] sm:$0xff]  ;;  %v12045_v50 = vld [vmem:[#allocation84_spill] sm:$0xff] }
 0xbd4   :  { %v6055_v39 = vpop.f32.mrf.mxu0  ;;  %v4167_v40 = vadd.f32 %v4166_v27, %v3959_v54  ;;  %v4782_v41 = vmul.f32 -1.442695, %v4314_v46  ;;  %v4321_v25 = vadd.f32 %v4241_v43, %v249_v38  ;;  %v12046_v54 = vld [vmem:[#allocation85_spill] sm:$0xff]  ;;  %v12047_v27 = vld [vmem:[#allocation86_spill] sm:$0xff]  ;;  %v12048_v46 = vld [vmem:[#allocation87_spill] sm:$0xff] }
 0xbd5   :  { %v12049_v39 = vld [vmem:[#allocation88_spill] sm:$0xff]  ;;  %v12054_v38 = vld [vmem:[#allocation93_spill] sm:$0xff] }
 0xbd6   :  { %6298 = vpow2.f32 %v4782_v41  ;;  %v4783_v0 = vmul.f32 -1.442695, %v4321_v25  ;;  %v12051_v41 = vld [vmem:[#allocation90_spill] sm:$0xff] }
 0xbd8   :  { %6300 = vpow2.f32 %v4783_v0  ;;  %v12055_v0 = vld [vmem:[#allocation94_spill] sm:$0xff] }
 0xbe3   :  { %v6299_v34 = vpop.eup %6298 }
 0xbe4   :  { %v4318_v7 = vadd.f32 1.0, %v6299_v34  ;;  %v12056_v34 = vld [vmem:[#allocation95_spill] sm:$0xff] }
 0xbe5   :  { %v6301_v55 = vpop.eup %6300 }
 0xbe6   :  { %6302 = vrcp.f32 %v4318_v7  ;;  %v4325_v59 = vadd.f32 1.0, %v6301_v55  ;;  %v12057_v7 = vld [vmem:[#allocation96_spill] sm:$0xff] }
 0xbe8   :  { %6304 = vrcp.f32 %v4325_v59  ;;  %v12058_v59 = vld [vmem:[#allocation97_spill] sm:$0xff] }
 0xbf3   :  { %v6303_v19 = vpop.eup %6302 }
 0xbf4   :  { %v4329_v60 = vmul.f32 %v6303_v19, %v4328_v12  ;;  %v12059_v12 = vld [vmem:[#allocation98_spill] sm:$0xff] }
 0xbf5   :  { %v6305_v16 = vpop.eup %6304 }
 0xbf6   :  { %v4330_v10 = vadd.f32 %v4329_v60, %v353_v51  ;;  %v4332_v17 = vsub.f32 1.0, %v6305_v16  ;;  %v4334_v23 = vmul.f32 %v6305_v16, %v10576_v26  ;;  %v4649_v51 = vld [vmem:[%s11192_s9 + $0x40] sm:$0xff]  ;;  %v4648_v60 = vld [vmem:[%s11192_s9 + $0x38] sm:$0xff]  ;;  %v4643_v16 = vld [vmem:[%s11192_s9 + $0x10] sm:$0xff] }
 0xbf8   :  { %6306 = vtanh.f32 %v4330_v10  ;;  %v4646_v10 = vld [vmem:[%s11192_s9 + $0x28] sm:$0xff] }
 0xbf9   :  { %6308 = vpow2.f32 %v4781_v6  ;;  %v4644_v6 = vld [vmem:[%s11192_s9 + $0x18] sm:$0xff] }
 0xc05   :  { %v6307_v14 = vpop.eup %6306 }
 0xc06   :  { %v4333_v36 = vmul.f32 %v6307_v14, %v4332_v17  ;;  %v6309_v5 = vpop.eup %6308  ;;  %v4642_v17 = vld [vmem:[%s11192_s9 + $0x8] sm:$0xff]  ;;  %v4641_v14 = vld [vmem:[%s11192_s9] sm:$0xff] }
 0xc07   :  { %v4162_v26 = vadd.f32 1.0, %v6309_v5 }
 0xc08   :  { %v4335_v13 = vadd.f32 %v4334_v23, %v4333_v36 }
 0xc09   :  { %6310 = vrcp.f32 %v4162_v26 }
 0xc0a   :  { %4401 = vmatmul.mubr.f32.vlgmr.msra.gmra.mxu1 %v4335_v13  ;;  %6089 = vmatmul.mubr.f32.vlgmr.msra.gmra.mxu0 %v4335_v13  ;;  %6312 = vtanh.f32 %v4167_v40  ;;  %v12050_v40 = vld [vmem:[#allocation89_spill] sm:$0xff] }
 0xc0b   :  { %4478 = vmatpush1.msra.mxu1 %v10581_v52  ;;  %6092 = vmatpush3.msra.mxu0 %v10586_v53  ;;  %v12028_v52 = vld [vmem:[#allocation45_spill] sm:$0xff]  ;;  %v12029_v53 = vld [vmem:[#allocation36_spill] sm:$0xff] }
 0xc0c   :  { %4479 = vmatprep.subr.mxu1 %v10591_v22  ;;  %6093 = vmatprep.subr.mxu0 %v11489_v44  ;;  %v12030_v22 = vld [vmem:[#allocation75_spill] sm:$0xff] }
 0xc0d   :  { %4480 = vmatpush1.msra.mxu1 %v10598_v42  ;;  %6094 = vmatpush3.msra.mxu0 %v10603_v58  ;;  %v12031_v42 = vld [vmem:[#allocation76_spill] sm:$0xff]  ;;  %v12032_v58 = vld [vmem:[#allocation77_spill] sm:$0xff] }
 0xc0e   :  { %4481 = vmatprep.subr.mxu1 %v10610_v15  ;;  %6095 = vmatprep.subr.mxu0 %v11489_v44  ;;  %v12033_v15 = vld [vmem:[#allocation78_spill] sm:$0xff] }
 0xc0f   :  { %4482 = vmatpush1.msra.mxu1 %v10617_v63  ;;  %6096 = vmatpush3.msra.mxu0 %v10622_v61  ;;  %v12034_v63 = vld [vmem:[#allocation79_spill] sm:$0xff]  ;;  %v12035_v61 = vld [vmem:[#allocation80_spill] sm:$0xff] }
 0xc10   :  { %4483 = vmatprep.subr.mxu1 %v12028_v52  ;;  %6097 = vmatprep.subr.mxu0 %v11489_v44 }
 0xc11   :  { %4484 = vmatpush1.msra.mxu1 %v12029_v53  ;;  %6098 = vmatpush3.msra.mxu0 %v12030_v22 }
 0xc12   :  { %4485 = vmatprep.subr.mxu1 %v12031_v42  ;;  %6099 = vmatprep.subr.mxu0 %v11489_v44 }
 0xc13   :  { %4486 = vmatpush1.msra.mxu1 %v12032_v58  ;;  %6100 = vmatpush3.msra.mxu0 %v12033_v15 }
 0xc14   :  { %4487 = vmatprep.subr.mxu1 %v12034_v63  ;;  %6101 = vmatprep.subr.mxu0 %v11489_v44 }
 0xc15   :  { %4488 = vmatpush1.msra.mxu1 %v12035_v61  ;;  %6102 = vmatpush3.msra.mxu0 %v12036_v45 }
 0xc16   :  { %4489 = vmatprep.subr.mxu1 %v12037_v35  ;;  %6103 = vmatprep.subr.mxu0 %v11489_v44  ;;  %v6311_v43 = vpop.eup %6310 }
 0xc17   :  { %4490 = vmatpush1.msra.mxu1 %v12038_v49  ;;  %6104 = vmatpush3.msra.mxu0 %v12039_v1  ;;  %v6313_v25 = vpop.eup %6312  ;;  %v4169_v55 = vsub.f32 1.0, %v6311_v43  ;;  %v4171_v28 = vmul.f32 %v6311_v43, %v10123_v56  ;;  %v4656_v56 = vld [vmem:[%s11192_s9 + $0x78] sm:$0xff] }
 0xc18   :  { %4491 = vmatprep.subr.mxu1 %v12040_v32  ;;  %6105 = vmatprep.subr.mxu0 %v11489_v44 }
 0xc19   :  { %4492 = vmatpush1.msra.mxu1 %v12041_v29  ;;  %6106 = vmatpush3.msra.mxu0 %v12042_v3  ;;  %v4170_v19 = vmul.f32 %v6313_v25, %v4169_v55 }
 0xc1a   :  { %4493 = vmatprep.subr.mxu1 %v12043_v33  ;;  %6107 = vmatprep.subr.mxu0 %v11489_v44 }
 0xc1b   :  { %4494 = vmatpush1.msra.mxu1 %v12044_v62  ;;  %6108 = vmatpush3.msra.mxu0 %v12045_v50 }
 0xc1c   :  { %4495 = vmatprep.subr.mxu1 %v12046_v54  ;;  %6109 = vmatprep.subr.mxu0 %v11489_v44 }
 0xc1d   :  { %4496 = vmatpush1.msra.mxu1 %v12047_v27  ;;  %6110 = vmatpush3.msra.mxu0 %v12048_v46 }
 0xc1e   :  { %4497 = vmatprep.subr.mxu1 %v12049_v39  ;;  %6111 = vmatprep.subr.mxu0 %v11489_v44 }
 0xc1f   :  { %4498 = vmatpush1.msra.mxu1 %v12050_v40  ;;  %6112 = vmatpush3.msra.mxu0 %v12051_v41  ;;  %v12060_v41 = vld [vmem:[#allocation44_spill] sm:$0xff] }
 0xc20   :  { %4499 = vmatprep.subr.mxu1 %v12052_v21  ;;  %6113 = vmatprep.subr.mxu0 %v11489_v44 }
 0xc21   :  { %4500 = vmatpush1.msra.mxu1 %v12053_v9  ;;  %6114 = vmatpush3.msra.mxu0 %v12054_v38 }
 0xc22   :  { %4501 = vmatprep.subr.mxu1 %v12055_v0  ;;  %6115 = vmatprep.subr.mxu0 %v11489_v44 }
 0xc23   :  { %4502 = vmatpush1.msra.mxu1 %v12056_v34  ;;  %6116 = vmatpush3.msra.mxu0 %v12057_v7 }
 0xc24   :  { %4503 = vmatprep.subr.mxu1 %v12058_v59  ;;  %6117 = vmatprep.subr.mxu0 %v11489_v44 }
 0xc25   :  { %4504 = vmatpush1.msra.mxu1 %v10826_v47  ;;  %6118 = vmatpush3.msra.mxu0 %v12059_v12  ;;  %v11100_v47 = vadd.f32 %v4171_v28, %v4170_v19 }
 0xc26   :  { %4505 = vmatprep.subr.mxu1 %v10838_v57  ;;  %6119 = vmatprep.subr.mxu0 %v11489_v44  ;;  %v4653_v57 = vld [vmem:[%s11192_s9 + $0x60] sm:$0xff] }
 0xc27   :  { %4506 = vmatpush1.msra.mxu1 %v10845_v8  ;;  %6120 = vmatpush3.msra.mxu0 %v10850_v4  ;;  %v4652_v8 = vld [vmem:[%s11192_s9 + $0x58] sm:$0xff]  ;;  %v4651_v4 = vld [vmem:[%s11192_s9 + $0x50] sm:$0xff] }
 0xc28   :  { %4507 = vmatprep.subr.mxu1 %v10857_v24  ;;  %6121 = vmatprep.subr.mxu0 %v11489_v44  ;;  %v4650_v24 = vld [vmem:[%s11192_s9 + $0x48] sm:$0xff] }
 0xc29   :  { %4508 = vmatpush1.msra.mxu1 %v10864_v20  ;;  %4541 = vmatprep.mubr.f32.mxu1 %v11489_v44  ;;  %v4655_v20 = vld [vmem:[%s11192_s9 + $0x70] sm:$0xff] }
 0xc2a   :  { %6122 = vmatpush3.msra.mxu0 %v10871_v11  ;;  %6123 = vmatprep.mubr.msk.f32.mxu0 %vm6420_vm2, %v11489_v44  ;;  %v4654_v11 = vld [vmem:[%s11192_s9 + $0x68] sm:$0xff] }
 0xc2b   :  { %4542 = vmatmul.mubr.f32.vlgmr.msra.gmra.mxu1 %v11100_v47  ;;  %6124 = vmatmul.mubr.f32.vlgmr.msra.gmra.mxu0 %v11100_v47 }
 0xc2c   :  { %6126 = vmatprep.subr.mxu1 %v11489_v44  ;;  %6158 = vmatprep.mubr.msk.f32.mxu1 %vm6420_vm2, %v11489_v44 }
 0xc2d   :  { %6127 = vmatpush3.msra.mxu1 %v4656_v56 }
 0xc2e   :  { %6128 = vmatprep.subr.mxu1 %v11489_v44 }
 0xc2f   :  { %6129 = vmatpush3.msra.mxu1 %v4655_v20 }
 0xc30   :  { %6130 = vmatprep.subr.mxu1 %v11489_v44 }
 0xc31   :  { %6131 = vmatpush3.msra.mxu1 %v4654_v11 }
 0xc32   :  { %6132 = vmatprep.subr.mxu1 %v11489_v44 }
 0xc33   :  { %6133 = vmatpush3.msra.mxu1 %v4653_v57 }
 0xc34   :  { %6134 = vmatprep.subr.mxu1 %v11489_v44 }
 0xc35   :  { %6135 = vmatpush3.msra.mxu1 %v4652_v8 }
 0xc36   :  { %6136 = vmatprep.subr.mxu1 %v11489_v44 }
 0xc37   :  { %6137 = vmatpush3.msra.mxu1 %v4651_v4 }
 0xc38   :  { %6138 = vmatprep.subr.mxu1 %v11489_v44 }
 0xc39   :  { %6139 = vmatpush3.msra.mxu1 %v4650_v24 }
 0xc3a   :  { %6140 = vmatprep.subr.mxu1 %v11489_v44 }
 0xc3b   :  { %6141 = vmatpush3.msra.mxu1 %v4649_v51 }
 0xc3c   :  { %6142 = vmatprep.subr.mxu1 %v11489_v44 }
 0xc3d   :  { %6143 = vmatpush3.msra.mxu1 %v4648_v60 }
 0xc3e   :  { %6144 = vmatprep.subr.mxu1 %v11489_v44 }
 0xc3f   :  { %6145 = vmatpush3.msra.mxu1 %v4647_v2 }
 0xc40   :  { %6146 = vmatprep.subr.mxu1 %v11489_v44 }
 0xc41   :  { %6147 = vmatpush3.msra.mxu1 %v4646_v10 }
 0xc42   :  { %6148 = vmatprep.subr.mxu1 %v11489_v44 }
 0xc43   :  { %6149 = vmatpush3.msra.mxu1 %v4645_v48 }
 0xc44   :  { %6150 = vmatprep.subr.mxu1 %v11489_v44 }
 0xc45   :  { %6151 = vmatpush3.msra.mxu1 %v4644_v6 }
 0xc46   :  { %6152 = vmatprep.subr.mxu1 %v11489_v44 }
 0xc47   :  { %6153 = vmatpush3.msra.mxu1 %v4643_v16 }
 0xc48   :  { %6154 = vmatprep.subr.mxu1 %v11489_v44 }
 0xc49   :  { %6155 = vmatpush3.msra.mxu1 %v4642_v17 }
 0xc4a   :  { %6156 = vmatprep.subr.mxu1 %v11489_v44 }
 0xc4b   :  { %6157 = vmatpush3.msra.mxu1 %v4641_v14 }
 0xcca   :  { %v4473_v36 = vpop.f32.mrf.mxu0  ;;  %v4402_v13 = vpop.f32.mrf.mxu1 }
 0xccb   :  { %v4403_v26 = vadd.f32 %v4402_v13, %v12020_v31  ;;  %v4474_v29 = vadd.f32 %v4473_v36, %v12023_v18 }
 0xccc   :  { %v6090_v23 = vpop.f32.mrf.mxu0  ;;  %v4404_v5 = vpop.f32.mrf.mxu1 }
 0xccd   :  { %v4405_v63 = vadd.f32 %v4404_v5, %v12027_v30 }
 0xceb   :  { %v4543_v52 = vpop.f32.mrf.mxu1  ;;  %v4614_v53 = vpop.f32.mrf.mxu0 }
 0xcec   :  { %v4618_v22 = vadd.f32 %v4543_v52, %v4403_v26  ;;  %v4632_v32 = vadd.f32 %v11026_v37, %v4614_v53 }
 0xced   :  { %v6125_v42 = vpop.f32.mrf.mxu0  ;;  %v4545_v15 = vpop.f32.mrf.mxu1 }
 0xcee   :  { %v4784_v58 = vmul.f32 -1.442695, %v4618_v22  ;;  %v4625_v61 = vadd.f32 %v4545_v15, %v4405_v63 }
 0xcf0   :  { %6314 = vpow2.f32 %v4784_v58  ;;  %v4785_v45 = vmul.f32 -1.442695, %v4625_v61 }
 0xcf2   :  { %6316 = vpow2.f32 %v4785_v45 }
 0xcfd   :  { %v6315_v44 = vpop.eup %6314 }
 0xcfe   :  { %v4622_v35 = vadd.f32 1.0, %v6315_v44 }
 0xcff   :  { %v6317_v49 = vpop.eup %6316 }
 0xd00   :  { %6318 = vrcp.f32 %v4622_v35  ;;  %v4629_v1 = vadd.f32 1.0, %v6317_v49 }
 0xd02   :  { %6320 = vrcp.f32 %v4629_v1 }
 0xd0d   :  { %v6319_v31 = vpop.eup %6318 }
 0xd0e   :  { %v4633_v3 = vmul.f32 %v6319_v31, %v4632_v32 }
 0xd0f   :  { %v6321_v62 = vpop.eup %6320 }
 0xd10   :  { %v4634_v33 = vadd.f32 %v4633_v3, %v4474_v29  ;;  %v4636_v30 = vsub.f32 1.0, %v6321_v62  ;;  %v4638_v27 = vmul.f32 %v6321_v62, %v11100_v47 }
 0xd12   :  { %6322 = vtanh.f32 %v4634_v33 }
 0xd1f   :  { %v6323_v50 = vpop.eup %6322 }
 0xd20   :  { %v4637_v54 = vmul.f32 %v6323_v50, %v4636_v30 }
 0xd22   :  { %v4639_v46 = vadd.f32 %v4638_v27, %v4637_v54 }
 0xd24   :  { %v4640_v39 = vmax.f32 %v11100_v47, %v4639_v46 }
 0xd26   :  { %6159 = vmatmul.mubr.f32.vlgmr.msra.gmra.mxu1 %v4640_v39 }
 0xde6   :  { %v4723_v40 = vpop.f32.mrf.mxu1 }
 0xde7   :  { %v4724_v37 = vadd.f32 %v12060_v41, %v4723_v40 }
 0xde8   :  { %v6160_v43 = vpop.f32.mrf.mxu1 }
 0xde9   :  { %4727 = vst [vmem:[%s11194_s11 + $0x18] sm:$0xff] %v4724_v37 }

</bundles_post_ra>
